<compile_context>
chip_gen: v6e
topology: v6e:2x2x1
jax: 0.10.0
libtpu: 0.0.40
codegen_flags: <defaults>
</compile_context>

<pallas_src>
import functools

import jax
import jax.numpy as jnp
from jax.experimental import pallas as pl
from jax.experimental.pallas import tpu as pltpu


# ---------------- model hyper-parameters (small demo sizes) ----------------
INPUT_LAYER = 8
OUTPUT_LAYER = 1                       # each head emits 1 value -> concat gives 2 cols
HIDDEN_LAYERS = [128, 128, 128, 128, 128]
N_BATCH = 512                          # demo batch
MAX_TILE_N = 1024                      # upper bound on rows per grid step
OUT_PAD = 128                          # lane-dense output width (real cols are [:, :2])


def _num_tensorcores() -> int:
    """Best-effort TensorCore count per chip (v7x has 2, earlier gens have 1)."""
    try:
        kind = jax.devices()[0].device_kind.lower()
        if "v7" in kind:
            return 2
    except Exception:
        pass
    return 1


def q_model_kernel(x_ref, w0_ref, b0_ref, hw_ref, hb_ref, wf_ref, bf_ref, o_ref,
                   *, num_hidden_stages):
    """Fused MLP forward for one batch tile.

    x_ref : (TILE_N, D_in)   bf16
    w0_ref: (D_in, H) bf16      b0_ref: (1, H) f32
    hw_ref: (L-1, H, H) bf16    hb_ref: (L-1, 1, H) f32
    wf_ref: (H, OUT_PAD) bf16   bf_ref: (1, OUT_PAD) f32  (two heads fused, zero-padded)
    o_ref : (TILE_N, OUT_PAD) f32
    """
    # input layer + relu0 (bf16 matmul, f32 accumulate, f32 elementwise)
    h = jnp.dot(x_ref[...], w0_ref[...], preferred_element_type=jnp.float32)
    h = jnp.maximum(h + b0_ref[...], 0.0)

    # hidden stack: dropout (identity in eval) -> linear -> relu; static unroll
    for l in range(num_hidden_stages):
        h = jnp.dot(h.astype(jnp.bfloat16), hw_ref[l],
                    preferred_element_type=jnp.float32)
        h = jnp.maximum(h + hb_ref[l], 0.0)

    # final dropout (identity) -> both heads fused as one lane-dense matmul
    out = jnp.dot(h.astype(jnp.bfloat16), wf_ref[...],
                  preferred_element_type=jnp.float32) + bf_ref[...]

    # post-processing: column index 1 -> softplus(x) + 1e-6 where negative.
    # exp argument clamped to <= 0 so no inf appears in the unselected branch.
    col_idx = jax.lax.broadcasted_iota(jnp.int32, out.shape, dimension=1)
    neg = out < 0.0
    softplus = jnp.log1p(jnp.exp(jnp.where(neg, out, 0.0))) + 1e-6
    o_ref[...] = jnp.where((col_idx == 1) & neg, softplus, out)


def q_model_forward(x, params, *, max_tile=MAX_TILE_N):
    w0, b0, hw, hb, wf, bf = params
    n, d_in = x.shape
    hidden = hw.shape[-1]
    out_cols = wf.shape[1]               # logical output columns (2)
    num_hidden_stages = hw.shape[0]

    # lane-dense fused head: pad to OUT_PAD lanes so the output writeback is
    # unmasked full-lane stores instead of 2-lane masked stores.
    wf_p = jnp.zeros((hidden, OUT_PAD), wf.dtype).at[:, :out_cols].set(wf)
    bf_p = jnp.zeros((1, OUT_PAD), bf.dtype).at[:, :out_cols].set(bf)

    # generation-aware batch tiling: one big tile per TensorCore
    # (one grid step on single-TC v5e/v6e, an even step count on dual-TC v7x).
    n_cores = _num_tensorcores()
    tile = min(max_tile, pl.cdiv(n, n_cores))
    tile = ((tile + 7) // 8) * 8          # sublane multiple
    n_pad = pl.cdiv(n, tile) * tile

    # cast x to bf16 in the wrapper: half-size x-tile DMA, no in-kernel cast
    x = x.astype(jnp.bfloat16)
    if n_pad != n:
        x = jnp.pad(x, ((0, n_pad - n), (0, 0)))

    kernel = functools.partial(q_model_kernel, num_hidden_stages=num_hidden_stages)

    # weights: full-array block, same block every grid step -> stay resident in VMEM
    def rep(a):
        nd = a.ndim
        return pl.BlockSpec(a.shape, lambda i: (0,) * nd)

    weight_args = (w0, b0, hw, hb, wf_p, bf_p)

    flops = 2 * n_pad * (d_in * hidden
                         + num_hidden_stages * hidden * hidden
                         + hidden * OUT_PAD)
    bytes_accessed = (int(x.size) * x.dtype.itemsize
                      + sum(int(a.size) * a.dtype.itemsize for a in weight_args)
                      + n_pad * OUT_PAD * 4)
    cost = pl.CostEstimate(flops=flops,
                           transcendentals=2 * n_pad * OUT_PAD,
                           bytes_accessed=bytes_accessed)

    out = pl.pallas_call(
        kernel,
        out_shape=jax.ShapeDtypeStruct((n_pad, OUT_PAD), jnp.float32),
        grid=(n_pad // tile,),
        in_specs=[pl.BlockSpec((tile, d_in), lambda i: (i, 0))]
                 + [rep(a) for a in weight_args],
        out_specs=pl.BlockSpec((tile, OUT_PAD), lambda i: (i, 0)),
        compiler_params=pltpu.CompilerParams(
            dimension_semantics=("parallel",)),   # shard batch tiles across v7x TCs
        cost_estimate=cost,
    )(x, *weight_args)
    return out[:n, :out_cols]


def init_params(key):
    """Deterministic init mirroring q_model.init_weights: orthogonal trunk,
    xavier-normal heads, zero biases. Weights stored (in, out); matmul weights
    kept bf16 (MXU-native), biases f32."""
    h = HIDDEN_LAYERS
    keys = jax.random.split(key, 3 + len(h))

    ortho = jax.nn.initializers.orthogonal()
    glorot = jax.nn.initializers.glorot_normal()

    w0 = ortho(keys[0], (INPUT_LAYER, h[0]), jnp.float32).astype(jnp.bfloat16)
    b0 = jnp.zeros((1, h[0]), jnp.float32)

    # NOTE: stacking assumes uniform hidden widths (true for the 128s used here).
    hw = jnp.stack([ortho(keys[1 + i], (h[i], h[i + 1]), jnp.float32)
                    for i in range(len(h) - 1)], axis=0).astype(jnp.bfloat16)
    hb = jnp.zeros((len(h) - 1, 1, h[-1]), jnp.float32)

    # two final heads, concatenated along the output axis (== torch.cat dim=1)
    wf_a = glorot(keys[-2], (h[-1], OUTPUT_LAYER), jnp.float32)
    wf_b = glorot(keys[-1], (h[-1], OUTPUT_LAYER), jnp.float32)
    wf = jnp.concatenate([wf_a, wf_b], axis=1).astype(jnp.bfloat16)
    bf = jnp.zeros((1, 2 * OUTPUT_LAYER), jnp.float32)

    return w0, b0, hw, hb, wf, bf


def q_model_ref(x, params):
    """Pure-JAX reference using the SAME numerics as the kernel (bf16 matmul
    inputs, f32 accumulation) so the comparison is not dominated by dtype drift.
    Returns (postprocessed_out, raw_head_output) — raw is needed to exclude rows
    sitting on the softplus branch discontinuity at 0."""
    w0, b0, hw, hb, wf, bf = params
    h = jnp.dot(x.astype(jnp.bfloat16), w0, preferred_element_type=jnp.float32)
    h = jnp.maximum(h + b0, 0.0)
    for l in range(hw.shape[0]):
        h = jnp.dot(h.astype(jnp.bfloat16), hw[l], preferred_element_type=jnp.float32)
        h = jnp.maximum(h + hb[l], 0.0)
    raw = jnp.dot(h.astype(jnp.bfloat16), wf, preferred_element_type=jnp.float32) + bf
    col1 = raw[:, 1]
    col1 = jnp.where(col1 < 0.0,
                     jnp.log1p(jnp.exp(jnp.minimum(col1, 0.0))) + 1e-6, col1)
    return raw.at[:, 1].set(col1), raw


if __name__ == "__main__":
    key = jax.random.PRNGKey(0)
    k_x, k_p = jax.random.split(key)

    x = jax.random.normal(k_x, (N_BATCH, INPUT_LAYER), jnp.float32)
    params = init_params(k_p)

    out = q_model_forward(x, params)
    jax.block_until_ready(out)

    assert out.shape == (N_BATCH, 2 * OUTPUT_LAYER), out.shape
    assert bool(jnp.all(jnp.isfinite(out)))

    ref, raw = q_model_ref(x, params)
    err = jnp.abs(out - ref)
    # Column 1 has a ~log(2) jump discontinuity at 0 (softplus(0^-)+1e-6 vs 0^+);
    # rows whose pre-activation sits within `band` of 0 are excluded because tiny
    # rounding differences can legitimately put kernel and reference on opposite
    # sides of the branch (this was the source of the previous 0.693 failure).
    band = 1e-3
    err_col1 = jnp.where(jnp.abs(raw[:, 1]) < band, 0.0, err[:, 1])
    max_err = float(jnp.maximum(jnp.max(err[:, 0]), jnp.max(err_col1)))
    assert max_err < 2e-2, f"max abs diff vs reference too large: {max_err}"

    print("KERNEL_OK")
</pallas_src>

<mosaic_0001>
module attributes {stable_mosaic.version = 11 : i64} {
  func.func @q_model_kernel(%arg0: i32, %arg1: memref<512x8xbf16, #tpu.memory_space<vmem>>, %arg2: memref<8x128xbf16, #tpu.memory_space<vmem>>, %arg3: memref<1x128xf32, #tpu.memory_space<vmem>>, %arg4: memref<4x128x128xbf16, #tpu.memory_space<vmem>>, %arg5: memref<4x1x128xf32, #tpu.memory_space<vmem>>, %arg6: memref<128x128xbf16, #tpu.memory_space<vmem>>, %arg7: memref<1x128xf32, #tpu.memory_space<vmem>>, %arg8: memref<512x128xf32, #tpu.memory_space<vmem>>) attributes {dimension_semantics = [#tpu.dimension_semantics<parallel>], iteration_bounds = array<i64: 1>, scalar_prefetch = 0 : i64, scratch_operands = 0 : i64, tpu.core_type = #tpu.core_type<tc>, window_params = [{transform_indices = @transform_0, window_bounds = array<i64: 512, 8>}, {pipeline_mode = #tpu.pipeline_mode<synchronous>, transform_indices = @transform_1, window_bounds = array<i64: 8, 128>}, {pipeline_mode = #tpu.pipeline_mode<synchronous>, transform_indices = @transform_2, window_bounds = array<i64: 1, 128>}, {pipeline_mode = #tpu.pipeline_mode<synchronous>, transform_indices = @transform_3, window_bounds = array<i64: 4, 128, 128>}, {pipeline_mode = #tpu.pipeline_mode<synchronous>, transform_indices = @transform_4, window_bounds = array<i64: 4, 1, 128>}, {pipeline_mode = #tpu.pipeline_mode<synchronous>, transform_indices = @transform_5, window_bounds = array<i64: 128, 128>}, {pipeline_mode = #tpu.pipeline_mode<synchronous>, transform_indices = @transform_6, window_bounds = array<i64: 1, 128>}, {transform_indices = @transform_7, window_bounds = array<i64: 512, 128>}]} {
    %c0 = arith.constant 0 : index
    %c0_0 = arith.constant 0 : index
    %0 = vector.load %arg1[%c0, %c0_0] : memref<512x8xbf16, #tpu.memory_space<vmem>>, vector<512x8xbf16>
    %c0_1 = arith.constant 0 : index
    %c0_2 = arith.constant 0 : index
    %1 = vector.load %arg2[%c0_1, %c0_2] : memref<8x128xbf16, #tpu.memory_space<vmem>>, vector<8x128xbf16>
    %cst = arith.constant dense<0.000000e+00> : vector<512x128xf32>
    %2 = tpu.matmul %0, %1, %cst {dimension_numbers = #tpu.dot_dimension_numbers<[1], [0], [0], [1], [0, 0, 1, 1], [], []>} : vector<512x8xbf16>, vector<8x128xbf16>, vector<512x128xf32> -> vector<512x128xf32>
    %c0_3 = arith.constant 0 : index
    %c0_4 = arith.constant 0 : index
    %3 = vector.load %arg3[%c0_3, %c0_4] : memref<1x128xf32, #tpu.memory_space<vmem>>, vector<1x128xf32>
    %4 = vector.broadcast %3 : vector<1x128xf32> to vector<512x128xf32>
    %5 = arith.addf %2, %4 : vector<512x128xf32>
    %cst_5 = arith.constant 0.000000e+00 : f32
    %6 = vector.broadcast %cst_5 : f32 to vector<512x128xf32>
    %7 = arith.maximumf %5, %6 : vector<512x128xf32>
    %8 = arith.truncf %7 : vector<512x128xf32> to vector<512x128xbf16>
    %c0_6 = arith.constant 0 : index
    %c0_7 = arith.constant 0 : index
    %c0_8 = arith.constant 0 : index
    %9 = vector.load %arg4[%c0_6, %c0_7, %c0_8] : memref<4x128x128xbf16, #tpu.memory_space<vmem>>, vector<1x128x128xbf16>
    %10 = vector.shape_cast %9 : vector<1x128x128xbf16> to vector<128x128xbf16>
    %cst_9 = arith.constant dense<0.000000e+00> : vector<512x128xf32>
    %11 = tpu.matmul %8, %10, %cst_9 {dimension_numbers = #tpu.dot_dimension_numbers<[1], [0], [0], [1], [0, 0, 1, 1], [], []>} : vector<512x128xbf16>, vector<128x128xbf16>, vector<512x128xf32> -> vector<512x128xf32>
    %c0_10 = arith.constant 0 : index
    %c0_11 = arith.constant 0 : index
    %c0_12 = arith.constant 0 : index
    %12 = vector.load %arg5[%c0_10, %c0_11, %c0_12] : memref<4x1x128xf32, #tpu.memory_space<vmem>>, vector<1x1x128xf32>
    %13 = vector.shape_cast %12 : vector<1x1x128xf32> to vector<1x128xf32>
    %14 = vector.broadcast %13 : vector<1x128xf32> to vector<512x128xf32>
    %15 = arith.addf %11, %14 : vector<512x128xf32>
    %cst_13 = arith.constant 0.000000e+00 : f32
    %16 = vector.broadcast %cst_13 : f32 to vector<512x128xf32>
    %17 = arith.maximumf %15, %16 : vector<512x128xf32>
    %18 = arith.truncf %17 : vector<512x128xf32> to vector<512x128xbf16>
    %c1 = arith.constant 1 : index
    %c0_14 = arith.constant 0 : index
    %c0_15 = arith.constant 0 : index
    %19 = vector.load %arg4[%c1, %c0_14, %c0_15] : memref<4x128x128xbf16, #tpu.memory_space<vmem>>, vector<1x128x128xbf16>
    %20 = vector.shape_cast %19 : vector<1x128x128xbf16> to vector<128x128xbf16>
    %cst_16 = arith.constant dense<0.000000e+00> : vector<512x128xf32>
    %21 = tpu.matmul %18, %20, %cst_16 {dimension_numbers = #tpu.dot_dimension_numbers<[1], [0], [0], [1], [0, 0, 1, 1], [], []>} : vector<512x128xbf16>, vector<128x128xbf16>, vector<512x128xf32> -> vector<512x128xf32>
    %c1_17 = arith.constant 1 : index
    %c0_18 = arith.constant 0 : index
    %c0_19 = arith.constant 0 : index
    %22 = vector.load %arg5[%c1_17, %c0_18, %c0_19] : memref<4x1x128xf32, #tpu.memory_space<vmem>>, vector<1x1x128xf32>
    %23 = vector.shape_cast %22 : vector<1x1x128xf32> to vector<1x128xf32>
    %24 = vector.broadcast %23 : vector<1x128xf32> to vector<512x128xf32>
    %25 = arith.addf %21, %24 : vector<512x128xf32>
    %cst_20 = arith.constant 0.000000e+00 : f32
    %26 = vector.broadcast %cst_20 : f32 to vector<512x128xf32>
    %27 = arith.maximumf %25, %26 : vector<512x128xf32>
    %28 = arith.truncf %27 : vector<512x128xf32> to vector<512x128xbf16>
    %c2 = arith.constant 2 : index
    %c0_21 = arith.constant 0 : index
    %c0_22 = arith.constant 0 : index
    %29 = vector.load %arg4[%c2, %c0_21, %c0_22] : memref<4x128x128xbf16, #tpu.memory_space<vmem>>, vector<1x128x128xbf16>
    %30 = vector.shape_cast %29 : vector<1x128x128xbf16> to vector<128x128xbf16>
    %cst_23 = arith.constant dense<0.000000e+00> : vector<512x128xf32>
    %31 = tpu.matmul %28, %30, %cst_23 {dimension_numbers = #tpu.dot_dimension_numbers<[1], [0], [0], [1], [0, 0, 1, 1], [], []>} : vector<512x128xbf16>, vector<128x128xbf16>, vector<512x128xf32> -> vector<512x128xf32>
    %c2_24 = arith.constant 2 : index
    %c0_25 = arith.constant 0 : index
    %c0_26 = arith.constant 0 : index
    %32 = vector.load %arg5[%c2_24, %c0_25, %c0_26] : memref<4x1x128xf32, #tpu.memory_space<vmem>>, vector<1x1x128xf32>
    %33 = vector.shape_cast %32 : vector<1x1x128xf32> to vector<1x128xf32>
    %34 = vector.broadcast %33 : vector<1x128xf32> to vector<512x128xf32>
    %35 = arith.addf %31, %34 : vector<512x128xf32>
    %cst_27 = arith.constant 0.000000e+00 : f32
    %36 = vector.broadcast %cst_27 : f32 to vector<512x128xf32>
    %37 = arith.maximumf %35, %36 : vector<512x128xf32>
    %38 = arith.truncf %37 : vector<512x128xf32> to vector<512x128xbf16>
    %c3 = arith.constant 3 : index
    %c0_28 = arith.constant 0 : index
    %c0_29 = arith.constant 0 : index
    %39 = vector.load %arg4[%c3, %c0_28, %c0_29] : memref<4x128x128xbf16, #tpu.memory_space<vmem>>, vector<1x128x128xbf16>
    %40 = vector.shape_cast %39 : vector<1x128x128xbf16> to vector<128x128xbf16>
    %cst_30 = arith.constant dense<0.000000e+00> : vector<512x128xf32>
    %41 = tpu.matmul %38, %40, %cst_30 {dimension_numbers = #tpu.dot_dimension_numbers<[1], [0], [0], [1], [0, 0, 1, 1], [], []>} : vector<512x128xbf16>, vector<128x128xbf16>, vector<512x128xf32> -> vector<512x128xf32>
    %c3_31 = arith.constant 3 : index
    %c0_32 = arith.constant 0 : index
    %c0_33 = arith.constant 0 : index
    %42 = vector.load %arg5[%c3_31, %c0_32, %c0_33] : memref<4x1x128xf32, #tpu.memory_space<vmem>>, vector<1x1x128xf32>
    %43 = vector.shape_cast %42 : vector<1x1x128xf32> to vector<1x128xf32>
    %44 = vector.broadcast %43 : vector<1x128xf32> to vector<512x128xf32>
    %45 = arith.addf %41, %44 : vector<512x128xf32>
    %cst_34 = arith.constant 0.000000e+00 : f32
    %46 = vector.broadcast %cst_34 : f32 to vector<512x128xf32>
    %47 = arith.maximumf %45, %46 : vector<512x128xf32>
    %48 = arith.truncf %47 : vector<512x128xf32> to vector<512x128xbf16>
    %c0_35 = arith.constant 0 : index
    %c0_36 = arith.constant 0 : index
    %49 = vector.load %arg6[%c0_35, %c0_36] : memref<128x128xbf16, #tpu.memory_space<vmem>>, vector<128x128xbf16>
    %cst_37 = arith.constant dense<0.000000e+00> : vector<512x128xf32>
    %50 = tpu.matmul %48, %49, %cst_37 {dimension_numbers = #tpu.dot_dimension_numbers<[1], [0], [0], [1], [0, 0, 1, 1], [], []>} : vector<512x128xbf16>, vector<128x128xbf16>, vector<512x128xf32> -> vector<512x128xf32>
    %c0_38 = arith.constant 0 : index
    %c0_39 = arith.constant 0 : index
    %51 = vector.load %arg7[%c0_38, %c0_39] : memref<1x128xf32, #tpu.memory_space<vmem>>, vector<1x128xf32>
    %52 = vector.broadcast %51 : vector<1x128xf32> to vector<512x128xf32>
    %53 = arith.addf %50, %52 : vector<512x128xf32>
    %54 = tpu.iota {dimensions = array<i32: 1>} : vector<512x128xi32>
    %cst_40 = arith.constant 0.000000e+00 : f32
    %55 = vector.broadcast %cst_40 : f32 to vector<512x128xf32>
    %56 = arith.cmpf olt, %53, %55 : vector<512x128xf32>
    %cst_41 = arith.constant 0.000000e+00 : f32
    %57 = vector.broadcast %cst_41 : f32 to vector<512x128xf32>
    %58 = arith.select %56, %53, %57 : vector<512x128xi1>, vector<512x128xf32>
    %59 = math.exp %58 : vector<512x128xf32>
    %60 = math.log1p %59 : vector<512x128xf32>
    %cst_42 = arith.constant 9.99999997E-7 : f32
    %61 = vector.broadcast %cst_42 : f32 to vector<512x128xf32>
    %62 = arith.addf %60, %61 : vector<512x128xf32>
    %c1_i32 = arith.constant 1 : i32
    %63 = vector.broadcast %c1_i32 : i32 to vector<512x128xi32>
    %64 = arith.cmpi eq, %54, %63 : vector<512x128xi32>
    %65 = arith.andi %64, %56 : vector<512x128xi1>
    %66 = arith.select %65, %62, %53 : vector<512x128xi1>, vector<512x128xf32>
    %c0_43 = arith.constant 0 : index
    %c0_44 = arith.constant 0 : index
    %67 = vector.load %arg8[%c0_43, %c0_44] : memref<512x128xf32, #tpu.memory_space<vmem>>, vector<512x128xf32>
    tpu.vector_store %arg8[%c0_43, %c0_44], %66 {strides = array<i32>} : memref<512x128xf32, #tpu.memory_space<vmem>>, vector<512x128xf32>,
    return
  }
  func.func @transform_0(%arg0: i32) -> (i32, i32) {
    %c0_i32 = arith.constant 0 : i32
    %c0_i32_0 = arith.constant 0 : i32
    return %arg0, %c0_i32 : i32, i32
  }
  func.func @transform_1(%arg0: i32) -> (i32, i32) {
    %c0_i32 = arith.constant 0 : i32
    %c0_i32_0 = arith.constant 0 : i32
    %c0_i32_1 = arith.constant 0 : i32
    return %c0_i32, %c0_i32_0 : i32, i32
  }
  func.func @transform_2(%arg0: i32) -> (i32, i32) {
    %c0_i32 = arith.constant 0 : i32
    %c0_i32_0 = arith.constant 0 : i32
    %c0_i32_1 = arith.constant 0 : i32
    return %c0_i32, %c0_i32_0 : i32, i32
  }
  func.func @transform_3(%arg0: i32) -> (i32, i32, i32) {
    %c0_i32 = arith.constant 0 : i32
    %c0_i32_0 = arith.constant 0 : i32
    %c0_i32_1 = arith.constant 0 : i32
    %c0_i32_2 = arith.constant 0 : i32
    return %c0_i32, %c0_i32_0, %c0_i32_1 : i32, i32, i32
  }
  func.func @transform_4(%arg0: i32) -> (i32, i32, i32) {
    %c0_i32 = arith.constant 0 : i32
    %c0_i32_0 = arith.constant 0 : i32
    %c0_i32_1 = arith.constant 0 : i32
    %c0_i32_2 = arith.constant 0 : i32
    return %c0_i32, %c0_i32_0, %c0_i32_1 : i32, i32, i32
  }
  func.func @transform_5(%arg0: i32) -> (i32, i32) {
    %c0_i32 = arith.constant 0 : i32
    %c0_i32_0 = arith.constant 0 : i32
    %c0_i32_1 = arith.constant 0 : i32
    return %c0_i32, %c0_i32_0 : i32, i32
  }
  func.func @transform_6(%arg0: i32) -> (i32, i32) {
    %c0_i32 = arith.constant 0 : i32
    %c0_i32_0 = arith.constant 0 : i32
    %c0_i32_1 = arith.constant 0 : i32
    return %c0_i32, %c0_i32_0 : i32, i32
  }
  func.func @transform_7(%arg0: i32) -> (i32, i32) {
    %c0_i32 = arith.constant 0 : i32
    %c0_i32_0 = arith.constant 0 : i32
    return %arg0, %c0_i32 : i32, i32
  }
}

</mosaic_0001>

<bundles_post_ra>
// kernel: tpu_custom_call.1
= control target key start
LH: loop header
LB: loop body
LE: loop exit
PB: predicated region body
PF: predicated region fallthrough
CT: control target
= control target key end

     0   :  { %12 = vsyncpa [#allocation3], 0  ;;  %s7333_s0 = inlined_call_operand.vmem [shape: bf16[512,8], index: 0, kind: input, shape index: {}]   ;;  %s7334_s1 = inlined_call_operand.vmem [shape: bf16[8,128], index: 1, kind: input, shape index: {}]   ;;  %s7335_s2 = inlined_call_operand.vmem [shape: f32[1,128], index: 2, kind: input, shape index: {}]   ;;  %s7336_s3 = inlined_call_operand.vmem [shape: bf16[4,128,128], index: 3, kind: input, shape index: {}]   ;;  %s7337_s4 = inlined_call_operand.vmem [shape: f32[4,1,128], index: 4, kind: input, shape index: {}]   ;;  %s7338_s5 = inlined_call_operand.hbm [shape: bf16[128,128], index: 5, kind: input, shape index: {}]   ;;  %s7339_s6 = inlined_call_operand.vmem [shape: f32[1,128], index: 6, kind: input, shape index: {}]   ;;  %s7340_s7 = inlined_call_operand.hbm [shape: f32[512,128], index: 7, kind: output, shape index: {}]  }
   0x1   :  { %13 = vsyncpa [#allocation4], 0  ;;  %s5315_s24 = smov [#allocation2]  }
   0x2   :  { %s29_s25 = sshll.u32 %s5315_s24, 4  ;;  %s30_s25 = int_to_ptr.vmem [resolvable:$true] %s29_s25 }
   0x3   :  { %s5279_s26 = scalar_lea.vmem %s30_s25, 1024  ;;  %p5284_p1 = scmp.lt.s32.totalorder %s30_s25, %s30_s25 }
   0x4   :  { %p5280_p0 = scmp.ne.s32.totalorder %s30_s25, %s5279_s26  ;;  %p5285_p2 = scmp.lt.s32.totalorder %s5279_s26, %s5279_s26 }
   0x6   :  { %p5286_p3 = por %p5285_p2, %p5284_p1 }
   0x8   :  { %p5287_p4 = pnand %p5286_p3, %p5280_p0 }
   0xa   :  { %5290 = shalt.err (!%p5287_p4)
}
   0xb   :  { %s5316_s27 = smov 64   ;;  %s5317_s28 = smov 4  }
   0xc   :  { %35 = dma.hbm_to_vmem [thread:$0]  %s7338_s5, 1024, %s30_s25, [#allocation3], %s5316_s27, %s5316_s27, %s5317_s28  }
   0xd   :  { %5311 = dma.done.wait [#allocation3], 1024  }
   0xe   :  { %5312 = vsyncadd [#allocation3], 4294966272  ;;  %vm371_vm0 = vcmask 1043456   ;;  %vm274_vm1 = vcmask 64512   ;;  %v106_v0 = vld [vmem:[%s7334_s1] sm:$0xf] }
   0xf   :  { %4934 = vmatprep.subr.msk.bf16.mxu0 %vm371_vm0, %v106_v0  ;;  %v373_v1 = vsel %vm371_vm0, %v106_v0, 0  ;;  %v4941_v2 = vld [vmem:[%s7333_s0] sm:$0xff]   ;;  %v4942_v3 = vld [vmem:[%s7333_s0 + $0x8] sm:$0xff]   ;;  %v4943_v4 = vld [vmem:[%s7333_s0 + $0x10] sm:$0xff]  }
  0x10   :  { %4453 = vmatpush3.bf16.msra.mxu0 %v373_v1  ;;  %4454 = vmatprep.mubr.msk.bf16.mxu0 %vm274_vm1, %v4941_v2  ;;  %v4944_v5 = vld [vmem:[%s7333_s0 + $0x18] sm:$0xff]   ;;  %v4945_v6 = vld [vmem:[%s7333_s0 + $0x20] sm:$0xff]   ;;  %v4946_v7 = vld [vmem:[%s7333_s0 + $0x28] sm:$0xff]  }
  0x11   :  { %v4947_v8 = vld [vmem:[%s7333_s0 + $0x30] sm:$0xff]   ;;  %v4948_v9 = vld [vmem:[%s7333_s0 + $0x38] sm:$0xff]   ;;  %v4949_v10 = vld [vmem:[%s7333_s0 + $0x40] sm:$0xff]  }
  0x12   :  { %v4950_v11 = vld [vmem:[%s7333_s0 + $0x48] sm:$0xff]   ;;  %v4951_v12 = vld [vmem:[%s7333_s0 + $0x50] sm:$0xff]   ;;  %v4973_v13 = vld [vmem:[%s7336_s3 + $0x38] sm:$0xff]  }
  0x13   :  { %4455 = vmatmul.mubr.msk.bf16.vlgmr.msra.gmra.mxu0 %vm274_vm1, %v4942_v3  ;;  %v4974_v14 = vld [vmem:[%s7336_s3 + $0x30] sm:$0xff]   ;;  %4518 = vmatprep.subr.bf16.mxu1 %v4973_v13  ;;  %v4975_v15 = vld [vmem:[%s7336_s3 + $0x28] sm:$0xff]   ;;  %v4952_v16 = vld [vmem:[%s7333_s0 + $0x58] sm:$0xff]  }
  0x14   :  { %4458 = vmatprep.mubr.msk.bf16.mxu0 %vm274_vm1, %v4943_v4  ;;  %4519 = vmatpush3.bf16.msra.mxu1 %v4973_v13  ;;  %v4976_v17 = vld [vmem:[%s7336_s3 + $0x20] sm:$0xff]   ;;  %v4977_v19 = vld [vmem:[%s7336_s3 + $0x18] sm:$0xff]   ;;  %v4954_v20 = vld [vmem:[%s7333_s0 + $0x68] sm:$0xff]  }
  0x15   :  { %4520 = vmatprep.subr.bf16.mxu1 %v4974_v14  ;;  %v4953_v18 = vld [vmem:[%s7333_s0 + $0x60] sm:$0xff]   ;;  %v4955_v21 = vld [vmem:[%s7333_s0 + $0x70] sm:$0xff]   ;;  %v4956_v22 = vld [vmem:[%s7333_s0 + $0x78] sm:$0xff]  }
  0x16   :  { %v4957_v23 = vld [vmem:[%s7333_s0 + $0x80] sm:$0xff]   ;;  %v4958_v24 = vld [vmem:[%s7333_s0 + $0x88] sm:$0xff]   ;;  %v4959_v25 = vld [vmem:[%s7333_s0 + $0x90] sm:$0xff]  }
  0x17   :  { %v4978_v26 = vld [vmem:[%s7336_s3 + $0x10] sm:$0xff]   ;;  %v4960_v27 = vld [vmem:[%s7333_s0 + $0x98] sm:$0xff]   ;;  %v4979_v28 = vld [vmem:[%s7336_s3 + $0x8] sm:$0xff]  }
  0x18   :  { %4521 = vmatpush3.bf16.msra.mxu1 %v4974_v14  ;;  %v4961_v29 = vld [vmem:[%s7333_s0 + $0xa0] sm:$0xff]   ;;  %v4962_v31 = vld [vmem:[%s7333_s0 + $0xa8] sm:$0xff]   ;;  %v4963_v32 = vld [vmem:[%s7333_s0 + $0xb0] sm:$0xff]  }
  0x19   :  { %4522 = vmatprep.subr.bf16.mxu1 %v4975_v15  ;;  %v4980_v30 = vld [vmem:[%s7336_s3] sm:$0xff]   ;;  %v4964_v33 = vld [vmem:[%s7333_s0 + $0xb8] sm:$0xff]   ;;  %v4966_v35 = vld [vmem:[%s7333_s0 + $0xc8] sm:$0xff]  }
  0x1a   :  { %v4965_v34 = vld [vmem:[%s7333_s0 + $0xc0] sm:$0xff]   ;;  %v4967_v36 = vld [vmem:[%s7333_s0 + $0xd0] sm:$0xff]   ;;  %v4968_v37 = vld [vmem:[%s7333_s0 + $0xd8] sm:$0xff]  }
  0x1b   :  { %4459 = vmatmul.mubr.msk.bf16.gmra.mxu0 %vm274_vm1, %v4944_v5  ;;  %v4969_v38 = vld [vmem:[%s7333_s0 + $0xe0] sm:$0xff]   ;;  %v4970_v39 = vld [vmem:[%s7333_s0 + $0xe8] sm:$0xff]   ;;  %v4971_v40 = vld [vmem:[%s7333_s0 + $0xf0] sm:$0xff]  }
  0x1c   :  { %4462 = vmatprep.mubr.msk.bf16.mxu0 %vm274_vm1, %v4945_v6  ;;  %4523 = vmatpush3.bf16.msra.mxu1 %v4975_v15  ;;  %v4972_v41 = vld [vmem:[%s7333_s0 + $0xf8] sm:$0xff]   ;;  %v4982_v43 = vld [vmem:[%s7336_s3 + $0x70] sm:$0xff]   ;;  %v4983_v44 = vld [vmem:[%s7336_s3 + $0x68] sm:$0xff]  }
  0x1d   :  { %4524 = vmatprep.subr.bf16.mxu1 %v4976_v17  ;;  %v4981_v42 = vld [vmem:[%s7336_s3 + $0x78] sm:$0xff]   ;;  %v5531_v47 = vld [vmem:[%s7335_s2] ss:$0 sm:$0xff]  ;;  %v4986_v62 = vld [vmem:[%s7336_s3 + $0x50] sm:$0xff]  }
  0x1e   :  { %4598 = vmatprep.subr.bf16.mxu0 %v4981_v42  ;;  %v4984_v53 = vld [vmem:[%s7336_s3 + $0x60] sm:$0xff]   ;;  %v4985_v54 = vld [vmem:[%s7336_s3 + $0x58] sm:$0xff]   ;;  %v4987_v6 = vld [vmem:[%s7336_s3 + $0x48] sm:$0xff]  }
  0x1f   :  { %4599 = vmatpush3.bf16.msra.mxu0 %v4981_v42  ;;  %v4988_v14 = vld [vmem:[%s7336_s3 + $0x40] sm:$0xff]  }
  0x20   :  { %4525 = vmatpush3.bf16.msra.mxu1 %v4976_v17  ;;  %4600 = vmatprep.subr.bf16.mxu0 %v4982_v43 }
  0x21   :  { %4526 = vmatprep.subr.bf16.mxu1 %v4977_v19 }
  0x23   :  { %4463 = vmatmul.mubr.msk.bf16.gmra.mxu0 %vm274_vm1, %v4946_v7 }
  0x24   :  { %4466 = vmatprep.mubr.msk.bf16.mxu0 %vm274_vm1, %v4947_v8  ;;  %4527 = vmatpush3.bf16.msra.mxu1 %v4977_v19 }
  0x25   :  { %4528 = vmatprep.subr.bf16.mxu1 %v4978_v26  ;;  %4601 = vmatpush3.bf16.msra.mxu0 %v4982_v43 }
  0x26   :  { %4602 = vmatprep.subr.bf16.mxu0 %v4983_v44 }
  0x28   :  { %4529 = vmatpush3.bf16.msra.mxu1 %v4978_v26 }
  0x29   :  { %4530 = vmatprep.subr.bf16.mxu1 %v4979_v28  ;;  %4603 = vmatpush3.bf16.msra.mxu0 %v4983_v44 }
  0x2a   :  { %4604 = vmatprep.subr.bf16.mxu0 %v4984_v53 }
  0x2b   :  { %4467 = vmatmul.mubr.msk.bf16.gmra.mxu0 %vm274_vm1, %v4948_v9 }
  0x2c   :  { %4470 = vmatprep.mubr.msk.bf16.mxu0 %vm274_vm1, %v4949_v10  ;;  %4531 = vmatpush3.bf16.msra.mxu1 %v4979_v28 }
  0x2d   :  { %4532 = vmatprep.subr.bf16.mxu1 %v4980_v30  ;;  %4605 = vmatpush3.bf16.msra.mxu0 %v4984_v53 }
  0x2e   :  { %4606 = vmatprep.subr.bf16.mxu0 %v4985_v54 }
  0x30   :  { %4533 = vmatpush3.bf16.msra.mxu1 %v4980_v30 }
  0x31   :  { %4607 = vmatpush3.bf16.msra.mxu0 %v4985_v54 }
  0x32   :  { %4608 = vmatprep.subr.bf16.mxu0 %v4986_v62 }
  0x33   :  { %4471 = vmatmul.mubr.msk.bf16.gmra.mxu0 %vm274_vm1, %v4950_v11 }
  0x34   :  { %4474 = vmatprep.mubr.msk.bf16.mxu0 %vm274_vm1, %v4951_v12 }
  0x35   :  { %4609 = vmatpush3.bf16.msra.mxu0 %v4986_v62 }
  0x36   :  { %4610 = vmatprep.subr.bf16.mxu0 %v4987_v6 }
  0x39   :  { %4611 = vmatpush3.bf16.msra.mxu0 %v4987_v6 }
  0x3a   :  { %4612 = vmatprep.subr.bf16.mxu0 %v4988_v14 }
  0x3b   :  { %4475 = vmatmul.mubr.msk.bf16.gmra.mxu0 %vm274_vm1, %v4952_v16 }
  0x3c   :  { %4478 = vmatprep.mubr.msk.bf16.mxu0 %vm274_vm1, %v4953_v18 }
  0x3d   :  { %4613 = vmatpush3.bf16.msra.mxu0 %v4988_v14 }
  0x43   :  { %4479 = vmatmul.mubr.msk.bf16.gmra.mxu0 %vm274_vm1, %v4954_v20 }
  0x44   :  { %4482 = vmatprep.mubr.msk.bf16.mxu0 %vm274_vm1, %v4955_v21 }
  0x4b   :  { %4483 = vmatmul.mubr.msk.bf16.gmra.mxu0 %vm274_vm1, %v4956_v22 }
  0x4c   :  { %4486 = vmatprep.mubr.msk.bf16.mxu0 %vm274_vm1, %v4957_v23 }
  0x53   :  { %4487 = vmatmul.mubr.msk.bf16.gmra.mxu0 %vm274_vm1, %v4958_v24 }
  0x54   :  { %4490 = vmatprep.mubr.msk.bf16.mxu0 %vm274_vm1, %v4959_v25 }
  0x5b   :  { %4491 = vmatmul.mubr.msk.bf16.gmra.mxu0 %vm274_vm1, %v4960_v27 }
  0x5c   :  { %4494 = vmatprep.mubr.msk.bf16.mxu0 %vm274_vm1, %v4961_v29 }
  0x63   :  { %4495 = vmatmul.mubr.msk.bf16.gmra.mxu0 %vm274_vm1, %v4962_v31 }
  0x64   :  { %4498 = vmatprep.mubr.msk.bf16.mxu0 %vm274_vm1, %v4963_v32 }
  0x6b   :  { %4499 = vmatmul.mubr.msk.bf16.gmra.mxu0 %vm274_vm1, %v4964_v33 }
  0x6c   :  { %4502 = vmatprep.mubr.msk.bf16.mxu0 %vm274_vm1, %v4965_v34 }
  0x73   :  { %4503 = vmatmul.mubr.msk.bf16.gmra.mxu0 %vm274_vm1, %v4966_v35 }
  0x74   :  { %4506 = vmatprep.mubr.msk.bf16.mxu0 %vm274_vm1, %v4967_v36 }
  0x7b   :  { %4507 = vmatmul.mubr.msk.bf16.gmra.mxu0 %vm274_vm1, %v4968_v37 }
  0x7c   :  { %4510 = vmatprep.mubr.msk.bf16.mxu0 %vm274_vm1, %v4969_v38 }
  0x83   :  { %4511 = vmatmul.mubr.msk.bf16.gmra.mxu0 %vm274_vm1, %v4970_v39 }
  0x84   :  { %4514 = vmatprep.mubr.msk.bf16.mxu0 %vm274_vm1, %v4971_v40 }
  0x8b   :  { %4515 = vmatmul.mubr.msk.bf16.gmra.mxu0 %vm274_vm1, %v4972_v41 }
  0xd3   :  { %v4456_v45 = vpop.f32.mrf.mxu0 }
  0xd4   :  { %v418_v51 = vadd.f32 %v4456_v45, %v5531_v47 }
  0xd5   :  { %v409_v46 = vpop.f32.mrf.mxu0 }
  0xd6   :  { %v410_v49 = vadd.f32 %v5531_v47, %v409_v46  ;;  %v666_v60 = vmax.f32 %v418_v51, 0.0 }
  0xd7   :  { %v4457_v48 = vpop.f32.mrf.mxu0 }
  0xd8   :  { %v421_v50 = vadd.f32 %v4457_v48, %v5531_v47  ;;  %v664_v58 = vmax.f32 %v410_v49, 0.0 }
  0xd9   :  { %v412_v52 = vpop.f32.mrf.mxu0 }
  0xda   :  { %v413_v55 = vadd.f32 %v5531_v47, %v412_v52  ;;  %v667_v56 = vmax.f32 %v421_v50, 0.0 }
  0xdb   :  { %v4460_v57 = vpop.f32.mrf.mxu0 }
  0xdc   :  { %v665_v59 = vmax.f32 %v413_v55, 0.0  ;;  %v729_v0 = vpack.c.bf16 %v667_v56, %v666_v60  ;;  %v434_v4 = vadd.f32 %v4460_v57, %v5531_v47 }
  0xdd   :  { %v425_v61 = vpop.f32.mrf.mxu0 }
  0xde   :  { %v728_v63 = vpack.c.bf16 %v665_v59, %v664_v58  ;;  %v426_v2 = vadd.f32 %v5531_v47, %v425_v61  ;;  %v670_v12 = vmax.f32 %v434_v4, 0.0 }
  0xdf   :  { %v4461_v1 = vpop.f32.mrf.mxu0 }
  0xe0   :  { %v437_v3 = vadd.f32 %v4461_v1, %v5531_v47  ;;  %4534 = vmatprep.mubr.bf16.mxu1 %v728_v63  ;;  %v668_v10 = vmax.f32 %v426_v2, 0.0 }
  0xe1   :  { %v428_v5 = vpop.f32.mrf.mxu0  ;;  %4535 = vmatmul.mubr.bf16.vlgmr.msra.gmra.mxu1 %v729_v0 }
  0xe2   :  { %v429_v7 = vadd.f32 %v5531_v47, %v428_v5  ;;  %v671_v8 = vmax.f32 %v437_v3, 0.0 }
  0xe3   :  { %v4464_v9 = vpop.f32.mrf.mxu0 }
  0xe4   :  { %v669_v11 = vmax.f32 %v429_v7, 0.0  ;;  %v731_v16 = vpack.c.bf16 %v671_v8, %v670_v12  ;;  %v450_v20 = vadd.f32 %v4464_v9, %v5531_v47 }
  0xe5   :  { %v441_v13 = vpop.f32.mrf.mxu0 }
  0xe6   :  { %v730_v15 = vpack.c.bf16 %v669_v11, %v668_v10  ;;  %v442_v18 = vadd.f32 %v5531_v47, %v441_v13  ;;  %v674_v27 = vmax.f32 %v450_v20, 0.0 }
  0xe7   :  { %v4465_v17 = vpop.f32.mrf.mxu0 }
  0xe8   :  { %v453_v19 = vadd.f32 %v4465_v17, %v5531_v47  ;;  %4538 = vmatprep.mubr.bf16.mxu1 %v730_v15  ;;  %v672_v25 = vmax.f32 %v442_v18, 0.0 }
  0xe9   :  { %v444_v21 = vpop.f32.mrf.mxu0  ;;  %4539 = vmatmul.mubr.bf16.gmra.mxu1 %v731_v16 }
  0xea   :  { %v445_v22 = vadd.f32 %v5531_v47, %v444_v21  ;;  %v675_v23 = vmax.f32 %v453_v19, 0.0 }
  0xeb   :  { %v4468_v24 = vpop.f32.mrf.mxu0 }
  0xec   :  { %v673_v26 = vmax.f32 %v445_v22, 0.0  ;;  %v733_v30 = vpack.c.bf16 %v675_v23, %v674_v27  ;;  %v466_v34 = vadd.f32 %v4468_v24, %v5531_v47 }
  0xed   :  { %v457_v28 = vpop.f32.mrf.mxu0 }
  0xee   :  { %v732_v29 = vpack.c.bf16 %v673_v26, %v672_v25  ;;  %v458_v32 = vadd.f32 %v5531_v47, %v457_v28  ;;  %v678_v41 = vmax.f32 %v466_v34, 0.0 }
  0xef   :  { %v4469_v31 = vpop.f32.mrf.mxu0 }
  0xf0   :  { %v469_v33 = vadd.f32 %v4469_v31, %v5531_v47  ;;  %4542 = vmatprep.mubr.bf16.mxu1 %v732_v29  ;;  %v676_v39 = vmax.f32 %v458_v32, 0.0 }
  0xf1   :  { %v460_v35 = vpop.f32.mrf.mxu0  ;;  %4543 = vmatmul.mubr.bf16.gmra.mxu1 %v733_v30 }
  0xf2   :  { %v461_v36 = vadd.f32 %v5531_v47, %v460_v35  ;;  %v679_v37 = vmax.f32 %v469_v33, 0.0 }
  0xf3   :  { %v4472_v38 = vpop.f32.mrf.mxu0 }
  0xf4   :  { %v677_v40 = vmax.f32 %v461_v36, 0.0  ;;  %v735_v44 = vpack.c.bf16 %v679_v37, %v678_v41  ;;  %v482_v49 = vadd.f32 %v4472_v38, %v5531_v47 }
  0xf5   :  { %v473_v42 = vpop.f32.mrf.mxu0 }
  0xf6   :  { %v734_v43 = vpack.c.bf16 %v677_v40, %v676_v39  ;;  %v474_v46 = vadd.f32 %v5531_v47, %v473_v42  ;;  %v682_v56 = vmax.f32 %v482_v49, 0.0 }
  0xf7   :  { %v4473_v45 = vpop.f32.mrf.mxu0 }
  0xf8   :  { %v485_v48 = vadd.f32 %v4473_v45, %v5531_v47  ;;  %4546 = vmatprep.mubr.bf16.mxu1 %v734_v43  ;;  %v680_v54 = vmax.f32 %v474_v46, 0.0 }
  0xf9   :  { %v476_v50 = vpop.f32.mrf.mxu0  ;;  %4547 = vmatmul.mubr.bf16.gmra.mxu1 %v735_v44 }
  0xfa   :  { %v477_v51 = vadd.f32 %v5531_v47, %v476_v50  ;;  %v683_v52 = vmax.f32 %v485_v48, 0.0 }
  0xfb   :  { %v4476_v53 = vpop.f32.mrf.mxu0 }
  0xfc   :  { %v681_v55 = vmax.f32 %v477_v51, 0.0  ;;  %v737_v59 = vpack.c.bf16 %v683_v52, %v682_v56  ;;  %v498_v63 = vadd.f32 %v4476_v53, %v5531_v47 }
  0xfd   :  { %v489_v57 = vpop.f32.mrf.mxu0 }
  0xfe   :  { %v736_v58 = vpack.c.bf16 %v681_v55, %v680_v54  ;;  %v490_v61 = vadd.f32 %v5531_v47, %v489_v57  ;;  %v686_v6 = vmax.f32 %v498_v63, 0.0 }
  0xff   :  { %v4477_v60 = vpop.f32.mrf.mxu0 }
 0x100   :  { %v501_v62 = vadd.f32 %v4477_v60, %v5531_v47  ;;  %4550 = vmatprep.mubr.bf16.mxu1 %v736_v58  ;;  %v684_v4 = vmax.f32 %v490_v61, 0.0 }
 0x101   :  { %v492_v0 = vpop.f32.mrf.mxu0  ;;  %4551 = vmatmul.mubr.bf16.gmra.mxu1 %v737_v59 }
 0x102   :  { %v493_v1 = vadd.f32 %v5531_v47, %v492_v0  ;;  %v687_v2 = vmax.f32 %v501_v62, 0.0 }
 0x103   :  { %v4480_v3 = vpop.f32.mrf.mxu0 }
 0x104   :  { %v685_v5 = vmax.f32 %v493_v1, 0.0  ;;  %v739_v9 = vpack.c.bf16 %v687_v2, %v686_v6  ;;  %v514_v13 = vadd.f32 %v4480_v3, %v5531_v47 }
 0x105   :  { %v505_v7 = vpop.f32.mrf.mxu0 }
 0x106   :  { %v738_v8 = vpack.c.bf16 %v685_v5, %v684_v4  ;;  %v506_v11 = vadd.f32 %v5531_v47, %v505_v7  ;;  %v690_v20 = vmax.f32 %v514_v13, 0.0 }
 0x107   :  { %v4481_v10 = vpop.f32.mrf.mxu0 }
 0x108   :  { %v517_v12 = vadd.f32 %v4481_v10, %v5531_v47  ;;  %4554 = vmatprep.mubr.bf16.mxu1 %v738_v8  ;;  %v688_v18 = vmax.f32 %v506_v11, 0.0 }
 0x109   :  { %v508_v14 = vpop.f32.mrf.mxu0  ;;  %4555 = vmatmul.mubr.bf16.gmra.mxu1 %v739_v9 }
 0x10a   :  { %v509_v15 = vadd.f32 %v5531_v47, %v508_v14  ;;  %v691_v16 = vmax.f32 %v517_v12, 0.0 }
 0x10b   :  { %v4484_v17 = vpop.f32.mrf.mxu0 }
 0x10c   :  { %v689_v19 = vmax.f32 %v509_v15, 0.0  ;;  %v741_v23 = vpack.c.bf16 %v691_v16, %v690_v20  ;;  %v530_v27 = vadd.f32 %v4484_v17, %v5531_v47 }
 0x10d   :  { %v521_v21 = vpop.f32.mrf.mxu0 }
 0x10e   :  { %v740_v22 = vpack.c.bf16 %v689_v19, %v688_v18  ;;  %v522_v25 = vadd.f32 %v5531_v47, %v521_v21  ;;  %v694_v34 = vmax.f32 %v530_v27, 0.0 }
 0x10f   :  { %v4485_v24 = vpop.f32.mrf.mxu0 }
 0x110   :  { %v533_v26 = vadd.f32 %v4485_v24, %v5531_v47  ;;  %4558 = vmatprep.mubr.bf16.mxu1 %v740_v22  ;;  %v692_v32 = vmax.f32 %v522_v25, 0.0 }
 0x111   :  { %v524_v28 = vpop.f32.mrf.mxu0  ;;  %4559 = vmatmul.mubr.bf16.gmra.mxu1 %v741_v23 }
 0x112   :  { %v525_v29 = vadd.f32 %v5531_v47, %v524_v28  ;;  %v695_v30 = vmax.f32 %v533_v26, 0.0 }
 0x113   :  { %v4488_v31 = vpop.f32.mrf.mxu0 }
 0x114   :  { %v693_v33 = vmax.f32 %v525_v29, 0.0  ;;  %v743_v37 = vpack.c.bf16 %v695_v30, %v694_v34  ;;  %v546_v41 = vadd.f32 %v4488_v31, %v5531_v47 }
 0x115   :  { %v537_v35 = vpop.f32.mrf.mxu0 }
 0x116   :  { %v742_v36 = vpack.c.bf16 %v693_v33, %v692_v32  ;;  %v538_v39 = vadd.f32 %v5531_v47, %v537_v35  ;;  %v698_v49 = vmax.f32 %v546_v41, 0.0 }
 0x117   :  { %v4489_v38 = vpop.f32.mrf.mxu0 }
 0x118   :  { %v549_v40 = vadd.f32 %v4489_v38, %v5531_v47  ;;  %4562 = vmatprep.mubr.bf16.mxu1 %v742_v36  ;;  %v696_v46 = vmax.f32 %v538_v39, 0.0 }
 0x119   :  { %v540_v42 = vpop.f32.mrf.mxu0  ;;  %4563 = vmatmul.mubr.bf16.gmra.mxu1 %v743_v37 }
 0x11a   :  { %v541_v43 = vadd.f32 %v5531_v47, %v540_v42  ;;  %v699_v44 = vmax.f32 %v549_v40, 0.0 }
 0x11b   :  { %v4492_v45 = vpop.f32.mrf.mxu0 }
 0x11c   :  { %v697_v48 = vmax.f32 %v541_v43, 0.0  ;;  %v745_v52 = vpack.c.bf16 %v699_v44, %v698_v49  ;;  %v562_v56 = vadd.f32 %v4492_v45, %v5531_v47 }
 0x11d   :  { %v553_v50 = vpop.f32.mrf.mxu0 }
 0x11e   :  { %v744_v51 = vpack.c.bf16 %v697_v48, %v696_v46  ;;  %v554_v54 = vadd.f32 %v5531_v47, %v553_v50  ;;  %v702_v63 = vmax.f32 %v562_v56, 0.0 }
 0x11f   :  { %v4493_v53 = vpop.f32.mrf.mxu0 }
 0x120   :  { %v565_v55 = vadd.f32 %v4493_v53, %v5531_v47  ;;  %4566 = vmatprep.mubr.bf16.mxu1 %v744_v51  ;;  %v700_v61 = vmax.f32 %v554_v54, 0.0 }
 0x121   :  { %v556_v57 = vpop.f32.mrf.mxu0  ;;  %4567 = vmatmul.mubr.bf16.gmra.mxu1 %v745_v52 }
 0x122   :  { %v557_v58 = vadd.f32 %v5531_v47, %v556_v57  ;;  %v703_v59 = vmax.f32 %v565_v55, 0.0 }
 0x123   :  { %v4496_v60 = vpop.f32.mrf.mxu0 }
 0x124   :  { %v701_v62 = vmax.f32 %v557_v58, 0.0  ;;  %v747_v2 = vpack.c.bf16 %v703_v59, %v702_v63  ;;  %v578_v6 = vadd.f32 %v4496_v60, %v5531_v47 }
 0x125   :  { %v569_v0 = vpop.f32.mrf.mxu0 }
 0x126   :  { %v746_v1 = vpack.c.bf16 %v701_v62, %v700_v61  ;;  %v570_v4 = vadd.f32 %v5531_v47, %v569_v0  ;;  %v706_v13 = vmax.f32 %v578_v6, 0.0 }
 0x127   :  { %v4497_v3 = vpop.f32.mrf.mxu0 }
 0x128   :  { %v581_v5 = vadd.f32 %v4497_v3, %v5531_v47  ;;  %4570 = vmatprep.mubr.bf16.mxu1 %v746_v1  ;;  %v704_v11 = vmax.f32 %v570_v4, 0.0 }
 0x129   :  { %v572_v7 = vpop.f32.mrf.mxu0  ;;  %4571 = vmatmul.mubr.bf16.gmra.mxu1 %v747_v2 }
 0x12a   :  { %v573_v8 = vadd.f32 %v5531_v47, %v572_v7  ;;  %v707_v9 = vmax.f32 %v581_v5, 0.0 }
 0x12b   :  { %v4500_v10 = vpop.f32.mrf.mxu0 }
 0x12c   :  { %v705_v12 = vmax.f32 %v573_v8, 0.0  ;;  %v749_v16 = vpack.c.bf16 %v707_v9, %v706_v13  ;;  %v594_v20 = vadd.f32 %v4500_v10, %v5531_v47 }
 0x12d   :  { %v585_v14 = vpop.f32.mrf.mxu0 }
 0x12e   :  { %v748_v15 = vpack.c.bf16 %v705_v12, %v704_v11  ;;  %v586_v18 = vadd.f32 %v5531_v47, %v585_v14  ;;  %v710_v27 = vmax.f32 %v594_v20, 0.0 }
 0x12f   :  { %v4501_v17 = vpop.f32.mrf.mxu0 }
 0x130   :  { %v597_v19 = vadd.f32 %v4501_v17, %v5531_v47  ;;  %4574 = vmatprep.mubr.bf16.mxu1 %v748_v15  ;;  %v708_v25 = vmax.f32 %v586_v18, 0.0 }
 0x131   :  { %v588_v21 = vpop.f32.mrf.mxu0  ;;  %4575 = vmatmul.mubr.bf16.gmra.mxu1 %v749_v16 }
 0x132   :  { %v589_v22 = vadd.f32 %v5531_v47, %v588_v21  ;;  %v711_v23 = vmax.f32 %v597_v19, 0.0 }
 0x133   :  { %v4504_v24 = vpop.f32.mrf.mxu0 }
 0x134   :  { %v709_v26 = vmax.f32 %v589_v22, 0.0  ;;  %v751_v30 = vpack.c.bf16 %v711_v23, %v710_v27  ;;  %v610_v34 = vadd.f32 %v4504_v24, %v5531_v47  ;;  %v4989_v22 = vld [vmem:[%s7336_s3 + $0xb8] sm:$0xff]   ;;  %v4990_v23 = vld [vmem:[%s7336_s3 + $0xb0] sm:$0xff]  }
 0x135   :  { %v601_v28 = vpop.f32.mrf.mxu0  ;;  %4678 = vmatprep.subr.bf16.mxu1 %v4989_v22 }
 0x136   :  { %v750_v29 = vpack.c.bf16 %v709_v26, %v708_v25  ;;  %v602_v32 = vadd.f32 %v5531_v47, %v601_v28  ;;  %v714_v41 = vmax.f32 %v610_v34, 0.0  ;;  %4679 = vmatpush3.bf16.msra.mxu1 %v4989_v22  ;;  %v5624_v26 = vld [vmem:[%s7337_s4] ss:$0 sm:$0xff] }
 0x137   :  { %v4505_v31 = vpop.f32.mrf.mxu0  ;;  %4680 = vmatprep.subr.bf16.mxu1 %v4990_v23 }
 0x138   :  { %v613_v33 = vadd.f32 %v4505_v31, %v5531_v47  ;;  %4578 = vmatprep.mubr.bf16.mxu1 %v750_v29  ;;  %v712_v39 = vmax.f32 %v602_v32, 0.0  ;;  %v4992_v32 = vld [vmem:[%s7336_s3 + $0xa0] sm:$0xff]  }
 0x139   :  { %v604_v35 = vpop.f32.mrf.mxu0  ;;  %4579 = vmatmul.mubr.bf16.gmra.mxu1 %v751_v30 }
 0x13a   :  { %v605_v36 = vadd.f32 %v5531_v47, %v604_v35  ;;  %v715_v37 = vmax.f32 %v613_v33, 0.0  ;;  %4681 = vmatpush3.bf16.msra.mxu1 %v4990_v23  ;;  %v4993_v33 = vld [vmem:[%s7336_s3 + $0x98] sm:$0xff]  }
 0x13b   :  { %v4508_v38 = vpop.f32.mrf.mxu0 }
 0x13c   :  { %v713_v40 = vmax.f32 %v605_v36, 0.0  ;;  %v753_v44 = vpack.c.bf16 %v715_v37, %v714_v41  ;;  %v626_v49 = vadd.f32 %v4508_v38, %v5531_v47  ;;  %v4994_v41 = vld [vmem:[%s7336_s3 + $0x90] sm:$0xff]  }
 0x13d   :  { %v617_v42 = vpop.f32.mrf.mxu0 }
 0x13e   :  { %v752_v43 = vpack.c.bf16 %v713_v40, %v712_v39  ;;  %v618_v46 = vadd.f32 %v5531_v47, %v617_v42  ;;  %v718_v56 = vmax.f32 %v626_v49, 0.0 }
 0x13f   :  { %v4509_v45 = vpop.f32.mrf.mxu0 }
 0x140   :  { %v629_v48 = vadd.f32 %v4509_v45, %v5531_v47  ;;  %4582 = vmatprep.mubr.bf16.mxu1 %v752_v43  ;;  %v716_v54 = vmax.f32 %v618_v46, 0.0 }
 0x141   :  { %v620_v50 = vpop.f32.mrf.mxu0  ;;  %4583 = vmatmul.mubr.bf16.gmra.mxu1 %v753_v44 }
 0x142   :  { %v621_v51 = vadd.f32 %v5531_v47, %v620_v50  ;;  %v719_v52 = vmax.f32 %v629_v48, 0.0  ;;  %v4995_v50 = vld [vmem:[%s7336_s3 + $0x88] sm:$0xff]  }
 0x143   :  { %v4512_v53 = vpop.f32.mrf.mxu0 }
 0x144   :  { %v717_v55 = vmax.f32 %v621_v51, 0.0  ;;  %v755_v59 = vpack.c.bf16 %v719_v52, %v718_v56  ;;  %v642_v63 = vadd.f32 %v4512_v53, %v5531_v47 }
 0x145   :  { %v633_v57 = vpop.f32.mrf.mxu0 }
 0x146   :  { %v754_v58 = vpack.c.bf16 %v717_v55, %v716_v54  ;;  %v634_v61 = vadd.f32 %v5531_v47, %v633_v57  ;;  %v722_v6 = vmax.f32 %v642_v63, 0.0 }
 0x147   :  { %v4513_v60 = vpop.f32.mrf.mxu0 }
 0x148   :  { %v645_v62 = vadd.f32 %v4513_v60, %v5531_v47  ;;  %4586 = vmatprep.mubr.bf16.mxu1 %v754_v58  ;;  %v720_v4 = vmax.f32 %v634_v61, 0.0  ;;  %v4996_v58 = vld [vmem:[%s7336_s3 + $0x80] sm:$0xff]  }
 0x149   :  { %v636_v0 = vpop.f32.mrf.mxu0  ;;  %4587 = vmatmul.mubr.bf16.gmra.mxu1 %v755_v59 }
 0x14a   :  { %v637_v1 = vadd.f32 %v5531_v47, %v636_v0  ;;  %v723_v2 = vmax.f32 %v645_v62, 0.0 }
 0x14b   :  { %v4516_v3 = vpop.f32.mrf.mxu0 }
 0x14c   :  { %v721_v5 = vmax.f32 %v637_v1, 0.0  ;;  %v757_v9 = vpack.c.bf16 %v723_v2, %v722_v6  ;;  %v658_v13 = vadd.f32 %v4516_v3, %v5531_v47 }
 0x14d   :  { %v649_v7 = vpop.f32.mrf.mxu0 }
 0x14e   :  { %v756_v8 = vpack.c.bf16 %v721_v5, %v720_v4  ;;  %v650_v11 = vadd.f32 %v5531_v47, %v649_v7  ;;  %v726_v19 = vmax.f32 %v658_v13, 0.0 }
 0x14f   :  { %v4517_v10 = vpop.f32.mrf.mxu0 }
 0x150   :  { %v661_v12 = vadd.f32 %v4517_v10, %v5531_v47  ;;  %4590 = vmatprep.mubr.bf16.mxu1 %v756_v8  ;;  %v724_v17 = vmax.f32 %v650_v11, 0.0 }
 0x151   :  { %v652_v14 = vpop.f32.mrf.mxu0  ;;  %4591 = vmatmul.mubr.bf16.gmra.mxu1 %v757_v9 }
 0x152   :  { %v653_v15 = vadd.f32 %v5531_v47, %v652_v14  ;;  %v727_v16 = vmax.f32 %v661_v12, 0.0  ;;  %v4991_v47 = vld [vmem:[%s7336_s3 + $0xa8] sm:$0xff]  }
 0x153   :  { %4682 = vmatprep.subr.bf16.mxu1 %v4991_v47 }
 0x154   :  { %v725_v18 = vmax.f32 %v653_v15, 0.0  ;;  %v759_v21 = vpack.c.bf16 %v727_v16, %v726_v19  ;;  %4683 = vmatpush3.bf16.msra.mxu1 %v4991_v47 }
 0x155   :  { %4684 = vmatprep.subr.bf16.mxu1 %v4992_v32 }
 0x156   :  { %v758_v20 = vpack.c.bf16 %v725_v18, %v724_v17 }
 0x158   :  { %4594 = vmatprep.mubr.bf16.mxu1 %v758_v20  ;;  %4685 = vmatpush3.bf16.msra.mxu1 %v4992_v32 }
 0x159   :  { %4595 = vmatmul.mubr.bf16.gmra.mxu1 %v759_v21  ;;  %4686 = vmatprep.subr.bf16.mxu1 %v4993_v33 }
 0x15c   :  { %4687 = vmatpush3.bf16.msra.mxu1 %v4993_v33 }
 0x15d   :  { %4688 = vmatprep.subr.bf16.mxu1 %v4994_v41 }
 0x160   :  { %4689 = vmatpush3.bf16.msra.mxu1 %v4994_v41 }
 0x161   :  { %4690 = vmatprep.subr.bf16.mxu1 %v4995_v50 }
 0x164   :  { %4691 = vmatpush3.bf16.msra.mxu1 %v4995_v50 }
 0x165   :  { %4692 = vmatprep.subr.bf16.mxu1 %v4996_v58 }
 0x168   :  { %4693 = vmatpush3.bf16.msra.mxu1 %v4996_v58 }
 0x1a1   :  { %v4536_v24 = vpop.f32.mrf.mxu1 }
 0x1a2   :  { %v874_v30 = vadd.f32 %v4536_v24, %v5624_v26 }
 0x1a3   :  { %v865_v25 = vpop.f32.mrf.mxu1 }
 0x1a4   :  { %v866_v28 = vadd.f32 %v5624_v26, %v865_v25  ;;  %v1122_v39 = vmax.f32 %v874_v30, 0.0 }
 0x1a5   :  { %v4537_v27 = vpop.f32.mrf.mxu1 }
 0x1a6   :  { %v877_v29 = vadd.f32 %v4537_v27, %v5624_v26  ;;  %v1120_v37 = vmax.f32 %v866_v28, 0.0 }
 0x1a7   :  { %v868_v31 = vpop.f32.mrf.mxu1 }
 0x1a8   :  { %v869_v34 = vadd.f32 %v5624_v26, %v868_v31  ;;  %v1123_v35 = vmax.f32 %v877_v29, 0.0 }
 0x1a9   :  { %v4540_v36 = vpop.f32.mrf.mxu1 }
 0x1aa   :  { %v1121_v38 = vmax.f32 %v869_v34, 0.0  ;;  %v1185_v43 = vpack.c.bf16 %v1123_v35, %v1122_v39  ;;  %v890_v48 = vadd.f32 %v4540_v36, %v5624_v26 }
 0x1ab   :  { %v881_v40 = vpop.f32.mrf.mxu1 }
 0x1ac   :  { %v1184_v42 = vpack.c.bf16 %v1121_v38, %v1120_v37  ;;  %v882_v45 = vadd.f32 %v5624_v26, %v881_v40  ;;  %v1126_v56 = vmax.f32 %v890_v48, 0.0 }
 0x1ad   :  { %v4541_v44 = vpop.f32.mrf.mxu1 }
 0x1ae   :  { %v893_v46 = vadd.f32 %v4541_v44, %v5624_v26  ;;  %4614 = vmatprep.mubr.bf16.mxu0 %v1184_v42  ;;  %v1124_v54 = vmax.f32 %v882_v45, 0.0 }
 0x1af   :  { %v884_v49 = vpop.f32.mrf.mxu1  ;;  %4615 = vmatmul.mubr.bf16.vlgmr.msra.gmra.mxu0 %v1185_v43 }
 0x1b0   :  { %v885_v51 = vadd.f32 %v5624_v26, %v884_v49  ;;  %v1127_v52 = vmax.f32 %v893_v46, 0.0 }
 0x1b1   :  { %v4544_v53 = vpop.f32.mrf.mxu1 }
 0x1b2   :  { %v1125_v55 = vmax.f32 %v885_v51, 0.0  ;;  %v1187_v60 = vpack.c.bf16 %v1127_v52, %v1126_v56  ;;  %v906_v0 = vadd.f32 %v4544_v53, %v5624_v26 }
 0x1b3   :  { %v897_v57 = vpop.f32.mrf.mxu1 }
 0x1b4   :  { %v1186_v59 = vpack.c.bf16 %v1125_v55, %v1124_v54  ;;  %v898_v62 = vadd.f32 %v5624_v26, %v897_v57  ;;  %v1130_v7 = vmax.f32 %v906_v0, 0.0 }
 0x1b5   :  { %v4545_v61 = vpop.f32.mrf.mxu1 }
 0x1b6   :  { %v909_v63 = vadd.f32 %v4545_v61, %v5624_v26  ;;  %4618 = vmatprep.mubr.bf16.mxu0 %v1186_v59  ;;  %v1128_v5 = vmax.f32 %v898_v62, 0.0 }
 0x1b7   :  { %v900_v1 = vpop.f32.mrf.mxu1  ;;  %4619 = vmatmul.mubr.bf16.gmra.mxu0 %v1187_v60 }
 0x1b8   :  { %v901_v2 = vadd.f32 %v5624_v26, %v900_v1  ;;  %v1131_v3 = vmax.f32 %v909_v63, 0.0 }
 0x1b9   :  { %v4548_v4 = vpop.f32.mrf.mxu1 }
 0x1ba   :  { %v1129_v6 = vmax.f32 %v901_v2, 0.0  ;;  %v1189_v10 = vpack.c.bf16 %v1131_v3, %v1130_v7  ;;  %v922_v14 = vadd.f32 %v4548_v4, %v5624_v26 }
 0x1bb   :  { %v913_v8 = vpop.f32.mrf.mxu1 }
 0x1bc   :  { %v1188_v9 = vpack.c.bf16 %v1129_v6, %v1128_v5  ;;  %v914_v12 = vadd.f32 %v5624_v26, %v913_v8  ;;  %v1134_v21 = vmax.f32 %v922_v14, 0.0 }
 0x1bd   :  { %v4549_v11 = vpop.f32.mrf.mxu1 }
 0x1be   :  { %v925_v13 = vadd.f32 %v4549_v11, %v5624_v26  ;;  %4622 = vmatprep.mubr.bf16.mxu0 %v1188_v9  ;;  %v1132_v19 = vmax.f32 %v914_v12, 0.0 }
 0x1bf   :  { %v916_v15 = vpop.f32.mrf.mxu1  ;;  %4623 = vmatmul.mubr.bf16.gmra.mxu0 %v1189_v10 }
 0x1c0   :  { %v917_v16 = vadd.f32 %v5624_v26, %v916_v15  ;;  %v1135_v17 = vmax.f32 %v925_v13, 0.0 }
 0x1c1   :  { %v4552_v18 = vpop.f32.mrf.mxu1 }
 0x1c2   :  { %v1133_v20 = vmax.f32 %v917_v16, 0.0  ;;  %v1191_v47 = vpack.c.bf16 %v1135_v17, %v1134_v21  ;;  %v938_v28 = vadd.f32 %v4552_v18, %v5624_v26 }
 0x1c3   :  { %v929_v22 = vpop.f32.mrf.mxu1 }
 0x1c4   :  { %v1190_v23 = vpack.c.bf16 %v1133_v20, %v1132_v19  ;;  %v930_v25 = vadd.f32 %v5624_v26, %v929_v22  ;;  %v1138_v35 = vmax.f32 %v938_v28, 0.0 }
 0x1c5   :  { %v4553_v24 = vpop.f32.mrf.mxu1 }
 0x1c6   :  { %v941_v27 = vadd.f32 %v4553_v24, %v5624_v26  ;;  %4626 = vmatprep.mubr.bf16.mxu0 %v1190_v23  ;;  %v1136_v33 = vmax.f32 %v930_v25, 0.0 }
 0x1c7   :  { %v932_v29 = vpop.f32.mrf.mxu1  ;;  %4627 = vmatmul.mubr.bf16.gmra.mxu0 %v1191_v47 }
 0x1c8   :  { %v933_v30 = vadd.f32 %v5624_v26, %v932_v29  ;;  %v1139_v31 = vmax.f32 %v941_v27, 0.0 }
 0x1c9   :  { %v4556_v32 = vpop.f32.mrf.mxu1 }
 0x1ca   :  { %v1137_v34 = vmax.f32 %v933_v30, 0.0  ;;  %v1193_v38 = vpack.c.bf16 %v1139_v31, %v1138_v35  ;;  %v954_v42 = vadd.f32 %v4556_v32, %v5624_v26 }
 0x1cb   :  { %v945_v36 = vpop.f32.mrf.mxu1 }
 0x1cc   :  { %v1192_v37 = vpack.c.bf16 %v1137_v34, %v1136_v33  ;;  %v946_v40 = vadd.f32 %v5624_v26, %v945_v36  ;;  %v1142_v50 = vmax.f32 %v954_v42, 0.0 }
 0x1cd   :  { %v4557_v39 = vpop.f32.mrf.mxu1 }
 0x1ce   :  { %v957_v41 = vadd.f32 %v4557_v39, %v5624_v26  ;;  %4630 = vmatprep.mubr.bf16.mxu0 %v1192_v37  ;;  %v1140_v48 = vmax.f32 %v946_v40, 0.0 }
 0x1cf   :  { %v948_v43 = vpop.f32.mrf.mxu1  ;;  %4631 = vmatmul.mubr.bf16.gmra.mxu0 %v1193_v38 }
 0x1d0   :  { %v949_v44 = vadd.f32 %v5624_v26, %v948_v43  ;;  %v1143_v45 = vmax.f32 %v957_v41, 0.0 }
 0x1d1   :  { %v4560_v46 = vpop.f32.mrf.mxu1 }
 0x1d2   :  { %v1141_v49 = vmax.f32 %v949_v44, 0.0  ;;  %v1195_v53 = vpack.c.bf16 %v1143_v45, %v1142_v50  ;;  %v970_v57 = vadd.f32 %v4560_v46, %v5624_v26 }
 0x1d3   :  { %v961_v51 = vpop.f32.mrf.mxu1 }
 0x1d4   :  { %v1194_v52 = vpack.c.bf16 %v1141_v49, %v1140_v48  ;;  %v962_v55 = vadd.f32 %v5624_v26, %v961_v51  ;;  %v1146_v0 = vmax.f32 %v970_v57, 0.0 }
 0x1d5   :  { %v4561_v54 = vpop.f32.mrf.mxu1 }
 0x1d6   :  { %v973_v56 = vadd.f32 %v4561_v54, %v5624_v26  ;;  %4634 = vmatprep.mubr.bf16.mxu0 %v1194_v52  ;;  %v1144_v62 = vmax.f32 %v962_v55, 0.0 }
 0x1d7   :  { %v964_v58 = vpop.f32.mrf.mxu1  ;;  %4635 = vmatmul.mubr.bf16.gmra.mxu0 %v1195_v53 }
 0x1d8   :  { %v965_v59 = vadd.f32 %v5624_v26, %v964_v58  ;;  %v1147_v60 = vmax.f32 %v973_v56, 0.0 }
 0x1d9   :  { %v4564_v61 = vpop.f32.mrf.mxu1 }
 0x1da   :  { %v1145_v63 = vmax.f32 %v965_v59, 0.0  ;;  %v1197_v3 = vpack.c.bf16 %v1147_v60, %v1146_v0  ;;  %v986_v7 = vadd.f32 %v4564_v61, %v5624_v26 }
 0x1db   :  { %v977_v1 = vpop.f32.mrf.mxu1 }
 0x1dc   :  { %v1196_v2 = vpack.c.bf16 %v1145_v63, %v1144_v62  ;;  %v978_v5 = vadd.f32 %v5624_v26, %v977_v1  ;;  %v1150_v14 = vmax.f32 %v986_v7, 0.0 }
 0x1dd   :  { %v4565_v4 = vpop.f32.mrf.mxu1 }
 0x1de   :  { %v989_v6 = vadd.f32 %v4565_v4, %v5624_v26  ;;  %4638 = vmatprep.mubr.bf16.mxu0 %v1196_v2  ;;  %v1148_v12 = vmax.f32 %v978_v5, 0.0 }
 0x1df   :  { %v980_v8 = vpop.f32.mrf.mxu1  ;;  %4639 = vmatmul.mubr.bf16.gmra.mxu0 %v1197_v3 }
 0x1e0   :  { %v981_v9 = vadd.f32 %v5624_v26, %v980_v8  ;;  %v1151_v10 = vmax.f32 %v989_v6, 0.0 }
 0x1e1   :  { %v4568_v11 = vpop.f32.mrf.mxu1 }
 0x1e2   :  { %v1149_v13 = vmax.f32 %v981_v9, 0.0  ;;  %v1199_v17 = vpack.c.bf16 %v1151_v10, %v1150_v14  ;;  %v1002_v21 = vadd.f32 %v4568_v11, %v5624_v26 }
 0x1e3   :  { %v993_v15 = vpop.f32.mrf.mxu1 }
 0x1e4   :  { %v1198_v16 = vpack.c.bf16 %v1149_v13, %v1148_v12  ;;  %v994_v19 = vadd.f32 %v5624_v26, %v993_v15  ;;  %v1154_v28 = vmax.f32 %v1002_v21, 0.0 }
 0x1e5   :  { %v4569_v18 = vpop.f32.mrf.mxu1 }
 0x1e6   :  { %v1005_v20 = vadd.f32 %v4569_v18, %v5624_v26  ;;  %4642 = vmatprep.mubr.bf16.mxu0 %v1198_v16  ;;  %v1152_v25 = vmax.f32 %v994_v19, 0.0 }
 0x1e7   :  { %v996_v22 = vpop.f32.mrf.mxu1  ;;  %4643 = vmatmul.mubr.bf16.gmra.mxu0 %v1199_v17 }
 0x1e8   :  { %v997_v23 = vadd.f32 %v5624_v26, %v996_v22  ;;  %v1155_v47 = vmax.f32 %v1005_v20, 0.0 }
 0x1e9   :  { %v4572_v24 = vpop.f32.mrf.mxu1 }
 0x1ea   :  { %v1153_v27 = vmax.f32 %v997_v23, 0.0  ;;  %v1201_v31 = vpack.c.bf16 %v1155_v47, %v1154_v28  ;;  %v1018_v35 = vadd.f32 %v4572_v24, %v5624_v26 }
 0x1eb   :  { %v1009_v29 = vpop.f32.mrf.mxu1 }
 0x1ec   :  { %v1200_v30 = vpack.c.bf16 %v1153_v27, %v1152_v25  ;;  %v1010_v33 = vadd.f32 %v5624_v26, %v1009_v29  ;;  %v1158_v42 = vmax.f32 %v1018_v35, 0.0 }
 0x1ed   :  { %v4573_v32 = vpop.f32.mrf.mxu1 }
 0x1ee   :  { %v1021_v34 = vadd.f32 %v4573_v32, %v5624_v26  ;;  %4646 = vmatprep.mubr.bf16.mxu0 %v1200_v30  ;;  %v1156_v40 = vmax.f32 %v1010_v33, 0.0 }
 0x1ef   :  { %v1012_v36 = vpop.f32.mrf.mxu1  ;;  %4647 = vmatmul.mubr.bf16.gmra.mxu0 %v1201_v31 }
 0x1f0   :  { %v1013_v37 = vadd.f32 %v5624_v26, %v1012_v36  ;;  %v1159_v38 = vmax.f32 %v1021_v34, 0.0 }
 0x1f1   :  { %v4576_v39 = vpop.f32.mrf.mxu1 }
 0x1f2   :  { %v1157_v41 = vmax.f32 %v1013_v37, 0.0  ;;  %v1203_v45 = vpack.c.bf16 %v1159_v38, %v1158_v42  ;;  %v1034_v50 = vadd.f32 %v4576_v39, %v5624_v26 }
 0x1f3   :  { %v1025_v43 = vpop.f32.mrf.mxu1 }
 0x1f4   :  { %v1202_v44 = vpack.c.bf16 %v1157_v41, %v1156_v40  ;;  %v1026_v48 = vadd.f32 %v5624_v26, %v1025_v43  ;;  %v1162_v57 = vmax.f32 %v1034_v50, 0.0 }
 0x1f5   :  { %v4577_v46 = vpop.f32.mrf.mxu1 }
 0x1f6   :  { %v1037_v49 = vadd.f32 %v4577_v46, %v5624_v26  ;;  %4650 = vmatprep.mubr.bf16.mxu0 %v1202_v44  ;;  %v1160_v55 = vmax.f32 %v1026_v48, 0.0 }
 0x1f7   :  { %v1028_v51 = vpop.f32.mrf.mxu1  ;;  %4651 = vmatmul.mubr.bf16.gmra.mxu0 %v1203_v45 }
 0x1f8   :  { %v1029_v52 = vadd.f32 %v5624_v26, %v1028_v51  ;;  %v1163_v53 = vmax.f32 %v1037_v49, 0.0 }
 0x1f9   :  { %v4580_v54 = vpop.f32.mrf.mxu1 }
 0x1fa   :  { %v1161_v56 = vmax.f32 %v1029_v52, 0.0  ;;  %v1205_v60 = vpack.c.bf16 %v1163_v53, %v1162_v57  ;;  %v1050_v0 = vadd.f32 %v4580_v54, %v5624_v26 }
 0x1fb   :  { %v1041_v58 = vpop.f32.mrf.mxu1 }
 0x1fc   :  { %v1204_v59 = vpack.c.bf16 %v1161_v56, %v1160_v55  ;;  %v1042_v62 = vadd.f32 %v5624_v26, %v1041_v58  ;;  %v1166_v7 = vmax.f32 %v1050_v0, 0.0 }
 0x1fd   :  { %v4581_v61 = vpop.f32.mrf.mxu1 }
 0x1fe   :  { %v1053_v63 = vadd.f32 %v4581_v61, %v5624_v26  ;;  %4654 = vmatprep.mubr.bf16.mxu0 %v1204_v59  ;;  %v1164_v5 = vmax.f32 %v1042_v62, 0.0 }
 0x1ff   :  { %v1044_v1 = vpop.f32.mrf.mxu1  ;;  %4655 = vmatmul.mubr.bf16.gmra.mxu0 %v1205_v60 }
 0x200   :  { %v1045_v2 = vadd.f32 %v5624_v26, %v1044_v1  ;;  %v1167_v3 = vmax.f32 %v1053_v63, 0.0 }
 0x201   :  { %v4584_v4 = vpop.f32.mrf.mxu1 }
 0x202   :  { %v1165_v6 = vmax.f32 %v1045_v2, 0.0  ;;  %v1207_v10 = vpack.c.bf16 %v1167_v3, %v1166_v7  ;;  %v1066_v14 = vadd.f32 %v4584_v4, %v5624_v26  ;;  %v4997_v2 = vld [vmem:[%s7336_s3 + $0xf8] sm:$0xff]   ;;  %v4998_v3 = vld [vmem:[%s7336_s3 + $0xf0] sm:$0xff]  }
 0x203   :  { %v1057_v8 = vpop.f32.mrf.mxu1  ;;  %4758 = vmatprep.subr.bf16.mxu0 %v4997_v2 }
 0x204   :  { %v1206_v9 = vpack.c.bf16 %v1165_v6, %v1164_v5  ;;  %v1058_v12 = vadd.f32 %v5624_v26, %v1057_v8  ;;  %v1170_v21 = vmax.f32 %v1066_v14, 0.0  ;;  %4759 = vmatpush3.bf16.msra.mxu0 %v4997_v2  ;;  %v5717_v6 = vld [vmem:[%s7337_s4 + $0x1] ss:$0 sm:$0xff] }
 0x205   :  { %v4585_v11 = vpop.f32.mrf.mxu1  ;;  %4760 = vmatprep.subr.bf16.mxu0 %v4998_v3 }
 0x206   :  { %v1069_v13 = vadd.f32 %v4585_v11, %v5624_v26  ;;  %4658 = vmatprep.mubr.bf16.mxu0 %v1206_v9  ;;  %v1168_v19 = vmax.f32 %v1058_v12, 0.0  ;;  %v5000_v12 = vld [vmem:[%s7336_s3 + $0xe0] sm:$0xff]  }
 0x207   :  { %v1060_v15 = vpop.f32.mrf.mxu1  ;;  %4659 = vmatmul.mubr.bf16.gmra.mxu0 %v1207_v10 }
 0x208   :  { %v1061_v16 = vadd.f32 %v5624_v26, %v1060_v15  ;;  %v1171_v17 = vmax.f32 %v1069_v13, 0.0  ;;  %4761 = vmatpush3.bf16.msra.mxu0 %v4998_v3  ;;  %v5001_v13 = vld [vmem:[%s7336_s3 + $0xd8] sm:$0xff]  }
 0x209   :  { %v4588_v18 = vpop.f32.mrf.mxu1 }
 0x20a   :  { %v1169_v20 = vmax.f32 %v1061_v16, 0.0  ;;  %v1209_v47 = vpack.c.bf16 %v1171_v17, %v1170_v21  ;;  %v1082_v28 = vadd.f32 %v4588_v18, %v5624_v26  ;;  %v5002_v21 = vld [vmem:[%s7336_s3 + $0xd0] sm:$0xff]  }
 0x20b   :  { %v1073_v22 = vpop.f32.mrf.mxu1 }
 0x20c   :  { %v1208_v23 = vpack.c.bf16 %v1169_v20, %v1168_v19  ;;  %v1074_v25 = vadd.f32 %v5624_v26, %v1073_v22  ;;  %v1174_v35 = vmax.f32 %v1082_v28, 0.0 }
 0x20d   :  { %v4589_v24 = vpop.f32.mrf.mxu1 }
 0x20e   :  { %v1085_v27 = vadd.f32 %v4589_v24, %v5624_v26  ;;  %4662 = vmatprep.mubr.bf16.mxu0 %v1208_v23  ;;  %v1172_v33 = vmax.f32 %v1074_v25, 0.0 }
 0x20f   :  { %v1076_v29 = vpop.f32.mrf.mxu1  ;;  %4663 = vmatmul.mubr.bf16.gmra.mxu0 %v1209_v47 }
 0x210   :  { %v1077_v30 = vadd.f32 %v5624_v26, %v1076_v29  ;;  %v1175_v31 = vmax.f32 %v1085_v27, 0.0  ;;  %v5003_v29 = vld [vmem:[%s7336_s3 + $0xc8] sm:$0xff]  }
 0x211   :  { %v4592_v32 = vpop.f32.mrf.mxu1 }
 0x212   :  { %v1173_v34 = vmax.f32 %v1077_v30, 0.0  ;;  %v1211_v38 = vpack.c.bf16 %v1175_v31, %v1174_v35  ;;  %v1098_v42 = vadd.f32 %v4592_v32, %v5624_v26 }
 0x213   :  { %v1089_v36 = vpop.f32.mrf.mxu1 }
 0x214   :  { %v1210_v37 = vpack.c.bf16 %v1173_v34, %v1172_v33  ;;  %v1090_v40 = vadd.f32 %v5624_v26, %v1089_v36  ;;  %v1178_v50 = vmax.f32 %v1098_v42, 0.0 }
 0x215   :  { %v4593_v39 = vpop.f32.mrf.mxu1 }
 0x216   :  { %v1101_v41 = vadd.f32 %v4593_v39, %v5624_v26  ;;  %4666 = vmatprep.mubr.bf16.mxu0 %v1210_v37  ;;  %v1176_v48 = vmax.f32 %v1090_v40, 0.0  ;;  %v5004_v37 = vld [vmem:[%s7336_s3 + $0xc0] sm:$0xff]  }
 0x217   :  { %v1092_v43 = vpop.f32.mrf.mxu1  ;;  %4667 = vmatmul.mubr.bf16.gmra.mxu0 %v1211_v38 }
 0x218   :  { %v1093_v44 = vadd.f32 %v5624_v26, %v1092_v43  ;;  %v1179_v45 = vmax.f32 %v1101_v41, 0.0 }
 0x219   :  { %v4596_v46 = vpop.f32.mrf.mxu1 }
 0x21a   :  { %v1177_v49 = vmax.f32 %v1093_v44, 0.0  ;;  %v1213_v53 = vpack.c.bf16 %v1179_v45, %v1178_v50  ;;  %v1114_v57 = vadd.f32 %v4596_v46, %v5624_v26 }
 0x21b   :  { %v1105_v51 = vpop.f32.mrf.mxu1 }
 0x21c   :  { %v1212_v52 = vpack.c.bf16 %v1177_v49, %v1176_v48  ;;  %v1106_v55 = vadd.f32 %v5624_v26, %v1105_v51  ;;  %v1182_v63 = vmax.f32 %v1114_v57, 0.0 }
 0x21d   :  { %v4597_v54 = vpop.f32.mrf.mxu1 }
 0x21e   :  { %v1117_v56 = vadd.f32 %v4597_v54, %v5624_v26  ;;  %4670 = vmatprep.mubr.bf16.mxu0 %v1212_v52  ;;  %v1180_v61 = vmax.f32 %v1106_v55, 0.0 }
 0x21f   :  { %v1108_v58 = vpop.f32.mrf.mxu1  ;;  %4671 = vmatmul.mubr.bf16.gmra.mxu0 %v1213_v53 }
 0x220   :  { %v1109_v59 = vadd.f32 %v5624_v26, %v1108_v58  ;;  %v1183_v60 = vmax.f32 %v1117_v56, 0.0  ;;  %v4999_v26 = vld [vmem:[%s7336_s3 + $0xe8] sm:$0xff]  }
 0x221   :  { %4762 = vmatprep.subr.bf16.mxu0 %v4999_v26 }
 0x222   :  { %v1181_v62 = vmax.f32 %v1109_v59, 0.0  ;;  %v1215_v1 = vpack.c.bf16 %v1183_v60, %v1182_v63  ;;  %4763 = vmatpush3.bf16.msra.mxu0 %v4999_v26 }
 0x223   :  { %4764 = vmatprep.subr.bf16.mxu0 %v5000_v12 }
 0x224   :  { %v1214_v0 = vpack.c.bf16 %v1181_v62, %v1180_v61 }
 0x226   :  { %4674 = vmatprep.mubr.bf16.mxu0 %v1214_v0  ;;  %4765 = vmatpush3.bf16.msra.mxu0 %v5000_v12 }
 0x227   :  { %4675 = vmatmul.mubr.bf16.gmra.mxu0 %v1215_v1  ;;  %4766 = vmatprep.subr.bf16.mxu0 %v5001_v13 }
 0x22a   :  { %4767 = vmatpush3.bf16.msra.mxu0 %v5001_v13 }
 0x22b   :  { %4768 = vmatprep.subr.bf16.mxu0 %v5002_v21 }
 0x22e   :  { %4769 = vmatpush3.bf16.msra.mxu0 %v5002_v21 }
 0x22f   :  { %4770 = vmatprep.subr.bf16.mxu0 %v5003_v29 }
 0x232   :  { %4771 = vmatpush3.bf16.msra.mxu0 %v5003_v29 }
 0x233   :  { %4772 = vmatprep.subr.bf16.mxu0 %v5004_v37 }
 0x236   :  { %4773 = vmatpush3.bf16.msra.mxu0 %v5004_v37 }
 0x26f   :  { %v4616_v4 = vpop.f32.mrf.mxu0 }
 0x270   :  { %v1332_v10 = vadd.f32 %v4616_v4, %v5717_v6 }
 0x271   :  { %v1323_v5 = vpop.f32.mrf.mxu0 }
 0x272   :  { %v1324_v8 = vadd.f32 %v5717_v6, %v1323_v5  ;;  %v1580_v19 = vmax.f32 %v1332_v10, 0.0 }
 0x273   :  { %v4617_v7 = vpop.f32.mrf.mxu0 }
 0x274   :  { %v1335_v9 = vadd.f32 %v4617_v7, %v5717_v6  ;;  %v1578_v17 = vmax.f32 %v1324_v8, 0.0 }
 0x275   :  { %v1326_v11 = vpop.f32.mrf.mxu0 }
 0x276   :  { %v1327_v14 = vadd.f32 %v5717_v6, %v1326_v11  ;;  %v1581_v15 = vmax.f32 %v1335_v9, 0.0 }
 0x277   :  { %v4620_v16 = vpop.f32.mrf.mxu0 }
 0x278   :  { %v1579_v18 = vmax.f32 %v1327_v14, 0.0  ;;  %v1643_v23 = vpack.c.bf16 %v1581_v15, %v1580_v19  ;;  %v1348_v27 = vadd.f32 %v4620_v16, %v5717_v6 }
 0x279   :  { %v1339_v20 = vpop.f32.mrf.mxu0 }
 0x27a   :  { %v1642_v22 = vpack.c.bf16 %v1579_v18, %v1578_v17  ;;  %v1340_v24 = vadd.f32 %v5717_v6, %v1339_v20  ;;  %v1584_v35 = vmax.f32 %v1348_v27, 0.0 }
 0x27b   :  { %v4621_v47 = vpop.f32.mrf.mxu0 }
 0x27c   :  { %v1351_v25 = vadd.f32 %v4621_v47, %v5717_v6  ;;  %4694 = vmatprep.mubr.bf16.mxu1 %v1642_v22  ;;  %v1582_v33 = vmax.f32 %v1340_v24, 0.0 }
 0x27d   :  { %v1342_v28 = vpop.f32.mrf.mxu0  ;;  %4695 = vmatmul.mubr.bf16.vlgmr.msra.gmra.mxu1 %v1643_v23 }
 0x27e   :  { %v1343_v30 = vadd.f32 %v5717_v6, %v1342_v28  ;;  %v1585_v31 = vmax.f32 %v1351_v25, 0.0 }
 0x27f   :  { %v4624_v32 = vpop.f32.mrf.mxu0 }
 0x280   :  { %v1583_v34 = vmax.f32 %v1343_v30, 0.0  ;;  %v1645_v39 = vpack.c.bf16 %v1585_v31, %v1584_v35  ;;  %v1364_v43 = vadd.f32 %v4624_v32, %v5717_v6 }
 0x281   :  { %v1355_v36 = vpop.f32.mrf.mxu0 }
 0x282   :  { %v1644_v38 = vpack.c.bf16 %v1583_v34, %v1582_v33  ;;  %v1356_v41 = vadd.f32 %v5717_v6, %v1355_v36  ;;  %v1588_v51 = vmax.f32 %v1364_v43, 0.0 }
 0x283   :  { %v4625_v40 = vpop.f32.mrf.mxu0 }
 0x284   :  { %v1367_v42 = vadd.f32 %v4625_v40, %v5717_v6  ;;  %4698 = vmatprep.mubr.bf16.mxu1 %v1644_v38  ;;  %v1586_v49 = vmax.f32 %v1356_v41, 0.0 }
 0x285   :  { %v1358_v44 = vpop.f32.mrf.mxu0  ;;  %4699 = vmatmul.mubr.bf16.gmra.mxu1 %v1645_v39 }
 0x286   :  { %v1359_v45 = vadd.f32 %v5717_v6, %v1358_v44  ;;  %v1589_v46 = vmax.f32 %v1367_v42, 0.0 }
 0x287   :  { %v4628_v48 = vpop.f32.mrf.mxu0 }
 0x288   :  { %v1587_v50 = vmax.f32 %v1359_v45, 0.0  ;;  %v1647_v54 = vpack.c.bf16 %v1589_v46, %v1588_v51  ;;  %v1380_v58 = vadd.f32 %v4628_v48, %v5717_v6 }
 0x289   :  { %v1371_v52 = vpop.f32.mrf.mxu0 }
 0x28a   :  { %v1646_v53 = vpack.c.bf16 %v1587_v50, %v1586_v49  ;;  %v1372_v56 = vadd.f32 %v5717_v6, %v1371_v52  ;;  %v1592_v1 = vmax.f32 %v1380_v58, 0.0 }
 0x28b   :  { %v4629_v55 = vpop.f32.mrf.mxu0 }
 0x28c   :  { %v1383_v57 = vadd.f32 %v4629_v55, %v5717_v6  ;;  %4702 = vmatprep.mubr.bf16.mxu1 %v1646_v53  ;;  %v1590_v63 = vmax.f32 %v1372_v56, 0.0 }
 0x28d   :  { %v1374_v59 = vpop.f32.mrf.mxu0  ;;  %4703 = vmatmul.mubr.bf16.gmra.mxu1 %v1647_v54 }
 0x28e   :  { %v1375_v60 = vadd.f32 %v5717_v6, %v1374_v59  ;;  %v1593_v61 = vmax.f32 %v1383_v57, 0.0 }
 0x28f   :  { %v4632_v62 = vpop.f32.mrf.mxu0 }
 0x290   :  { %v1591_v0 = vmax.f32 %v1375_v60, 0.0  ;;  %v1649_v26 = vpack.c.bf16 %v1593_v61, %v1592_v1  ;;  %v1396_v8 = vadd.f32 %v4632_v62, %v5717_v6 }
 0x291   :  { %v1387_v2 = vpop.f32.mrf.mxu0 }
 0x292   :  { %v1648_v3 = vpack.c.bf16 %v1591_v0, %v1590_v63  ;;  %v1388_v5 = vadd.f32 %v5717_v6, %v1387_v2  ;;  %v1596_v15 = vmax.f32 %v1396_v8, 0.0 }
 0x293   :  { %v4633_v4 = vpop.f32.mrf.mxu0 }
 0x294   :  { %v1399_v7 = vadd.f32 %v4633_v4, %v5717_v6  ;;  %4706 = vmatprep.mubr.bf16.mxu1 %v1648_v3  ;;  %v1594_v13 = vmax.f32 %v1388_v5, 0.0 }
 0x295   :  { %v1390_v9 = vpop.f32.mrf.mxu0  ;;  %4707 = vmatmul.mubr.bf16.gmra.mxu1 %v1649_v26 }
 0x296   :  { %v1391_v10 = vadd.f32 %v5717_v6, %v1390_v9  ;;  %v1597_v11 = vmax.f32 %v1399_v7, 0.0 }
 0x297   :  { %v4636_v12 = vpop.f32.mrf.mxu0 }
 0x298   :  { %v1595_v14 = vmax.f32 %v1391_v10, 0.0  ;;  %v1651_v18 = vpack.c.bf16 %v1597_v11, %v1596_v15  ;;  %v1412_v22 = vadd.f32 %v4636_v12, %v5717_v6 }
 0x299   :  { %v1403_v16 = vpop.f32.mrf.mxu0 }
 0x29a   :  { %v1650_v17 = vpack.c.bf16 %v1595_v14, %v1594_v13  ;;  %v1404_v20 = vadd.f32 %v5717_v6, %v1403_v16  ;;  %v1600_v29 = vmax.f32 %v1412_v22, 0.0 }
 0x29b   :  { %v4637_v19 = vpop.f32.mrf.mxu0 }
 0x29c   :  { %v1415_v21 = vadd.f32 %v4637_v19, %v5717_v6  ;;  %4710 = vmatprep.mubr.bf16.mxu1 %v1650_v17  ;;  %v1598_v27 = vmax.f32 %v1404_v20, 0.0 }
 0x29d   :  { %v1406_v23 = vpop.f32.mrf.mxu0  ;;  %4711 = vmatmul.mubr.bf16.gmra.mxu1 %v1651_v18 }
 0x29e   :  { %v1407_v47 = vadd.f32 %v5717_v6, %v1406_v23  ;;  %v1601_v24 = vmax.f32 %v1415_v21, 0.0 }
 0x29f   :  { %v4640_v25 = vpop.f32.mrf.mxu0 }
 0x2a0   :  { %v1599_v28 = vmax.f32 %v1407_v47, 0.0  ;;  %v1653_v32 = vpack.c.bf16 %v1601_v24, %v1600_v29  ;;  %v1428_v36 = vadd.f32 %v4640_v25, %v5717_v6 }
 0x2a1   :  { %v1419_v30 = vpop.f32.mrf.mxu0 }
 0x2a2   :  { %v1652_v31 = vpack.c.bf16 %v1599_v28, %v1598_v27  ;;  %v1420_v34 = vadd.f32 %v5717_v6, %v1419_v30  ;;  %v1604_v43 = vmax.f32 %v1428_v36, 0.0 }
 0x2a3   :  { %v4641_v33 = vpop.f32.mrf.mxu0 }
 0x2a4   :  { %v1431_v35 = vadd.f32 %v4641_v33, %v5717_v6  ;;  %4714 = vmatprep.mubr.bf16.mxu1 %v1652_v31  ;;  %v1602_v41 = vmax.f32 %v1420_v34, 0.0 }
 0x2a5   :  { %v1422_v37 = vpop.f32.mrf.mxu0  ;;  %4715 = vmatmul.mubr.bf16.gmra.mxu1 %v1653_v32 }
 0x2a6   :  { %v1423_v38 = vadd.f32 %v5717_v6, %v1422_v37  ;;  %v1605_v39 = vmax.f32 %v1431_v35, 0.0 }
 0x2a7   :  { %v4644_v40 = vpop.f32.mrf.mxu0 }
 0x2a8   :  { %v1603_v42 = vmax.f32 %v1423_v38, 0.0  ;;  %v1655_v46 = vpack.c.bf16 %v1605_v39, %v1604_v43  ;;  %v1444_v51 = vadd.f32 %v4644_v40, %v5717_v6 }
 0x2a9   :  { %v1435_v44 = vpop.f32.mrf.mxu0 }
 0x2aa   :  { %v1654_v45 = vpack.c.bf16 %v1603_v42, %v1602_v41  ;;  %v1436_v49 = vadd.f32 %v5717_v6, %v1435_v44  ;;  %v1608_v58 = vmax.f32 %v1444_v51, 0.0 }
 0x2ab   :  { %v4645_v48 = vpop.f32.mrf.mxu0 }
 0x2ac   :  { %v1447_v50 = vadd.f32 %v4645_v48, %v5717_v6  ;;  %4718 = vmatprep.mubr.bf16.mxu1 %v1654_v45  ;;  %v1606_v56 = vmax.f32 %v1436_v49, 0.0 }
 0x2ad   :  { %v1438_v52 = vpop.f32.mrf.mxu0  ;;  %4719 = vmatmul.mubr.bf16.gmra.mxu1 %v1655_v46 }
 0x2ae   :  { %v1439_v53 = vadd.f32 %v5717_v6, %v1438_v52  ;;  %v1609_v54 = vmax.f32 %v1447_v50, 0.0 }
 0x2af   :  { %v4648_v55 = vpop.f32.mrf.mxu0 }
 0x2b0   :  { %v1607_v57 = vmax.f32 %v1439_v53, 0.0  ;;  %v1657_v61 = vpack.c.bf16 %v1609_v54, %v1608_v58  ;;  %v1460_v1 = vadd.f32 %v4648_v55, %v5717_v6 }
 0x2b1   :  { %v1451_v59 = vpop.f32.mrf.mxu0 }
 0x2b2   :  { %v1656_v60 = vpack.c.bf16 %v1607_v57, %v1606_v56  ;;  %v1452_v63 = vadd.f32 %v5717_v6, %v1451_v59  ;;  %v1612_v8 = vmax.f32 %v1460_v1, 0.0 }
 0x2b3   :  { %v4649_v62 = vpop.f32.mrf.mxu0 }
 0x2b4   :  { %v1463_v0 = vadd.f32 %v4649_v62, %v5717_v6  ;;  %4722 = vmatprep.mubr.bf16.mxu1 %v1656_v60  ;;  %v1610_v5 = vmax.f32 %v1452_v63, 0.0 }
 0x2b5   :  { %v1454_v2 = vpop.f32.mrf.mxu0  ;;  %4723 = vmatmul.mubr.bf16.gmra.mxu1 %v1657_v61 }
 0x2b6   :  { %v1455_v3 = vadd.f32 %v5717_v6, %v1454_v2  ;;  %v1613_v26 = vmax.f32 %v1463_v0, 0.0 }
 0x2b7   :  { %v4652_v4 = vpop.f32.mrf.mxu0 }
 0x2b8   :  { %v1611_v7 = vmax.f32 %v1455_v3, 0.0  ;;  %v1659_v11 = vpack.c.bf16 %v1613_v26, %v1612_v8  ;;  %v1476_v15 = vadd.f32 %v4652_v4, %v5717_v6 }
 0x2b9   :  { %v1467_v9 = vpop.f32.mrf.mxu0 }
 0x2ba   :  { %v1658_v10 = vpack.c.bf16 %v1611_v7, %v1610_v5  ;;  %v1468_v13 = vadd.f32 %v5717_v6, %v1467_v9  ;;  %v1616_v22 = vmax.f32 %v1476_v15, 0.0 }
 0x2bb   :  { %v4653_v12 = vpop.f32.mrf.mxu0 }
 0x2bc   :  { %v1479_v14 = vadd.f32 %v4653_v12, %v5717_v6  ;;  %4726 = vmatprep.mubr.bf16.mxu1 %v1658_v10  ;;  %v1614_v20 = vmax.f32 %v1468_v13, 0.0 }
 0x2bd   :  { %v1470_v16 = vpop.f32.mrf.mxu0  ;;  %4727 = vmatmul.mubr.bf16.gmra.mxu1 %v1659_v11 }
 0x2be   :  { %v1471_v17 = vadd.f32 %v5717_v6, %v1470_v16  ;;  %v1617_v18 = vmax.f32 %v1479_v14, 0.0 }
 0x2bf   :  { %v4656_v19 = vpop.f32.mrf.mxu0 }
 0x2c0   :  { %v1615_v21 = vmax.f32 %v1471_v17, 0.0  ;;  %v1661_v24 = vpack.c.bf16 %v1617_v18, %v1616_v22  ;;  %v1492_v29 = vadd.f32 %v4656_v19, %v5717_v6 }
 0x2c1   :  { %v1483_v23 = vpop.f32.mrf.mxu0 }
 0x2c2   :  { %v1660_v47 = vpack.c.bf16 %v1615_v21, %v1614_v20  ;;  %v1484_v27 = vadd.f32 %v5717_v6, %v1483_v23  ;;  %v1620_v36 = vmax.f32 %v1492_v29, 0.0 }
 0x2c3   :  { %v4657_v25 = vpop.f32.mrf.mxu0 }
 0x2c4   :  { %v1495_v28 = vadd.f32 %v4657_v25, %v5717_v6  ;;  %4730 = vmatprep.mubr.bf16.mxu1 %v1660_v47  ;;  %v1618_v34 = vmax.f32 %v1484_v27, 0.0 }
 0x2c5   :  { %v1486_v30 = vpop.f32.mrf.mxu0  ;;  %4731 = vmatmul.mubr.bf16.gmra.mxu1 %v1661_v24 }
 0x2c6   :  { %v1487_v31 = vadd.f32 %v5717_v6, %v1486_v30  ;;  %v1621_v32 = vmax.f32 %v1495_v28, 0.0 }
 0x2c7   :  { %v4660_v33 = vpop.f32.mrf.mxu0 }
 0x2c8   :  { %v1619_v35 = vmax.f32 %v1487_v31, 0.0  ;;  %v1663_v39 = vpack.c.bf16 %v1621_v32, %v1620_v36  ;;  %v1508_v43 = vadd.f32 %v4660_v33, %v5717_v6 }
 0x2c9   :  { %v1499_v37 = vpop.f32.mrf.mxu0 }
 0x2ca   :  { %v1662_v38 = vpack.c.bf16 %v1619_v35, %v1618_v34  ;;  %v1500_v41 = vadd.f32 %v5717_v6, %v1499_v37  ;;  %v1624_v51 = vmax.f32 %v1508_v43, 0.0 }
 0x2cb   :  { %v4661_v40 = vpop.f32.mrf.mxu0 }
 0x2cc   :  { %v1511_v42 = vadd.f32 %v4661_v40, %v5717_v6  ;;  %4734 = vmatprep.mubr.bf16.mxu1 %v1662_v38  ;;  %v1622_v49 = vmax.f32 %v1500_v41, 0.0 }
 0x2cd   :  { %v1502_v44 = vpop.f32.mrf.mxu0  ;;  %4735 = vmatmul.mubr.bf16.gmra.mxu1 %v1663_v39 }
 0x2ce   :  { %v1503_v45 = vadd.f32 %v5717_v6, %v1502_v44  ;;  %v1625_v46 = vmax.f32 %v1511_v42, 0.0 }
 0x2cf   :  { %v4664_v48 = vpop.f32.mrf.mxu0 }
 0x2d0   :  { %v1623_v50 = vmax.f32 %v1503_v45, 0.0  ;;  %v1665_v54 = vpack.c.bf16 %v1625_v46, %v1624_v51  ;;  %v1524_v58 = vadd.f32 %v4664_v48, %v5717_v6  ;;  %v5005_v45 = vld [vmem:[#allocation2 + $0x38] sm:$0xff]   ;;  %v5006_v46 = vld [vmem:[#allocation2 + $0x30] sm:$0xff]  }
 0x2d1   :  { %v1515_v52 = vpop.f32.mrf.mxu0  ;;  %4918 = vmatprep.subr.bf16.mxu1 %v5005_v45  ;;  %4838 = vmatprep.subr.bf16.mxu0 %v5005_v45 }
 0x2d2   :  { %v1664_v53 = vpack.c.bf16 %v1623_v50, %v1622_v49  ;;  %v1516_v56 = vadd.f32 %v5717_v6, %v1515_v52  ;;  %v1628_v1 = vmax.f32 %v1524_v58, 0.0  ;;  %4926 = vmatpush3.bf16.msra.mxu1 %v5005_v45  ;;  %v5007_v50 = vld [vmem:[#allocation2 + $0x28] sm:$0xff]  }
 0x2d3   :  { %v4665_v55 = vpop.f32.mrf.mxu0  ;;  %4919 = vmatprep.subr.bf16.mxu1 %v5006_v46 }
 0x2d4   :  { %v1527_v57 = vadd.f32 %v4665_v55, %v5717_v6  ;;  %4738 = vmatprep.mubr.bf16.mxu1 %v1664_v53  ;;  %v1626_v63 = vmax.f32 %v1516_v56, 0.0  ;;  %v5008_v56 = vld [vmem:[#allocation2 + $0x20] sm:$0xff]  }
 0x2d5   :  { %v1518_v59 = vpop.f32.mrf.mxu0  ;;  %4739 = vmatmul.mubr.bf16.gmra.mxu1 %v1665_v54 }
 0x2d6   :  { %v1519_v60 = vadd.f32 %v5717_v6, %v1518_v59  ;;  %v1629_v61 = vmax.f32 %v1527_v57, 0.0  ;;  %4927 = vmatpush3.bf16.msra.mxu1 %v5006_v46 }
 0x2d7   :  { %v4668_v62 = vpop.f32.mrf.mxu0  ;;  %4920 = vmatprep.subr.bf16.mxu1 %v5007_v50 }
 0x2d8   :  { %v1627_v0 = vmax.f32 %v1519_v60, 0.0  ;;  %v1667_v26 = vpack.c.bf16 %v1629_v61, %v1628_v1  ;;  %v1540_v8 = vadd.f32 %v4668_v62, %v5717_v6  ;;  %v5009_v62 = vld [vmem:[#allocation2 + $0x18] sm:$0xff]  }
 0x2d9   :  { %v1531_v2 = vpop.f32.mrf.mxu0 }
 0x2da   :  { %v1666_v3 = vpack.c.bf16 %v1627_v0, %v1626_v63  ;;  %v1532_v5 = vadd.f32 %v5717_v6, %v1531_v2  ;;  %v1632_v15 = vmax.f32 %v1540_v8, 0.0  ;;  %4928 = vmatpush3.bf16.msra.mxu1 %v5007_v50 }
 0x2db   :  { %v4669_v4 = vpop.f32.mrf.mxu0  ;;  %4921 = vmatprep.subr.bf16.mxu1 %v5008_v56 }
 0x2dc   :  { %v1543_v7 = vadd.f32 %v4669_v4, %v5717_v6  ;;  %4742 = vmatprep.mubr.bf16.mxu1 %v1666_v3  ;;  %v1630_v13 = vmax.f32 %v1532_v5, 0.0  ;;  %v5010_v5 = vld [vmem:[#allocation2 + $0x10] sm:$0xff]  }
 0x2dd   :  { %v1534_v9 = vpop.f32.mrf.mxu0  ;;  %4743 = vmatmul.mubr.bf16.gmra.mxu1 %v1667_v26 }
 0x2de   :  { %v1535_v10 = vadd.f32 %v5717_v6, %v1534_v9  ;;  %v1633_v11 = vmax.f32 %v1543_v7, 0.0  ;;  %4929 = vmatpush3.bf16.msra.mxu1 %v5008_v56 }
 0x2df   :  { %v4672_v12 = vpop.f32.mrf.mxu0  ;;  %4922 = vmatprep.subr.bf16.mxu1 %v5009_v62 }
 0x2e0   :  { %v1631_v14 = vmax.f32 %v1535_v10, 0.0  ;;  %v1669_v18 = vpack.c.bf16 %v1633_v11, %v1632_v15  ;;  %v1556_v22 = vadd.f32 %v4672_v12, %v5717_v6 }
 0x2e1   :  { %v1547_v16 = vpop.f32.mrf.mxu0 }
 0x2e2   :  { %v1668_v17 = vpack.c.bf16 %v1631_v14, %v1630_v13  ;;  %v1548_v20 = vadd.f32 %v5717_v6, %v1547_v16  ;;  %v1636_v29 = vmax.f32 %v1556_v22, 0.0  ;;  %4930 = vmatpush3.bf16.msra.mxu1 %v5009_v62  ;;  %v5011_v14 = vld [vmem:[#allocation2 + $0x8] sm:$0xff]  }
 0x2e3   :  { %v4673_v19 = vpop.f32.mrf.mxu0  ;;  %4923 = vmatprep.subr.bf16.mxu1 %v5010_v5 }
 0x2e4   :  { %v1559_v21 = vadd.f32 %v4673_v19, %v5717_v6  ;;  %4746 = vmatprep.mubr.bf16.mxu1 %v1668_v17  ;;  %v1634_v27 = vmax.f32 %v1548_v20, 0.0 }
 0x2e5   :  { %v1550_v23 = vpop.f32.mrf.mxu0  ;;  %4747 = vmatmul.mubr.bf16.gmra.mxu1 %v1669_v18 }
 0x2e6   :  { %v1551_v47 = vadd.f32 %v5717_v6, %v1550_v23  ;;  %v1637_v24 = vmax.f32 %v1559_v21, 0.0  ;;  %4931 = vmatpush3.bf16.msra.mxu1 %v5010_v5 }
 0x2e7   :  { %v4676_v25 = vpop.f32.mrf.mxu0  ;;  %4924 = vmatprep.subr.bf16.mxu1 %v5011_v14 }
 0x2e8   :  { %v1635_v28 = vmax.f32 %v1551_v47, 0.0  ;;  %v1671_v32 = vpack.c.bf16 %v1637_v24, %v1636_v29  ;;  %v1572_v36 = vadd.f32 %v4676_v25, %v5717_v6 }
 0x2e9   :  { %v1563_v30 = vpop.f32.mrf.mxu0 }
 0x2ea   :  { %v1670_v31 = vpack.c.bf16 %v1635_v28, %v1634_v27  ;;  %v1564_v34 = vadd.f32 %v5717_v6, %v1563_v30  ;;  %v1640_v42 = vmax.f32 %v1572_v36, 0.0  ;;  %4932 = vmatpush3.bf16.msra.mxu1 %v5011_v14 }
 0x2eb   :  { %v4677_v33 = vpop.f32.mrf.mxu0 }
 0x2ec   :  { %v1575_v35 = vadd.f32 %v4677_v33, %v5717_v6  ;;  %4750 = vmatprep.mubr.bf16.mxu1 %v1670_v31  ;;  %v1638_v40 = vmax.f32 %v1564_v34, 0.0 }
 0x2ed   :  { %v1566_v37 = vpop.f32.mrf.mxu0  ;;  %4751 = vmatmul.mubr.bf16.gmra.mxu1 %v1671_v32 }
 0x2ee   :  { %v1567_v38 = vadd.f32 %v5717_v6, %v1566_v37  ;;  %v1641_v39 = vmax.f32 %v1575_v35, 0.0  ;;  %v5801_v6 = vld [vmem:[%s7337_s4 + $0x2] ss:$0 sm:$0xff] }
 0x2f0   :  { %v1639_v41 = vmax.f32 %v1567_v38, 0.0  ;;  %v1673_v44 = vpack.c.bf16 %v1641_v39, %v1640_v42 }
 0x2f2   :  { %v1672_v43 = vpack.c.bf16 %v1639_v41, %v1638_v40 }
 0x2f4   :  { %4754 = vmatprep.mubr.bf16.mxu1 %v1672_v43 }
 0x2f5   :  { %4755 = vmatmul.mubr.bf16.gmra.mxu1 %v1673_v44 }
 0x33d   :  { %v4696_v48 = vpop.f32.mrf.mxu1 }
 0x33e   :  { %v1790_v54 = vadd.f32 %v4696_v48, %v5801_v6 }
 0x33f   :  { %v1781_v49 = vpop.f32.mrf.mxu1 }
 0x340   :  { %v1782_v52 = vadd.f32 %v5801_v6, %v1781_v49  ;;  %v2038_v63 = vmax.f32 %v1790_v54, 0.0 }
 0x341   :  { %v4697_v51 = vpop.f32.mrf.mxu1 }
 0x342   :  { %v1793_v53 = vadd.f32 %v4697_v51, %v5801_v6  ;;  %v2036_v60 = vmax.f32 %v1782_v52, 0.0 }
 0x343   :  { %v1784_v55 = vpop.f32.mrf.mxu1 }
 0x344   :  { %v1785_v57 = vadd.f32 %v5801_v6, %v1784_v55  ;;  %v2039_v58 = vmax.f32 %v1793_v53, 0.0 }
 0x345   :  { %v4700_v59 = vpop.f32.mrf.mxu1 }
 0x346   :  { %v2037_v61 = vmax.f32 %v1785_v57, 0.0  ;;  %v2101_v2 = vpack.c.bf16 %v2039_v58, %v2038_v63  ;;  %v1806_v7 = vadd.f32 %v4700_v59, %v5801_v6 }
 0x347   :  { %v1797_v0 = vpop.f32.mrf.mxu1 }
 0x348   :  { %v2100_v1 = vpack.c.bf16 %v2037_v61, %v2036_v60  ;;  %v1798_v26 = vadd.f32 %v5801_v6, %v1797_v0  ;;  %v2042_v15 = vmax.f32 %v1806_v7, 0.0 }
 0x349   :  { %v4701_v3 = vpop.f32.mrf.mxu1 }
 0x34a   :  { %v1809_v4 = vadd.f32 %v4701_v3, %v5801_v6  ;;  %4774 = vmatprep.mubr.bf16.mxu0 %v2100_v1  ;;  %v2040_v12 = vmax.f32 %v1798_v26, 0.0 }
 0x34b   :  { %v1800_v8 = vpop.f32.mrf.mxu1  ;;  %4775 = vmatmul.mubr.bf16.vlgmr.msra.gmra.mxu0 %v2101_v2 }
 0x34c   :  { %v1801_v9 = vadd.f32 %v5801_v6, %v1800_v8  ;;  %4839 = vmatpush3.bf16.msra.mxu0 %v5005_v45  ;;  %v2043_v10 = vmax.f32 %v1809_v4, 0.0 }
 0x34d   :  { %v4704_v11 = vpop.f32.mrf.mxu1  ;;  %4840 = vmatprep.subr.bf16.mxu0 %v5006_v46 }
 0x34e   :  { %v2041_v13 = vmax.f32 %v1801_v9, 0.0  ;;  %v2103_v18 = vpack.c.bf16 %v2043_v10, %v2042_v15  ;;  %v1822_v22 = vadd.f32 %v4704_v11, %v5801_v6 }
 0x34f   :  { %v1813_v16 = vpop.f32.mrf.mxu1 }
 0x350   :  { %v2102_v17 = vpack.c.bf16 %v2041_v13, %v2040_v12  ;;  %4841 = vmatpush3.bf16.msra.mxu0 %v5006_v46  ;;  %v1814_v20 = vadd.f32 %v5801_v6, %v1813_v16  ;;  %v2046_v29 = vmax.f32 %v1822_v22, 0.0 }
 0x351   :  { %v4705_v19 = vpop.f32.mrf.mxu1  ;;  %4842 = vmatprep.subr.bf16.mxu0 %v5007_v50 }
 0x352   :  { %v1825_v21 = vadd.f32 %v4705_v19, %v5801_v6  ;;  %4778 = vmatprep.mubr.bf16.mxu0 %v2102_v17  ;;  %v2044_v27 = vmax.f32 %v1814_v20, 0.0 }
 0x353   :  { %v1816_v23 = vpop.f32.mrf.mxu1  ;;  %4779 = vmatmul.mubr.bf16.gmra.mxu0 %v2103_v18 }
 0x354   :  { %v1817_v47 = vadd.f32 %v5801_v6, %v1816_v23  ;;  %4843 = vmatpush3.bf16.msra.mxu0 %v5007_v50  ;;  %v2047_v24 = vmax.f32 %v1825_v21, 0.0 }
 0x355   :  { %v4708_v25 = vpop.f32.mrf.mxu1  ;;  %4844 = vmatprep.subr.bf16.mxu0 %v5008_v56 }
 0x356   :  { %v2045_v28 = vmax.f32 %v1817_v47, 0.0  ;;  %v2105_v32 = vpack.c.bf16 %v2047_v24, %v2046_v29  ;;  %v1838_v36 = vadd.f32 %v4708_v25, %v5801_v6 }
 0x357   :  { %v1829_v30 = vpop.f32.mrf.mxu1 }
 0x358   :  { %v2104_v31 = vpack.c.bf16 %v2045_v28, %v2044_v27  ;;  %4845 = vmatpush3.bf16.msra.mxu0 %v5008_v56  ;;  %v1830_v34 = vadd.f32 %v5801_v6, %v1829_v30  ;;  %v2050_v43 = vmax.f32 %v1838_v36, 0.0 }
 0x359   :  { %v4709_v33 = vpop.f32.mrf.mxu1  ;;  %4846 = vmatprep.subr.bf16.mxu0 %v5009_v62 }
 0x35a   :  { %v1841_v35 = vadd.f32 %v4709_v33, %v5801_v6  ;;  %4782 = vmatprep.mubr.bf16.mxu0 %v2104_v31  ;;  %v2048_v41 = vmax.f32 %v1830_v34, 0.0 }
 0x35b   :  { %v1832_v37 = vpop.f32.mrf.mxu1  ;;  %4783 = vmatmul.mubr.bf16.gmra.mxu0 %v2105_v32 }
 0x35c   :  { %v1833_v38 = vadd.f32 %v5801_v6, %v1832_v37  ;;  %4847 = vmatpush3.bf16.msra.mxu0 %v5009_v62  ;;  %v2051_v39 = vmax.f32 %v1841_v35, 0.0 }
 0x35d   :  { %v4712_v40 = vpop.f32.mrf.mxu1  ;;  %4848 = vmatprep.subr.bf16.mxu0 %v5010_v5 }
 0x35e   :  { %v2049_v42 = vmax.f32 %v1833_v38, 0.0  ;;  %v2107_v46 = vpack.c.bf16 %v2051_v39, %v2050_v43  ;;  %v1854_v51 = vadd.f32 %v4712_v40, %v5801_v6 }
 0x35f   :  { %v1845_v44 = vpop.f32.mrf.mxu1 }
 0x360   :  { %v2106_v45 = vpack.c.bf16 %v2049_v42, %v2048_v41  ;;  %4849 = vmatpush3.bf16.msra.mxu0 %v5010_v5  ;;  %v1846_v49 = vadd.f32 %v5801_v6, %v1845_v44  ;;  %v2054_v58 = vmax.f32 %v1854_v51, 0.0 }
 0x361   :  { %v4713_v48 = vpop.f32.mrf.mxu1  ;;  %4850 = vmatprep.subr.bf16.mxu0 %v5011_v14 }
 0x362   :  { %v1857_v50 = vadd.f32 %v4713_v48, %v5801_v6  ;;  %4786 = vmatprep.mubr.bf16.mxu0 %v2106_v45  ;;  %v2052_v56 = vmax.f32 %v1846_v49, 0.0 }
 0x363   :  { %v1848_v52 = vpop.f32.mrf.mxu1  ;;  %4787 = vmatmul.mubr.bf16.gmra.mxu0 %v2107_v46 }
 0x364   :  { %v1849_v53 = vadd.f32 %v5801_v6, %v1848_v52  ;;  %4851 = vmatpush3.bf16.msra.mxu0 %v5011_v14  ;;  %v2055_v54 = vmax.f32 %v1857_v50, 0.0 }
 0x365   :  { %v4716_v55 = vpop.f32.mrf.mxu1 }
 0x366   :  { %v2053_v57 = vmax.f32 %v1849_v53, 0.0  ;;  %v2109_v61 = vpack.c.bf16 %v2055_v54, %v2054_v58  ;;  %v1870_v1 = vadd.f32 %v4716_v55, %v5801_v6 }
 0x367   :  { %v1861_v59 = vpop.f32.mrf.mxu1 }
 0x368   :  { %v2108_v60 = vpack.c.bf16 %v2053_v57, %v2052_v56  ;;  %v1862_v63 = vadd.f32 %v5801_v6, %v1861_v59  ;;  %v2058_v8 = vmax.f32 %v1870_v1, 0.0 }
 0x369   :  { %v4717_v62 = vpop.f32.mrf.mxu1 }
 0x36a   :  { %v1873_v0 = vadd.f32 %v4717_v62, %v5801_v6  ;;  %4790 = vmatprep.mubr.bf16.mxu0 %v2108_v60  ;;  %v2056_v5 = vmax.f32 %v1862_v63, 0.0 }
 0x36b   :  { %v1864_v2 = vpop.f32.mrf.mxu1  ;;  %4791 = vmatmul.mubr.bf16.gmra.mxu0 %v2109_v61 }
 0x36c   :  { %v1865_v3 = vadd.f32 %v5801_v6, %v1864_v2  ;;  %v2059_v26 = vmax.f32 %v1873_v0, 0.0 }
 0x36d   :  { %v4720_v4 = vpop.f32.mrf.mxu1 }
 0x36e   :  { %v2057_v7 = vmax.f32 %v1865_v3, 0.0  ;;  %v2111_v11 = vpack.c.bf16 %v2059_v26, %v2058_v8  ;;  %v1886_v15 = vadd.f32 %v4720_v4, %v5801_v6 }
 0x36f   :  { %v1877_v9 = vpop.f32.mrf.mxu1 }
 0x370   :  { %v2110_v10 = vpack.c.bf16 %v2057_v7, %v2056_v5  ;;  %v1878_v13 = vadd.f32 %v5801_v6, %v1877_v9  ;;  %v2062_v22 = vmax.f32 %v1886_v15, 0.0 }
 0x371   :  { %v4721_v12 = vpop.f32.mrf.mxu1 }
 0x372   :  { %v1889_v14 = vadd.f32 %v4721_v12, %v5801_v6  ;;  %4794 = vmatprep.mubr.bf16.mxu0 %v2110_v10  ;;  %v2060_v20 = vmax.f32 %v1878_v13, 0.0  ;;  %v5012_v10 = vld [vmem:[#allocation2] sm:$0xff]  }
 0x373   :  { %v1880_v16 = vpop.f32.mrf.mxu1  ;;  %4795 = vmatmul.mubr.bf16.gmra.mxu0 %v2111_v11  ;;  %4925 = vmatprep.subr.bf16.mxu1 %v5012_v10 }
 0x374   :  { %v1881_v17 = vadd.f32 %v5801_v6, %v1880_v16  ;;  %v2063_v18 = vmax.f32 %v1889_v14, 0.0  ;;  %4852 = vmatprep.subr.bf16.mxu0 %v5012_v10  ;;  %4933 = vmatpush3.bf16.msra.mxu1 %v5012_v10 }
 0x375   :  { %v4724_v19 = vpop.f32.mrf.mxu1  ;;  %4853 = vmatpush3.bf16.msra.mxu0 %v5012_v10 }
 0x376   :  { %v2061_v21 = vmax.f32 %v1881_v17, 0.0  ;;  %v2113_v24 = vpack.c.bf16 %v2063_v18, %v2062_v22  ;;  %v1902_v29 = vadd.f32 %v4724_v19, %v5801_v6 }
 0x377   :  { %v1893_v23 = vpop.f32.mrf.mxu1 }
 0x378   :  { %v2112_v47 = vpack.c.bf16 %v2061_v21, %v2060_v20  ;;  %v1894_v27 = vadd.f32 %v5801_v6, %v1893_v23  ;;  %v2066_v36 = vmax.f32 %v1902_v29, 0.0 }
 0x379   :  { %v4725_v25 = vpop.f32.mrf.mxu1 }
 0x37a   :  { %v1905_v28 = vadd.f32 %v4725_v25, %v5801_v6  ;;  %4798 = vmatprep.mubr.bf16.mxu0 %v2112_v47  ;;  %v2064_v34 = vmax.f32 %v1894_v27, 0.0 }
 0x37b   :  { %v1896_v30 = vpop.f32.mrf.mxu1  ;;  %4799 = vmatmul.mubr.bf16.gmra.mxu0 %v2113_v24 }
 0x37c   :  { %v1897_v31 = vadd.f32 %v5801_v6, %v1896_v30  ;;  %v2067_v32 = vmax.f32 %v1905_v28, 0.0 }
 0x37d   :  { %v4728_v33 = vpop.f32.mrf.mxu1 }
 0x37e   :  { %v2065_v35 = vmax.f32 %v1897_v31, 0.0  ;;  %v2115_v39 = vpack.c.bf16 %v2067_v32, %v2066_v36  ;;  %v1918_v43 = vadd.f32 %v4728_v33, %v5801_v6 }
 0x37f   :  { %v1909_v37 = vpop.f32.mrf.mxu1 }
 0x380   :  { %v2114_v38 = vpack.c.bf16 %v2065_v35, %v2064_v34  ;;  %v1910_v41 = vadd.f32 %v5801_v6, %v1909_v37  ;;  %v2070_v51 = vmax.f32 %v1918_v43, 0.0 }
 0x381   :  { %v4729_v40 = vpop.f32.mrf.mxu1 }
 0x382   :  { %v1921_v42 = vadd.f32 %v4729_v40, %v5801_v6  ;;  %4802 = vmatprep.mubr.bf16.mxu0 %v2114_v38  ;;  %v2068_v49 = vmax.f32 %v1910_v41, 0.0 }
 0x383   :  { %v1912_v44 = vpop.f32.mrf.mxu1  ;;  %4803 = vmatmul.mubr.bf16.gmra.mxu0 %v2115_v39 }
 0x384   :  { %v1913_v45 = vadd.f32 %v5801_v6, %v1912_v44  ;;  %v2071_v46 = vmax.f32 %v1921_v42, 0.0 }
 0x385   :  { %v4732_v48 = vpop.f32.mrf.mxu1 }
 0x386   :  { %v2069_v50 = vmax.f32 %v1913_v45, 0.0  ;;  %v2117_v54 = vpack.c.bf16 %v2071_v46, %v2070_v51  ;;  %v1934_v58 = vadd.f32 %v4732_v48, %v5801_v6 }
 0x387   :  { %v1925_v52 = vpop.f32.mrf.mxu1 }
 0x388   :  { %v2116_v53 = vpack.c.bf16 %v2069_v50, %v2068_v49  ;;  %v1926_v56 = vadd.f32 %v5801_v6, %v1925_v52  ;;  %v2074_v1 = vmax.f32 %v1934_v58, 0.0 }
 0x389   :  { %v4733_v55 = vpop.f32.mrf.mxu1 }
 0x38a   :  { %v1937_v57 = vadd.f32 %v4733_v55, %v5801_v6  ;;  %4806 = vmatprep.mubr.bf16.mxu0 %v2116_v53  ;;  %v2072_v63 = vmax.f32 %v1926_v56, 0.0 }
 0x38b   :  { %v1928_v59 = vpop.f32.mrf.mxu1  ;;  %4807 = vmatmul.mubr.bf16.gmra.mxu0 %v2117_v54 }
 0x38c   :  { %v1929_v60 = vadd.f32 %v5801_v6, %v1928_v59  ;;  %v2075_v61 = vmax.f32 %v1937_v57, 0.0 }
 0x38d   :  { %v4736_v62 = vpop.f32.mrf.mxu1 }
 0x38e   :  { %v2073_v0 = vmax.f32 %v1929_v60, 0.0  ;;  %v2119_v26 = vpack.c.bf16 %v2075_v61, %v2074_v1  ;;  %v1950_v8 = vadd.f32 %v4736_v62, %v5801_v6 }
 0x38f   :  { %v1941_v2 = vpop.f32.mrf.mxu1 }
 0x390   :  { %v2118_v3 = vpack.c.bf16 %v2073_v0, %v2072_v63  ;;  %v1942_v5 = vadd.f32 %v5801_v6, %v1941_v2  ;;  %v2078_v16 = vmax.f32 %v1950_v8, 0.0 }
 0x391   :  { %v4737_v4 = vpop.f32.mrf.mxu1 }
 0x392   :  { %v1953_v7 = vadd.f32 %v4737_v4, %v5801_v6  ;;  %4810 = vmatprep.mubr.bf16.mxu0 %v2118_v3  ;;  %v2076_v14 = vmax.f32 %v1942_v5, 0.0 }
 0x393   :  { %v1944_v9 = vpop.f32.mrf.mxu1  ;;  %4811 = vmatmul.mubr.bf16.gmra.mxu0 %v2119_v26 }
 0x394   :  { %v1945_v11 = vadd.f32 %v5801_v6, %v1944_v9  ;;  %v2079_v12 = vmax.f32 %v1953_v7, 0.0 }
 0x395   :  { %v4740_v13 = vpop.f32.mrf.mxu1 }
 0x396   :  { %v2077_v15 = vmax.f32 %v1945_v11, 0.0  ;;  %v2121_v19 = vpack.c.bf16 %v2079_v12, %v2078_v16  ;;  %v1966_v23 = vadd.f32 %v4740_v13, %v5801_v6 }
 0x397   :  { %v1957_v17 = vpop.f32.mrf.mxu1 }
 0x398   :  { %v2120_v18 = vpack.c.bf16 %v2077_v15, %v2076_v14  ;;  %v1958_v21 = vadd.f32 %v5801_v6, %v1957_v17  ;;  %v2082_v30 = vmax.f32 %v1966_v23, 0.0 }
 0x399   :  { %v4741_v20 = vpop.f32.mrf.mxu1 }
 0x39a   :  { %v1969_v22 = vadd.f32 %v4741_v20, %v5801_v6  ;;  %4814 = vmatprep.mubr.bf16.mxu0 %v2120_v18  ;;  %v2080_v28 = vmax.f32 %v1958_v21, 0.0 }
 0x39b   :  { %v1960_v47 = vpop.f32.mrf.mxu1  ;;  %4815 = vmatmul.mubr.bf16.gmra.mxu0 %v2121_v19 }
 0x39c   :  { %v1961_v24 = vadd.f32 %v5801_v6, %v1960_v47  ;;  %v2083_v25 = vmax.f32 %v1969_v22, 0.0 }
 0x39d   :  { %v4744_v27 = vpop.f32.mrf.mxu1 }
 0x39e   :  { %v2081_v29 = vmax.f32 %v1961_v24, 0.0  ;;  %v2123_v33 = vpack.c.bf16 %v2083_v25, %v2082_v30  ;;  %v1982_v37 = vadd.f32 %v4744_v27, %v5801_v6  ;;  %v5870_v27 = vld [vmem:[%s7337_s4 + $0x3] ss:$0 sm:$0xff] }
 0x39f   :  { %v1973_v31 = vpop.f32.mrf.mxu1 }
 0x3a0   :  { %v2122_v32 = vpack.c.bf16 %v2081_v29, %v2080_v28  ;;  %v1974_v35 = vadd.f32 %v5801_v6, %v1973_v31  ;;  %v2086_v44 = vmax.f32 %v1982_v37, 0.0 }
 0x3a1   :  { %v4745_v34 = vpop.f32.mrf.mxu1 }
 0x3a2   :  { %v1985_v36 = vadd.f32 %v4745_v34, %v5801_v6  ;;  %4818 = vmatprep.mubr.bf16.mxu0 %v2122_v32  ;;  %v2084_v42 = vmax.f32 %v1974_v35, 0.0 }
 0x3a3   :  { %v1976_v38 = vpop.f32.mrf.mxu1  ;;  %4819 = vmatmul.mubr.bf16.gmra.mxu0 %v2123_v33 }
 0x3a4   :  { %v1977_v39 = vadd.f32 %v5801_v6, %v1976_v38  ;;  %v2087_v40 = vmax.f32 %v1985_v36, 0.0 }
 0x3a5   :  { %v4748_v41 = vpop.f32.mrf.mxu1 }
 0x3a6   :  { %v2085_v43 = vmax.f32 %v1977_v39, 0.0  ;;  %v2125_v48 = vpack.c.bf16 %v2087_v40, %v2086_v44  ;;  %v1998_v52 = vadd.f32 %v4748_v41, %v5801_v6 }
 0x3a7   :  { %v1989_v45 = vpop.f32.mrf.mxu1 }
 0x3a8   :  { %v2124_v46 = vpack.c.bf16 %v2085_v43, %v2084_v42  ;;  %v1990_v50 = vadd.f32 %v5801_v6, %v1989_v45  ;;  %v2090_v59 = vmax.f32 %v1998_v52, 0.0 }
 0x3a9   :  { %v4749_v49 = vpop.f32.mrf.mxu1 }
 0x3aa   :  { %v2001_v51 = vadd.f32 %v4749_v49, %v5801_v6  ;;  %4822 = vmatprep.mubr.bf16.mxu0 %v2124_v46  ;;  %v2088_v57 = vmax.f32 %v1990_v50, 0.0 }
 0x3ab   :  { %v1992_v53 = vpop.f32.mrf.mxu1  ;;  %4823 = vmatmul.mubr.bf16.gmra.mxu0 %v2125_v48 }
 0x3ac   :  { %v1993_v54 = vadd.f32 %v5801_v6, %v1992_v53  ;;  %v2091_v55 = vmax.f32 %v2001_v51, 0.0 }
 0x3ad   :  { %v4752_v56 = vpop.f32.mrf.mxu1 }
 0x3ae   :  { %v2089_v58 = vmax.f32 %v1993_v54, 0.0  ;;  %v2127_v62 = vpack.c.bf16 %v2091_v55, %v2090_v59  ;;  %v2014_v2 = vadd.f32 %v4752_v56, %v5801_v6 }
 0x3af   :  { %v2005_v60 = vpop.f32.mrf.mxu1 }
 0x3b0   :  { %v2126_v61 = vpack.c.bf16 %v2089_v58, %v2088_v57  ;;  %v2006_v0 = vadd.f32 %v5801_v6, %v2005_v60  ;;  %v2094_v9 = vmax.f32 %v2014_v2, 0.0 }
 0x3b1   :  { %v4753_v63 = vpop.f32.mrf.mxu1 }
 0x3b2   :  { %v2017_v1 = vadd.f32 %v4753_v63, %v5801_v6  ;;  %4826 = vmatprep.mubr.bf16.mxu0 %v2126_v61  ;;  %v2092_v7 = vmax.f32 %v2006_v0, 0.0 }
 0x3b3   :  { %v2008_v3 = vpop.f32.mrf.mxu1  ;;  %4827 = vmatmul.mubr.bf16.gmra.mxu0 %v2127_v62 }
 0x3b4   :  { %v2009_v26 = vadd.f32 %v5801_v6, %v2008_v3  ;;  %v2095_v4 = vmax.f32 %v2017_v1, 0.0 }
 0x3b5   :  { %v4756_v5 = vpop.f32.mrf.mxu1 }
 0x3b6   :  { %v2093_v8 = vmax.f32 %v2009_v26, 0.0  ;;  %v2129_v12 = vpack.c.bf16 %v2095_v4, %v2094_v9  ;;  %v2030_v16 = vadd.f32 %v4756_v5, %v5801_v6 }
 0x3b7   :  { %v2021_v10 = vpop.f32.mrf.mxu1 }
 0x3b8   :  { %v2128_v11 = vpack.c.bf16 %v2093_v8, %v2092_v7  ;;  %v2022_v14 = vadd.f32 %v5801_v6, %v2021_v10  ;;  %v2098_v22 = vmax.f32 %v2030_v16, 0.0 }
 0x3b9   :  { %v4757_v13 = vpop.f32.mrf.mxu1 }
 0x3ba   :  { %v2033_v15 = vadd.f32 %v4757_v13, %v5801_v6  ;;  %4830 = vmatprep.mubr.bf16.mxu0 %v2128_v11  ;;  %v2096_v20 = vmax.f32 %v2022_v14, 0.0 }
 0x3bb   :  { %v2024_v17 = vpop.f32.mrf.mxu1  ;;  %4831 = vmatmul.mubr.bf16.gmra.mxu0 %v2129_v12 }
 0x3bc   :  { %v2025_v18 = vadd.f32 %v5801_v6, %v2024_v17  ;;  %v2099_v19 = vmax.f32 %v2033_v15, 0.0 }
 0x3be   :  { %v2097_v21 = vmax.f32 %v2025_v18, 0.0  ;;  %v2131_v47 = vpack.c.bf16 %v2099_v19, %v2098_v22 }
 0x3c0   :  { %v2130_v23 = vpack.c.bf16 %v2097_v21, %v2096_v20 }
 0x3c2   :  { %4834 = vmatprep.mubr.bf16.mxu0 %v2130_v23 }
 0x3c3   :  { %4835 = vmatmul.mubr.bf16.gmra.mxu0 %v2131_v47 }
 0x40b   :  { %v4776_v24 = vpop.f32.mrf.mxu0 }
 0x40c   :  { %v2248_v30 = vadd.f32 %v4776_v24, %v5870_v27 }
 0x40d   :  { %v2239_v25 = vpop.f32.mrf.mxu0 }
 0x40e   :  { %v2240_v29 = vadd.f32 %v5870_v27, %v2239_v25  ;;  %v2496_v37 = vmax.f32 %v2248_v30, 0.0 }
 0x40f   :  { %v4777_v28 = vpop.f32.mrf.mxu0 }
 0x410   :  { %v2251_v6 = vadd.f32 %v4777_v28, %v5870_v27  ;;  %v2494_v35 = vmax.f32 %v2240_v29, 0.0 }
 0x411   :  { %v2242_v31 = vpop.f32.mrf.mxu0 }
 0x412   :  { %v2243_v32 = vadd.f32 %v5870_v27, %v2242_v31  ;;  %v2497_v33 = vmax.f32 %v2251_v6, 0.0 }
 0x413   :  { %v4780_v34 = vpop.f32.mrf.mxu0 }
 0x414   :  { %v2495_v36 = vmax.f32 %v2243_v32, 0.0  ;;  %v2559_v40 = vpack.c.bf16 %v2497_v33, %v2496_v37  ;;  %v2264_v44 = vadd.f32 %v4780_v34, %v5870_v27 }
 0x415   :  { %v2255_v38 = vpop.f32.mrf.mxu0 }
 0x416   :  { %v2558_v39 = vpack.c.bf16 %v2495_v36, %v2494_v35  ;;  %v2256_v42 = vadd.f32 %v5870_v27, %v2255_v38  ;;  %v2500_v52 = vmax.f32 %v2264_v44, 0.0 }
 0x417   :  { %v4781_v41 = vpop.f32.mrf.mxu0 }
 0x418   :  { %v2267_v43 = vadd.f32 %v4781_v41, %v5870_v27  ;;  %4854 = vmatprep.mubr.bf16.mxu0 %v2558_v39  ;;  %v2498_v50 = vmax.f32 %v2256_v42, 0.0 }
 0x419   :  { %v2258_v45 = vpop.f32.mrf.mxu0  ;;  %4855 = vmatmul.mubr.bf16.vlgmr.msra.gmra.mxu0 %v2559_v40 }
 0x41a   :  { %v2259_v46 = vadd.f32 %v5870_v27, %v2258_v45  ;;  %v2501_v48 = vmax.f32 %v2267_v43, 0.0 }
 0x41b   :  { %v4784_v49 = vpop.f32.mrf.mxu0 }
 0x41c   :  { %v2499_v51 = vmax.f32 %v2259_v46, 0.0  ;;  %v2561_v55 = vpack.c.bf16 %v2501_v48, %v2500_v52  ;;  %v2280_v59 = vadd.f32 %v4784_v49, %v5870_v27 }
 0x41d   :  { %v2271_v53 = vpop.f32.mrf.mxu0 }
 0x41e   :  { %v2560_v54 = vpack.c.bf16 %v2499_v51, %v2498_v50  ;;  %v2272_v57 = vadd.f32 %v5870_v27, %v2271_v53  ;;  %v2504_v2 = vmax.f32 %v2280_v59, 0.0 }
 0x41f   :  { %v4785_v56 = vpop.f32.mrf.mxu0 }
 0x420   :  { %v2283_v58 = vadd.f32 %v4785_v56, %v5870_v27  ;;  %4858 = vmatprep.mubr.bf16.mxu1 %v2560_v54  ;;  %v2502_v0 = vmax.f32 %v2272_v57, 0.0 }
 0x421   :  { %v2274_v60 = vpop.f32.mrf.mxu0  ;;  %4859 = vmatmul.mubr.bf16.vlgmr.msra.gmra.mxu1 %v2561_v55 }
 0x422   :  { %v2275_v61 = vadd.f32 %v5870_v27, %v2274_v60  ;;  %v2505_v62 = vmax.f32 %v2283_v58, 0.0 }
 0x423   :  { %v4788_v63 = vpop.f32.mrf.mxu0 }
 0x424   :  { %v2503_v1 = vmax.f32 %v2275_v61, 0.0  ;;  %v2563_v4 = vpack.c.bf16 %v2505_v62, %v2504_v2  ;;  %v2296_v9 = vadd.f32 %v4788_v63, %v5870_v27 }
 0x425   :  { %v2287_v3 = vpop.f32.mrf.mxu0 }
 0x426   :  { %v2562_v26 = vpack.c.bf16 %v2503_v1, %v2502_v0  ;;  %v2288_v7 = vadd.f32 %v5870_v27, %v2287_v3  ;;  %v2508_v16 = vmax.f32 %v2296_v9, 0.0 }
 0x427   :  { %v4789_v5 = vpop.f32.mrf.mxu0 }
 0x428   :  { %v2299_v8 = vadd.f32 %v4789_v5, %v5870_v27  ;;  %4862 = vmatprep.mubr.bf16.mxu1 %v2562_v26  ;;  %v2506_v14 = vmax.f32 %v2288_v7, 0.0 }
 0x429   :  { %v2290_v10 = vpop.f32.mrf.mxu0  ;;  %4863 = vmatmul.mubr.bf16.gmra.mxu1 %v2563_v4 }
 0x42a   :  { %v2291_v11 = vadd.f32 %v5870_v27, %v2290_v10  ;;  %v2509_v12 = vmax.f32 %v2299_v8, 0.0 }
 0x42b   :  { %v4792_v13 = vpop.f32.mrf.mxu0 }
 0x42c   :  { %v2507_v15 = vmax.f32 %v2291_v11, 0.0  ;;  %v2565_v19 = vpack.c.bf16 %v2509_v12, %v2508_v16  ;;  %v2312_v23 = vadd.f32 %v4792_v13, %v5870_v27 }
 0x42d   :  { %v2303_v17 = vpop.f32.mrf.mxu0 }
 0x42e   :  { %v2564_v18 = vpack.c.bf16 %v2507_v15, %v2506_v14  ;;  %v2304_v21 = vadd.f32 %v5870_v27, %v2303_v17  ;;  %v2512_v30 = vmax.f32 %v2312_v23, 0.0 }
 0x42f   :  { %v4793_v20 = vpop.f32.mrf.mxu0 }
 0x430   :  { %v2315_v22 = vadd.f32 %v4793_v20, %v5870_v27  ;;  %4866 = vmatprep.mubr.bf16.mxu1 %v2564_v18  ;;  %v2510_v29 = vmax.f32 %v2304_v21, 0.0 }
 0x431   :  { %v2306_v47 = vpop.f32.mrf.mxu0  ;;  %4867 = vmatmul.mubr.bf16.gmra.mxu1 %v2565_v19 }
 0x432   :  { %v2307_v24 = vadd.f32 %v5870_v27, %v2306_v47  ;;  %v2513_v25 = vmax.f32 %v2315_v22, 0.0 }
 0x433   :  { %v4796_v28 = vpop.f32.mrf.mxu0 }
 0x434   :  { %v2511_v6 = vmax.f32 %v2307_v24, 0.0  ;;  %v2567_v33 = vpack.c.bf16 %v2513_v25, %v2512_v30  ;;  %v2328_v37 = vadd.f32 %v4796_v28, %v5870_v27 }
 0x435   :  { %v2319_v31 = vpop.f32.mrf.mxu0 }
 0x436   :  { %v2566_v32 = vpack.c.bf16 %v2511_v6, %v2510_v29  ;;  %v2320_v35 = vadd.f32 %v5870_v27, %v2319_v31  ;;  %v2516_v44 = vmax.f32 %v2328_v37, 0.0 }
 0x437   :  { %v4797_v34 = vpop.f32.mrf.mxu0 }
 0x438   :  { %v2331_v36 = vadd.f32 %v4797_v34, %v5870_v27  ;;  %4870 = vmatprep.mubr.bf16.mxu1 %v2566_v32  ;;  %v2514_v42 = vmax.f32 %v2320_v35, 0.0 }
 0x439   :  { %v2322_v38 = vpop.f32.mrf.mxu0  ;;  %4871 = vmatmul.mubr.bf16.gmra.mxu1 %v2567_v33 }
 0x43a   :  { %v2323_v39 = vadd.f32 %v5870_v27, %v2322_v38  ;;  %v2517_v40 = vmax.f32 %v2331_v36, 0.0 }
 0x43b   :  { %v4800_v41 = vpop.f32.mrf.mxu0 }
 0x43c   :  { %v2515_v43 = vmax.f32 %v2323_v39, 0.0  ;;  %v2569_v48 = vpack.c.bf16 %v2517_v40, %v2516_v44  ;;  %v2344_v52 = vadd.f32 %v4800_v41, %v5870_v27 }
 0x43d   :  { %v2335_v45 = vpop.f32.mrf.mxu0 }
 0x43e   :  { %v2568_v46 = vpack.c.bf16 %v2515_v43, %v2514_v42  ;;  %v2336_v50 = vadd.f32 %v5870_v27, %v2335_v45  ;;  %v2520_v59 = vmax.f32 %v2344_v52, 0.0 }
 0x43f   :  { %v4801_v49 = vpop.f32.mrf.mxu0 }
 0x440   :  { %v2347_v51 = vadd.f32 %v4801_v49, %v5870_v27  ;;  %4874 = vmatprep.mubr.bf16.mxu1 %v2568_v46  ;;  %v2518_v57 = vmax.f32 %v2336_v50, 0.0 }
 0x441   :  { %v2338_v53 = vpop.f32.mrf.mxu0  ;;  %4875 = vmatmul.mubr.bf16.gmra.mxu1 %v2569_v48 }
 0x442   :  { %v2339_v54 = vadd.f32 %v5870_v27, %v2338_v53  ;;  %v2521_v55 = vmax.f32 %v2347_v51, 0.0 }
 0x443   :  { %v4804_v56 = vpop.f32.mrf.mxu0 }
 0x444   :  { %v2519_v58 = vmax.f32 %v2339_v54, 0.0  ;;  %v2571_v62 = vpack.c.bf16 %v2521_v55, %v2520_v59  ;;  %v2360_v2 = vadd.f32 %v4804_v56, %v5870_v27 }
 0x445   :  { %v2351_v60 = vpop.f32.mrf.mxu0 }
 0x446   :  { %v2570_v61 = vpack.c.bf16 %v2519_v58, %v2518_v57  ;;  %v2352_v0 = vadd.f32 %v5870_v27, %v2351_v60  ;;  %v2524_v9 = vmax.f32 %v2360_v2, 0.0 }
 0x447   :  { %v4805_v63 = vpop.f32.mrf.mxu0 }
 0x448   :  { %v2363_v1 = vadd.f32 %v4805_v63, %v5870_v27  ;;  %4878 = vmatprep.mubr.bf16.mxu1 %v2570_v61  ;;  %v2522_v7 = vmax.f32 %v2352_v0, 0.0 }
 0x449   :  { %v2354_v3 = vpop.f32.mrf.mxu0  ;;  %4879 = vmatmul.mubr.bf16.gmra.mxu1 %v2571_v62 }
 0x44a   :  { %v2355_v26 = vadd.f32 %v5870_v27, %v2354_v3  ;;  %v2525_v4 = vmax.f32 %v2363_v1, 0.0 }
 0x44b   :  { %v4808_v5 = vpop.f32.mrf.mxu0 }
 0x44c   :  { %v2523_v8 = vmax.f32 %v2355_v26, 0.0  ;;  %v2573_v12 = vpack.c.bf16 %v2525_v4, %v2524_v9  ;;  %v2376_v16 = vadd.f32 %v4808_v5, %v5870_v27 }
 0x44d   :  { %v2367_v10 = vpop.f32.mrf.mxu0 }
 0x44e   :  { %v2572_v11 = vpack.c.bf16 %v2523_v8, %v2522_v7  ;;  %v2368_v14 = vadd.f32 %v5870_v27, %v2367_v10  ;;  %v2528_v23 = vmax.f32 %v2376_v16, 0.0 }
 0x44f   :  { %v4809_v13 = vpop.f32.mrf.mxu0 }
 0x450   :  { %v2379_v15 = vadd.f32 %v4809_v13, %v5870_v27  ;;  %4882 = vmatprep.mubr.bf16.mxu1 %v2572_v11  ;;  %v2526_v21 = vmax.f32 %v2368_v14, 0.0 }
 0x451   :  { %v2370_v17 = vpop.f32.mrf.mxu0  ;;  %4883 = vmatmul.mubr.bf16.gmra.mxu1 %v2573_v12 }
 0x452   :  { %v2371_v18 = vadd.f32 %v5870_v27, %v2370_v17  ;;  %v2529_v19 = vmax.f32 %v2379_v15, 0.0 }
 0x453   :  { %v4812_v20 = vpop.f32.mrf.mxu0 }
 0x454   :  { %v2527_v22 = vmax.f32 %v2371_v18, 0.0  ;;  %v2575_v25 = vpack.c.bf16 %v2529_v19, %v2528_v23  ;;  %v2392_v30 = vadd.f32 %v4812_v20, %v5870_v27 }
 0x455   :  { %v2383_v47 = vpop.f32.mrf.mxu0 }
 0x456   :  { %v2574_v24 = vpack.c.bf16 %v2527_v22, %v2526_v21  ;;  %v2384_v29 = vadd.f32 %v5870_v27, %v2383_v47  ;;  %v2532_v37 = vmax.f32 %v2392_v30, 0.0 }
 0x457   :  { %v4813_v28 = vpop.f32.mrf.mxu0 }
 0x458   :  { %v2395_v6 = vadd.f32 %v4813_v28, %v5870_v27  ;;  %4886 = vmatprep.mubr.bf16.mxu1 %v2574_v24  ;;  %v2530_v35 = vmax.f32 %v2384_v29, 0.0 }
 0x459   :  { %v2386_v31 = vpop.f32.mrf.mxu0  ;;  %4887 = vmatmul.mubr.bf16.gmra.mxu1 %v2575_v25 }
 0x45a   :  { %v2387_v32 = vadd.f32 %v5870_v27, %v2386_v31  ;;  %v2533_v33 = vmax.f32 %v2395_v6, 0.0 }
 0x45b   :  { %v4816_v34 = vpop.f32.mrf.mxu0 }
 0x45c   :  { %v2531_v36 = vmax.f32 %v2387_v32, 0.0  ;;  %v2577_v40 = vpack.c.bf16 %v2533_v33, %v2532_v37  ;;  %v2408_v44 = vadd.f32 %v4816_v34, %v5870_v27 }
 0x45d   :  { %v2399_v38 = vpop.f32.mrf.mxu0 }
 0x45e   :  { %v2576_v39 = vpack.c.bf16 %v2531_v36, %v2530_v35  ;;  %v2400_v42 = vadd.f32 %v5870_v27, %v2399_v38  ;;  %v2536_v52 = vmax.f32 %v2408_v44, 0.0 }
 0x45f   :  { %v4817_v41 = vpop.f32.mrf.mxu0 }
 0x460   :  { %v2411_v43 = vadd.f32 %v4817_v41, %v5870_v27  ;;  %4890 = vmatprep.mubr.bf16.mxu1 %v2576_v39  ;;  %v2534_v50 = vmax.f32 %v2400_v42, 0.0 }
 0x461   :  { %v2402_v45 = vpop.f32.mrf.mxu0  ;;  %4891 = vmatmul.mubr.bf16.gmra.mxu1 %v2577_v40 }
 0x462   :  { %v2403_v46 = vadd.f32 %v5870_v27, %v2402_v45  ;;  %v2537_v48 = vmax.f32 %v2411_v43, 0.0 }
 0x463   :  { %v4820_v49 = vpop.f32.mrf.mxu0 }
 0x464   :  { %v2535_v51 = vmax.f32 %v2403_v46, 0.0  ;;  %v2579_v55 = vpack.c.bf16 %v2537_v48, %v2536_v52  ;;  %v2424_v59 = vadd.f32 %v4820_v49, %v5870_v27 }
 0x465   :  { %v2415_v53 = vpop.f32.mrf.mxu0 }
 0x466   :  { %v2578_v54 = vpack.c.bf16 %v2535_v51, %v2534_v50  ;;  %v2416_v57 = vadd.f32 %v5870_v27, %v2415_v53  ;;  %v2540_v2 = vmax.f32 %v2424_v59, 0.0 }
 0x467   :  { %v4821_v56 = vpop.f32.mrf.mxu0 }
 0x468   :  { %v2427_v58 = vadd.f32 %v4821_v56, %v5870_v27  ;;  %4894 = vmatprep.mubr.bf16.mxu1 %v2578_v54  ;;  %v2538_v0 = vmax.f32 %v2416_v57, 0.0 }
 0x469   :  { %v2418_v60 = vpop.f32.mrf.mxu0  ;;  %4895 = vmatmul.mubr.bf16.gmra.mxu1 %v2579_v55 }
 0x46a   :  { %v2419_v61 = vadd.f32 %v5870_v27, %v2418_v60  ;;  %v2541_v62 = vmax.f32 %v2427_v58, 0.0 }
 0x46b   :  { %v4824_v63 = vpop.f32.mrf.mxu0 }
 0x46c   :  { %v2539_v1 = vmax.f32 %v2419_v61, 0.0  ;;  %v2581_v4 = vpack.c.bf16 %v2541_v62, %v2540_v2  ;;  %v2440_v9 = vadd.f32 %v4824_v63, %v5870_v27  ;;  %v5939_v61 = vld [vmem:[%s7339_s6] ss:$0 sm:$0xff] }
 0x46d   :  { %v2431_v3 = vpop.f32.mrf.mxu0 }
 0x46e   :  { %v2580_v26 = vpack.c.bf16 %v2539_v1, %v2538_v0  ;;  %v2432_v7 = vadd.f32 %v5870_v27, %v2431_v3  ;;  %v2544_v16 = vmax.f32 %v2440_v9, 0.0 }
 0x46f   :  { %v4825_v5 = vpop.f32.mrf.mxu0 }
 0x470   :  { %v2443_v8 = vadd.f32 %v4825_v5, %v5870_v27  ;;  %4898 = vmatprep.mubr.bf16.mxu1 %v2580_v26  ;;  %v2542_v14 = vmax.f32 %v2432_v7, 0.0 }
 0x471   :  { %v2434_v10 = vpop.f32.mrf.mxu0  ;;  %4899 = vmatmul.mubr.bf16.gmra.mxu1 %v2581_v4 }
 0x472   :  { %v2435_v11 = vadd.f32 %v5870_v27, %v2434_v10  ;;  %v2545_v12 = vmax.f32 %v2443_v8, 0.0 }
 0x473   :  { %v4828_v13 = vpop.f32.mrf.mxu0 }
 0x474   :  { %v2543_v15 = vmax.f32 %v2435_v11, 0.0  ;;  %v2583_v19 = vpack.c.bf16 %v2545_v12, %v2544_v16  ;;  %v2456_v23 = vadd.f32 %v4828_v13, %v5870_v27 }
 0x475   :  { %v2447_v17 = vpop.f32.mrf.mxu0 }
 0x476   :  { %v2582_v18 = vpack.c.bf16 %v2543_v15, %v2542_v14  ;;  %v2448_v21 = vadd.f32 %v5870_v27, %v2447_v17  ;;  %v2548_v30 = vmax.f32 %v2456_v23, 0.0 }
 0x477   :  { %v4829_v20 = vpop.f32.mrf.mxu0 }
 0x478   :  { %v2459_v22 = vadd.f32 %v4829_v20, %v5870_v27  ;;  %4902 = vmatprep.mubr.bf16.mxu1 %v2582_v18  ;;  %v2546_v29 = vmax.f32 %v2448_v21, 0.0 }
 0x479   :  { %v2450_v47 = vpop.f32.mrf.mxu0  ;;  %4903 = vmatmul.mubr.bf16.gmra.mxu1 %v2583_v19 }
 0x47a   :  { %v2451_v24 = vadd.f32 %v5870_v27, %v2450_v47  ;;  %v2549_v25 = vmax.f32 %v2459_v22, 0.0 }
 0x47b   :  { %v4832_v28 = vpop.f32.mrf.mxu0 }
 0x47c   :  { %v2547_v6 = vmax.f32 %v2451_v24, 0.0  ;;  %v2585_v33 = vpack.c.bf16 %v2549_v25, %v2548_v30  ;;  %v2472_v37 = vadd.f32 %v4832_v28, %v5870_v27 }
 0x47d   :  { %v2463_v31 = vpop.f32.mrf.mxu0 }
 0x47e   :  { %v2584_v32 = vpack.c.bf16 %v2547_v6, %v2546_v29  ;;  %v2464_v35 = vadd.f32 %v5870_v27, %v2463_v31  ;;  %v2552_v44 = vmax.f32 %v2472_v37, 0.0 }
 0x47f   :  { %v4833_v34 = vpop.f32.mrf.mxu0 }
 0x480   :  { %v2475_v36 = vadd.f32 %v4833_v34, %v5870_v27  ;;  %4906 = vmatprep.mubr.bf16.mxu1 %v2584_v32  ;;  %v2550_v42 = vmax.f32 %v2464_v35, 0.0 }
 0x481   :  { %v2466_v38 = vpop.f32.mrf.mxu0  ;;  %4907 = vmatmul.mubr.bf16.gmra.mxu1 %v2585_v33 }
 0x482   :  { %v2467_v39 = vadd.f32 %v5870_v27, %v2466_v38  ;;  %v2553_v40 = vmax.f32 %v2475_v36, 0.0  ;;  %v2950_v38 = vlaneseq }
 0x483   :  { %v4836_v41 = vpop.f32.mrf.mxu0 }
 0x484   :  { %v2551_v43 = vmax.f32 %v2467_v39, 0.0  ;;  %v2587_v48 = vpack.c.bf16 %v2553_v40, %v2552_v44  ;;  %v2488_v52 = vadd.f32 %v4836_v41, %v5870_v27 }
 0x485   :  { %v2479_v45 = vpop.f32.mrf.mxu0 }
 0x486   :  { %v2586_v46 = vpack.c.bf16 %v2551_v43, %v2550_v42  ;;  %v2480_v50 = vadd.f32 %v5870_v27, %v2479_v45  ;;  %v2556_v58 = vmax.f32 %v2488_v52, 0.0 }
 0x487   :  { %v4837_v49 = vpop.f32.mrf.mxu0 }
 0x488   :  { %v2491_v51 = vadd.f32 %v4837_v49, %v5870_v27  ;;  %4910 = vmatprep.mubr.bf16.mxu1 %v2586_v46  ;;  %v2554_v56 = vmax.f32 %v2480_v50, 0.0  ;;  %v6016_v49 = vand.u32 127, %v2950_v38 }
 0x489   :  { %v2482_v53 = vpop.f32.mrf.mxu0  ;;  %4911 = vmatmul.mubr.bf16.gmra.mxu1 %v2587_v48 }
 0x48a   :  { %v2483_v54 = vadd.f32 %v5870_v27, %v2482_v53  ;;  %v2557_v55 = vmax.f32 %v2491_v51, 0.0  ;;  %vm3848_vm14 = vcmp.eq.s32.totalorder %v6016_v49, 1 }
 0x48c   :  { %v2555_v57 = vmax.f32 %v2483_v54, 0.0  ;;  %v2589_v60 = vpack.c.bf16 %v2557_v55, %v2556_v58 }
 0x48e   :  { %v2588_v59 = vpack.c.bf16 %v2555_v57, %v2554_v56 }
 0x490   :  { %4914 = vmatprep.mubr.bf16.mxu1 %v2588_v59 }
 0x491   :  { %4915 = vmatmul.mubr.bf16.gmra.mxu1 %v2589_v60 }
 0x4d9   :  { %v4856_v62 = vpop.f32.mrf.mxu0 }
 0x4da   :  { %v5942_v63 = vadd.f32 %v4856_v62, %v5939_v61 }
 0x4db   :  { %v2695_v0 = vpop.f32.mrf.mxu0 }
 0x4dc   :  { %vm2954_vm2 = vcmp.lt.f32.partialorder %v5942_v63, 0.0  ;;  %v5946_v27 = vadd.f32 %v5939_v61, %v2695_v0 }
 0x4dd   :  { %v3018_v1 = vsel %vm2954_vm2, %v5942_v63, 0.0  ;;  %v4857_v2 = vpop.f32.mrf.mxu0 }
 0x4de   :  { %v3084_v3 = vmul.f32 1.442695, %v3018_v1  ;;  %vm2952_vm3 = vcmp.lt.f32.partialorder %v5946_v27, 0.0  ;;  %v5953_v26 = vadd.f32 %v4857_v2, %v5939_v61 }
 0x4df   :  { %v3016_v4 = vsel %vm2952_vm3, %v5946_v27, 0.0  ;;  %v2698_v5 = vpop.f32.mrf.mxu0 }
 0x4e0   :  { %5013 = vpow2.f32 %v3084_v3  ;;  %v3080_v7 = vmul.f32 1.442695, %v3016_v4  ;;  %vm2955_vm4 = vcmp.lt.f32.partialorder %v5953_v26, 0.0  ;;  %v5960_v8 = vadd.f32 %v5939_v61, %v2698_v5 }
 0x4e1   :  { %v3019_v9 = vsel %vm2955_vm4, %v5953_v26, 0.0  ;;  %v4860_v10 = vpop.f32.mrf.mxu1 }
 0x4e2   :  { %5015 = vpow2.f32 %v3080_v7  ;;  %v3086_v11 = vmul.f32 1.442695, %v3019_v9  ;;  %vm2953_vm5 = vcmp.lt.f32.partialorder %v5960_v8, 0.0  ;;  %v5967_v12 = vadd.f32 %v4860_v10, %v5939_v61 }
 0x4e3   :  { %v3017_v13 = vsel %vm2953_vm5, %v5960_v8, 0.0  ;;  %v2711_v14 = vpop.f32.mrf.mxu1 }
 0x4e4   :  { %5017 = vpow2.f32 %v3086_v11  ;;  %v3082_v15 = vmul.f32 1.442695, %v3017_v13  ;;  %vm2958_vm6 = vcmp.lt.f32.partialorder %v5967_v12, 0.0  ;;  %v5974_v16 = vadd.f32 %v5939_v61, %v2711_v14 }
 0x4e5   :  { %v3022_v17 = vsel %vm2958_vm6, %v5967_v12, 0.0  ;;  %v4861_v18 = vpop.f32.mrf.mxu1 }
 0x4e6   :  { %5019 = vpow2.f32 %v3082_v15  ;;  %v3092_v19 = vmul.f32 1.442695, %v3022_v17  ;;  %vm2956_vm7 = vcmp.lt.f32.partialorder %v5974_v16, 0.0  ;;  %v5981_v20 = vadd.f32 %v4861_v18, %v5939_v61 }
 0x4e7   :  { %v3020_v21 = vsel %vm2956_vm7, %v5974_v16, 0.0  ;;  %v2714_v22 = vpop.f32.mrf.mxu1 }
 0x4e8   :  { %5021 = vpow2.f32 %v3092_v19  ;;  %v3088_v23 = vmul.f32 1.442695, %v3020_v21  ;;  %vm2959_vm8 = vcmp.lt.f32.partialorder %v5981_v20, 0.0  ;;  %v5988_v47 = vadd.f32 %v5939_v61, %v2714_v22 }
 0x4e9   :  { %v3023_v24 = vsel %vm2959_vm8, %v5981_v20, 0.0  ;;  %v4864_v25 = vpop.f32.mrf.mxu1 }
 0x4ea   :  { %5023 = vpow2.f32 %v3088_v23  ;;  %v3094_v28 = vmul.f32 1.442695, %v3023_v24  ;;  %vm7344_vm9 = vcmp.lt.f32.partialorder %v5988_v47, 0.0  ;;  %v5995_v29 = vadd.f32 %v4864_v25, %v5939_v61 }
 0x4eb   :  { %v3021_v6 = vsel %vm7344_vm9, %v5988_v47, 0.0  ;;  %v2727_v30 = vpop.f32.mrf.mxu1  ;;  %vm3851_vm9 = vmand %vm3848_vm14, %vm2954_vm2 }
 0x4ec   :  { %5025 = vpow2.f32 %v3094_v28  ;;  %v3090_v31 = vmul.f32 1.442695, %v3021_v6  ;;  %vm7343_vm10 = vcmp.lt.f32.partialorder %v5995_v29, 0.0  ;;  %v6002_v32 = vadd.f32 %v5939_v61, %v2727_v30  ;;  %vm3849_vm2 = vmand %vm3848_vm14, %vm2952_vm3 }
 0x4ed   :  { %v5014_v33 = vpop.eup %5013  ;;  %v3026_v34 = vsel %vm7343_vm10, %v5995_v29, 0.0  ;;  %v4865_v35 = vpop.f32.mrf.mxu1  ;;  %vm3852_vm3 = vmand %vm3848_vm14, %vm2955_vm4 }
 0x4ee   :  { %v3226_v36 = vadd.f32 1.0, %v5014_v33  ;;  %5027 = vpow2.f32 %v3090_v31  ;;  %v3100_v39 = vmul.f32 1.442695, %v3026_v34  ;;  %vm7342_vm11 = vcmp.lt.f32.partialorder %v6002_v32, 0.0  ;;  %vm3850_vm4 = vmand %vm3848_vm14, %vm2953_vm5 }
 0x4ef   :  { %v5016_v37 = vpop.eup %5015  ;;  %v6008_v40 = vpop.f32.mrf.mxu1  ;;  %v3229_v43 = vmul.f32 -0.5, %v5014_v33  ;;  %v3024_v45 = vsel %vm7342_vm11, %v6002_v32, 0.0  ;;  %v6014_v46 = vadd.f32 %v4865_v35, %v5939_v61  ;;  %v3232_v50 = vand.u32 2147483647, %v5014_v33  ;;  %vm3855_vm5 = vmand %vm3848_vm14, %vm2958_vm6 }
 0x4f0   :  { %5029 = vlog2.f32 %v3226_v36  ;;  %v3208_v41 = vadd.f32 1.0, %v5016_v37  ;;  %v3211_v51 = vmul.f32 -0.5, %v5016_v37  ;;  %v3096_v58 = vmul.f32 1.442695, %v3024_v45  ;;  %vm3853_vm6 = vmand %vm3848_vm14, %vm2956_vm7 }
 0x4f1   :  { %v5018_v42 = vpop.eup %5017  ;;  %5031 = vpow2.f32 %v3100_v39  ;;  %v6018_v52 = vpop.f32.mrf.mxu1  ;;  %v3230_v56 = vadd.f32 1.0, %v3229_v43  ;;  %v3214_v59 = vand.u32 2147483647, %v5016_v37  ;;  %vm7341_vm12 = vcmp.lt.f32.partialorder %v6014_v46, 0.0  ;;  %vm3856_vm7 = vmand %vm3848_vm14, %vm2959_vm8 }
 0x4f2   :  { %5033 = vlog2.f32 %v3208_v41  ;;  %v3235_v44 = vadd.f32 1.0, %v5018_v42  ;;  %v3238_v53 = vmul.f32 -0.5, %v5018_v42  ;;  %vm6021_vm13 = vcmp.lt.f32.partialorder %v3232_v50, 0.0004427343 }
 0x4f3   :  { %v5020_v48 = vpop.eup %5019  ;;  %v3212_v1 = vadd.f32 1.0, %v3211_v51  ;;  %v3241_v2 = vand.u32 2147483647, %v5018_v42  ;;  %v6026_v3 = vpop.f32.mrf.mxu1  ;;  %v3027_v14 = vsel %vm7341_vm12, %v6014_v46, 0.0  ;;  %v3231_v15 = vmul.f32 %v5014_v33, %v3230_v56 }
 0x4f4   :  { %5035 = vlog2.f32 %v3235_v44  ;;  %v3217_v54 = vadd.f32 1.0, %v5020_v48  ;;  %v3220_v57 = vmul.f32 -0.5, %v5020_v48  ;;  %v3239_v4 = vadd.f32 1.0, %v3238_v53 }
 0x4f5   :  { %v5022_v55 = vpop.eup %5021  ;;  %v3223_v11 = vand.u32 2147483647, %v5020_v48  ;;  %vm6031_vm15 = vcmp.lt.f32.partialorder %v3214_v59, 0.0004427343  ;;  %v3213_v21 = vmul.f32 %v5016_v37, %v3212_v1  ;;  %vm6037_vm0 = vcmp.lt.f32.partialorder %v3241_v2, 0.0004427343  ;;  %v6041_v28 = vpop.f32.mrf.mxu1 }
 0x4f6   :  { %5037 = vlog2.f32 %v3217_v54  ;;  %v3262_v60 = vadd.f32 1.0, %v5022_v55  ;;  %v3265_v5 = vmul.f32 -0.5, %v5022_v55  ;;  %v3221_v10 = vadd.f32 1.0, %v3220_v57 }
 0x4f7   :  { %v5024_v62 = vpop.eup %5023  ;;  %5039 = vpow2.f32 %v3096_v58  ;;  %v3268_v23 = vand.u32 2147483647, %v5022_v55  ;;  %v3102_v25 = vmul.f32 1.442695, %v3027_v14  ;;  %v3240_v6 = vmul.f32 %v5018_v42, %v3239_v4  ;;  %v6060_v51 = vpop.f32.mrf.mxu1 }
 0x4f8   :  { %5041 = vlog2.f32 %v3262_v60  ;;  %v3244_v7 = vadd.f32 1.0, %v5024_v62  ;;  %v3247_v13 = vmul.f32 -0.5, %v5024_v62  ;;  %v3266_v30 = vadd.f32 1.0, %v3265_v5 }
 0x4f9   :  { %v5026_v9 = vpop.eup %5025  ;;  %v3222_v34 = vmul.f32 %v5020_v48, %v3221_v10  ;;  %vm6044_vm1 = vcmp.lt.f32.partialorder %v3223_v11, 0.0004427343  ;;  %v3250_v37 = vand.u32 2147483647, %v5024_v62  ;;  %v6053_v42 = vadd.f32 %v5939_v61, %v6008_v40 }
 0x4fa   :  { %5043 = vlog2.f32 %v3244_v7  ;;  %v3271_v18 = vadd.f32 1.0, %v5026_v9  ;;  %v3274_v24 = vmul.f32 -0.5, %v5026_v9  ;;  %v3248_v36 = vadd.f32 1.0, %v3247_v13  ;;  %v6084_v13 = vpop.f32.mrf.mxu1 }
 0x4fb   :  { %v6035_v19 = vpop.eup %5027  ;;  %vm6055_vm12 = vcmp.lt.f32.partialorder %v3268_v23, 0.0004427343  ;;  %v3277_v48 = vand.u32 2147483647, %v5026_v9  ;;  %v3267_v56 = vmul.f32 %v5022_v55, %v3266_v30  ;;  %vm2961_vm11 = vcmp.lt.f32.partialorder %v6053_v42, 0.0 }
 0x4fc   :  { %5045 = vlog2.f32 %v3271_v18  ;;  %v3253_v31 = vadd.f32 1.0, %v6035_v19  ;;  %v3256_v41 = vmul.f32 -0.5, %v6035_v19  ;;  %v3275_v45 = vadd.f32 1.0, %v3274_v24 }
 0x4fd   :  { %v5030_v33 = vpop.eup %5029  ;;  %5047 = vpow2.f32 %v3102_v25  ;;  %v3249_v58 = vmul.f32 %v5024_v62, %v3248_v36  ;;  %vm6065_vm10 = vcmp.lt.f32.partialorder %v3250_v37, 0.0004427343  ;;  %v3259_v60 = vand.u32 2147483647, %v6035_v19  ;;  %v2759_v37 = vpop.f32.mrf.mxu1 }
 0x4fe   :  { %v6048_v38 = vpop.eup %5031  ;;  %v3228_v39 = vmul.f32 0.6931472, %v5030_v33  ;;  %5049 = vlog2.f32 %v3253_v31  ;;  %v3257_v1 = vadd.f32 1.0, %v3256_v41  ;;  %v3025_v62 = vsel %vm2961_vm11, %v6053_v42, 0.0 }
 0x4ff   :  { %v5034_v43 = vpop.eup %5033  ;;  %v3298_v50 = vadd.f32 1.0, %v6048_v38  ;;  %v3276_v7 = vmul.f32 %v5026_v9, %v3275_v45  ;;  %v3098_v11 = vmul.f32 1.442695, %v3025_v62  ;;  %v3301_v9 = vmul.f32 -0.5, %v6048_v38 }
 0x500   :  { %v3234_v53 = vsel %vm6021_vm13, %v3231_v15, %v3228_v39  ;;  %v3210_v54 = vmul.f32 0.6931472, %v5034_v43  ;;  %vm6080_vm13 = vcmp.lt.f32.partialorder %v3277_v48, 0.0004427343  ;;  %v6097_v17 = vadd.f32 %v6018_v52, %v5939_v61 }
 0x501   :  { %v5036_v40 = vpop.eup %5035  ;;  %v3786_v57 = vadd.f32 1e-06, %v3234_v53  ;;  %5051 = vlog2.f32 %v3298_v50  ;;  %v3304_v25 = vand.u32 2147483647, %v6048_v38  ;;  %v6116_v36 = vadd.f32 %v5939_v61, %v6026_v3 }
 0x502   :  { %v3216_v55 = vsel %vm6031_vm15, %v3213_v21, %v3210_v54  ;;  %v3237_v0 = vmul.f32 0.6931472, %v5036_v40  ;;  %5053 = vpow2.f32 %v3098_v11  ;;  %v3302_v35 = vadd.f32 1.0, %v3301_v9 }
 0x503   :  { %v5038_v2 = vpop.eup %5037  ;;  %v3915_v4 = vsel %vm3851_vm9, %v3786_v57, %v5942_v63  ;;  %v3784_v5 = vadd.f32 1e-06, %v3216_v55  ;;  %vm6100_vm9 = vcmp.lt.f32.partialorder %v3259_v60, 0.0004427343  ;;  %vm2966_vm15 = vcmp.lt.f32.partialorder %v6097_v17, 0.0  ;;  %v4873_v57 = vpop.f32.mrf.mxu1 }
 0x504   :  { %v6086_v14 = vpop.eup %5039  ;;  %3979 = vst [vmem:[#allocation5 + $0x10] sm:$0xff] %v3915_v4  ;;  %v3243_v63 = vsel %vm6037_vm0, %v3240_v6, %v3237_v0  ;;  %v3219_v15 = vmul.f32 0.6931472, %v5038_v2  ;;  %vm6126_vm0 = vcmp.lt.f32.partialorder %v3304_v25, 0.0004427343  ;;  %v3030_v43 = vsel %vm2966_vm15, %v6097_v17, 0.0 }
 0x505   :  { %v5042_v18 = vpop.eup %5041  ;;  %v3913_v21 = vsel %vm3849_vm2, %v3784_v5, %v5946_v27  ;;  %v3787_v23 = vadd.f32 1e-06, %v3243_v63  ;;  %v3280_v22 = vadd.f32 1.0, %v6086_v14  ;;  %v3258_v27 = vmul.f32 %v6035_v19, %v3257_v1  ;;  %v2762_v11 = vpop.f32.mrf.mxu1 }
 0x506   :  { %3977 = vst [vmem:[#allocation5] sm:$0xff] %v3913_v21  ;;  %v3225_v52 = vsel %vm6044_vm1, %v3222_v34, %v3219_v15  ;;  %v3264_v6 = vmul.f32 0.6931472, %v5042_v18  ;;  %v3283_v48 = vmul.f32 -0.5, %v6086_v14  ;;  %v3108_v50 = vmul.f32 1.442695, %v3030_v43 }
 0x507   :  { %v5044_v30 = vpop.eup %5043  ;;  %v3916_v31 = vsel %vm3852_vm3, %v3787_v23, %v5953_v26  ;;  %v3785_v33 = vadd.f32 1e-06, %v3225_v52  ;;  %5055 = vlog2.f32 %v3280_v22  ;;  %v3303_v60 = vmul.f32 %v6048_v38, %v3302_v35  ;;  %v4876_v22 = vpop.f32.mrf.mxu1 }
 0x508   :  { %3980 = vst [vmem:[#allocation5 + $0x18] sm:$0xff] %v3916_v31  ;;  %v3270_v19 = vsel %vm6055_vm12, %v3267_v56, %v3264_v6  ;;  %v3246_v34 = vmul.f32 0.6931472, %v5044_v30  ;;  %vm2964_vm12 = vcmp.lt.f32.partialorder %v6116_v36, 0.0  ;;  %5057 = vpow2.f32 %v3108_v50 }
 0x509   :  { %v5046_v26 = vpop.eup %5045  ;;  %v3914_v39 = vsel %vm3850_vm4, %v3785_v33, %v5960_v8  ;;  %v3790_v41 = vadd.f32 1e-06, %v3270_v19  ;;  %v3286_v0 = vand.u32 2147483647, %v6086_v14  ;;  %v3284_v2 = vadd.f32 1.0, %v3283_v48  ;;  %v2775_v35 = vpop.f32.mrf.mxu1 }
 0x50a   :  { %v6133_v45 = vpop.eup %5047  ;;  %3978 = vst [vmem:[#allocation5 + $0x8] sm:$0xff] %v3914_v39  ;;  %v3252_v8 = vsel %vm6065_vm10, %v3249_v58, %v3246_v34  ;;  %v3273_v44 = vmul.f32 0.6931472, %v5046_v26  ;;  %v3028_v38 = vsel %vm2964_vm12, %v6116_v36, 0.0  ;;  %vm7370_vm8 = vcmp.lt.f32.partialorder %v5988_v47, 0.0 }
 0x50b   :  { %v5050_v53 = vpop.eup %5049  ;;  %v3919_v54 = vsel %vm3855_vm5, %v3790_v41, %v5967_v12  ;;  %v3788_v56 = vadd.f32 1e-06, %v3252_v8  ;;  %v3307_v40 = vadd.f32 1.0, %v6133_v45  ;;  %v3310_v10 = vmul.f32 -0.5, %v6133_v45  ;;  %vm3854_vm10 = vmand %vm3848_vm14, %vm7370_vm8 }
 0x50c   :  { %3983 = vst [vmem:[#allocation5 + $0x30] sm:$0xff] %v3919_v54  ;;  %v3279_v58 = vsel %vm6080_vm13, %v3276_v7, %v3273_v44  ;;  %v3255_v59 = vmul.f32 0.6931472, %v5050_v53  ;;  %v3104_v63 = vmul.f32 1.442695, %v3028_v38  ;;  %v6189_v21 = vadd.f32 %v5939_v61, %v2759_v37 }
 0x50d   :  { %v3917_v12 = vsel %vm3853_vm6, %v3788_v56, %v5974_v16  ;;  %v3791_v55 = vadd.f32 1e-06, %v3279_v58  ;;  %5059 = vlog2.f32 %v3307_v40  ;;  %v6165_v16 = vadd.f32 %v6041_v28, %v5939_v61 }
 0x50e   :  { %v5052_v1 = vpop.eup %5051  ;;  %3981 = vst [vmem:[#allocation5 + $0x20] sm:$0xff] %v3917_v12  ;;  %v3261_v62 = vsel %vm6100_vm9, %v3258_v27, %v3255_v59  ;;  %v6176_v28 = vadd.f32 %v5939_v61, %v6060_v51  ;;  %5061 = vpow2.f32 %v3104_v63  ;;  %vm7371_vm2 = vcmp.lt.f32.partialorder %v5995_v29, 0.0 }
 0x50f   :  { %v3920_v4 = vsel %vm3856_vm7, %v3791_v55, %v5981_v20  ;;  %v3789_v5 = vadd.f32 1e-06, %v3261_v62  ;;  %v3300_v7 = vmul.f32 0.6931472, %v5052_v1  ;;  %vm2967_vm1 = vcmp.lt.f32.partialorder %v6165_v16, 0.0  ;;  %vm3859_vm9 = vmand %vm3848_vm14, %vm7371_vm2 }
 0x510   :  { %3984 = vst [vmem:[#allocation5 + $0x38] sm:$0xff] %v3920_v4  ;;  %v6180_v20 = vadd.f32 %v6084_v13, %v5939_v61  ;;  %v3031_v18 = vsel %vm2967_vm1, %v6165_v16, 0.0  ;;  %vm2965_vm13 = vcmp.lt.f32.partialorder %v6176_v28, 0.0  ;;  %v6192_v13 = vpop.eup %5053  ;;  %v6204_v25 = vadd.f32 %v4873_v57, %v5939_v61 }
 0x511   :  { %v3918_v15 = vsel %vm3854_vm10, %v3789_v5, %v5988_v47  ;;  %v3306_v9 = vsel %vm6126_vm0, %v3303_v60, %v3300_v7  ;;  %v3110_v51 = vmul.f32 1.442695, %v3031_v18  ;;  %v3285_v47 = vmul.f32 %v6086_v14, %v3284_v2 }
 0x512   :  { %3982 = vst [vmem:[#allocation5 + $0x28] sm:$0xff] %v3918_v15  ;;  %v3794_v23 = vadd.f32 1e-06, %v3306_v9  ;;  %v3029_v24 = vsel %vm2965_vm13, %v6176_v28, 0.0  ;;  %vm2970_vm3 = vcmp.lt.f32.partialorder %v6180_v20, 0.0  ;;  %v3289_v30 = vadd.f32 1.0, %v6192_v13 }
 0x513   :  { %v3313_v27 = vand.u32 2147483647, %v6133_v45  ;;  %vm2968_vm4 = vcmp.lt.f32.partialorder %v6189_v21, 0.0  ;;  %5063 = vpow2.f32 %v3110_v51  ;;  %v3106_v31 = vmul.f32 1.442695, %v3029_v24 }
 0x514   :  { %v5056_v52 = vpop.eup %5055  ;;  %v3923_v6 = vsel %vm3859_vm9, %v3794_v23, %v5995_v29  ;;  %v3034_v33 = vsel %vm2970_vm3, %v6180_v20, 0.0  ;;  %vm3287_vm0 = vcmp.lt.f32.partialorder %v3286_v0, 0.0004427343  ;;  %v3311_v37 = vadd.f32 1.0, %v3310_v10 }
 0x515   :  { %3987 = vst [vmem:[#allocation5 + $0x50] sm:$0xff] %v3923_v6  ;;  %v3282_v14 = vmul.f32 0.6931472, %v5056_v52  ;;  %5065 = vlog2.f32 %v3289_v30  ;;  %v3116_v19 = vmul.f32 1.442695, %v3034_v33  ;;  %v3032_v29 = vsel %vm2968_vm4, %v6189_v21, 0.0  ;;  %v6217_v41 = vpop.eup %5057 }
 0x516   :  { %5067 = vpow2.f32 %v3106_v31  ;;  %vm2971_vm5 = vcmp.lt.f32.partialorder %v6204_v25, 0.0  ;;  %v3112_v39 = vmul.f32 1.442695, %v3032_v29  ;;  %vm7372_vm6 = vcmp.lt.f32.partialorder %v6002_v32, 0.0 }
 0x517   :  { %v3288_v34 = vsel %vm3287_vm0, %v3285_v47, %v3282_v14  ;;  %5069 = vpow2.f32 %v3116_v19  ;;  %vm3857_vm7 = vmand %vm3848_vm14, %vm7372_vm6  ;;  %vm6223_vm8 = vcmp.lt.f32.partialorder %v3313_v27, 0.0004427343  ;;  %v3035_v43 = vsel %vm2971_vm5, %v6204_v25, 0.0 }
 0x518   :  { %v3792_v26 = vadd.f32 1e-06, %v3288_v34  ;;  %v6231_v8 = vadd.f32 %v5939_v61, %v2762_v11  ;;  %v6234_v44 = vadd.f32 %v4876_v22, %v5939_v61  ;;  %v3312_v53 = vmul.f32 %v6133_v45, %v3311_v37  ;;  %v4877_v45 = vpop.f32.mrf.mxu1 }
 0x519   :  { %v3334_v54 = vadd.f32 1.0, %v6217_v41  ;;  %v6240_v56 = vadd.f32 %v5939_v61, %v2775_v35  ;;  %5071 = vpow2.f32 %v3112_v39  ;;  %v3118_v57 = vmul.f32 1.442695, %v3035_v43 }
 0x51a   :  { %v5060_v48 = vpop.eup %5059  ;;  %v3921_v50 = vsel %vm3857_vm7, %v3792_v26, %v6002_v32  ;;  %vm2969_vm10 = vcmp.lt.f32.partialorder %v6231_v8, 0.0  ;;  %v3292_v58 = vmul.f32 -0.5, %v6192_v13  ;;  %v3295_v59 = vand.u32 2147483647, %v6192_v13  ;;  %v2778_v9 = vpop.f32.mrf.mxu1 }
 0x51b   :  { %3985 = vst [vmem:[#allocation5 + $0x40] sm:$0xff] %v3921_v50  ;;  %v3309_v40 = vmul.f32 0.6931472, %v5060_v48  ;;  %5073 = vlog2.f32 %v3334_v54  ;;  %v3033_v32 = vsel %vm2969_vm10, %v6231_v8, 0.0  ;;  %vm2974_vm2 = vcmp.lt.f32.partialorder %v6234_v44, 0.0  ;;  %v5062_v62 = vpop.eup %5061 }
 0x51c   :  { %5075 = vpow2.f32 %v3118_v57  ;;  %v3114_v12 = vmul.f32 1.442695, %v3033_v32  ;;  %v3337_v0 = vmul.f32 -0.5, %v6217_v41  ;;  %v3038_v1 = vsel %vm2974_vm2, %v6234_v44, 0.0  ;;  %v6280_v37 = vpop.f32.mrf.mxu1 }
 0x51d   :  { %v3315_v60 = vsel %vm6223_vm8, %v3312_v53, %v3309_v40  ;;  %vm7346_vm9 = vcmp.lt.f32.partialorder %v6240_v56, 0.0  ;;  %vm7375_vm0 = vcmp.lt.f32.partialorder %v6014_v46, 0.0  ;;  %v3124_v2 = vmul.f32 1.442695, %v3038_v1 }
 0x51e   :  { %v3795_v55 = vadd.f32 1e-06, %v3315_v60  ;;  %vm3860_vm6 = vmand %vm3848_vm14, %vm7375_vm0  ;;  %5077 = vpow2.f32 %v3114_v12  ;;  %v3036_v38 = vsel %vm7346_vm9, %v6240_v56, 0.0  ;;  %v6264_v4 = vadd.f32 %v4877_v45, %v5939_v61 }
 0x51f   :  { %v3293_v7 = vadd.f32 1.0, %v3292_v58  ;;  %v3340_v10 = vand.u32 2147483647, %v6217_v41  ;;  %v3316_v11 = vadd.f32 1.0, %v5062_v62  ;;  %v3319_v63 = vmul.f32 -0.5, %v5062_v62 }
 0x520   :  { %v3924_v5 = vsel %vm3860_vm6, %v3795_v55, %v6014_v46  ;;  %5079 = vpow2.f32 %v3124_v2  ;;  %v3120_v15 = vmul.f32 1.442695, %v3036_v38  ;;  %v5064_v18 = vpop.eup %5063  ;;  %vm6268_vm7 = vcmp.lt.f32.partialorder %v3295_v59, 0.0004427343  ;;  %vm3858_vm6 = vmand %vm3848_vm14, %vm2961_vm11  ;;  %v6304_v59 = vpop.f32.mrf.mxu1 }
 0x521   :  { %3988 = vst [vmem:[#allocation5 + $0x58] sm:$0xff] %v3924_v5  ;;  %5081 = vlog2.f32 %v3316_v11  ;;  %v3338_v47 = vadd.f32 1.0, %v3337_v0  ;;  %v3343_v24 = vadd.f32 1.0, %v5064_v18  ;;  %vm7345_vm8 = vcmp.lt.f32.partialorder %v6264_v4, 0.0 }
 0x522   :  { %v5066_v51 = vpop.eup %5065  ;;  %5083 = vpow2.f32 %v3120_v15  ;;  %v3294_v52 = vmul.f32 %v6192_v13, %v3293_v7  ;;  %vm6274_vm0 = vcmp.lt.f32.partialorder %v3340_v10, 0.0004427343  ;;  %v3346_v27 = vmul.f32 -0.5, %v5064_v18  ;;  %v4881_v15 = vpop.f32.mrf.mxu1 }
 0x523   :  { %v5068_v46 = vpop.eup %5067  ;;  %v3291_v22 = vmul.f32 0.6931472, %v5066_v51  ;;  %v3320_v14 = vadd.f32 1.0, %v3319_v63  ;;  %v3322_v31 = vand.u32 2147483647, %v5062_v62  ;;  %5085 = vlog2.f32 %v3343_v24 }
 0x524   :  { %v6278_v30 = vpop.eup %5069  ;;  %v3325_v33 = vadd.f32 1.0, %v5068_v46  ;;  %v3328_v34 = vmul.f32 -0.5, %v5068_v46  ;;  %v3039_v13 = vsel %vm7345_vm8, %v6264_v4, 0.0  ;;  %v3339_v26 = vmul.f32 %v6217_v41, %v3338_v47  ;;  %vm3863_vm8 = vmand %vm3848_vm14, %vm2966_vm15 }
 0x525   :  { %v3297_v19 = vsel %vm6268_vm7, %v3294_v52, %v3291_v22  ;;  %v3370_v29 = vadd.f32 1.0, %v6278_v30  ;;  %v6290_v39 = vadd.f32 %v5939_v61, %v2778_v9  ;;  %v3347_v43 = vadd.f32 1.0, %v3346_v27 }
 0x526   :  { %v3793_v35 = vadd.f32 1e-06, %v3297_v19  ;;  %5087 = vlog2.f32 %v3325_v33  ;;  %v5072_v3 = vpop.eup %5071  ;;  %v3349_v48 = vand.u32 2147483647, %v5064_v18  ;;  %v3373_v50 = vmul.f32 -0.5, %v6278_v30 }
 0x527   :  { %5089 = vlog2.f32 %v3370_v29  ;;  %vm6298_vm7 = vcmp.lt.f32.partialorder %v3322_v31, 0.0004427343  ;;  %v3352_v40 = vadd.f32 1.0, %v5072_v3  ;;  %v3355_v57 = vmul.f32 -0.5, %v5072_v3 }
 0x528   :  { %v5074_v53 = vpop.eup %5073  ;;  %v3922_v54 = vsel %vm3858_vm6, %v3793_v35, %v6053_v42  ;;  %v6302_v58 = vmul.f32 1.442695, %v3039_v13  ;;  %v3321_v60 = vmul.f32 %v5062_v62, %v3320_v14  ;;  %v3329_v12 = vadd.f32 1.0, %v3328_v34  ;;  %v6337_v35 = vpop.f32.mrf.mxu1 }
 0x529   :  { %v5076_v32 = vpop.eup %5075  ;;  %3986 = vst [vmem:[#allocation5 + $0x48] sm:$0xff] %v3922_v54  ;;  %v3336_v45 = vmul.f32 0.6931472, %v5074_v53  ;;  %v3331_v55 = vand.u32 2147483647, %v5068_v46  ;;  %5091 = vlog2.f32 %v3352_v40  ;;  %vm2973_vm11 = vcmp.lt.f32.partialorder %v6290_v39, 0.0 }
 0x52a   :  { %v3376_v0 = vand.u32 2147483647, %v6278_v30  ;;  %v3379_v42 = vadd.f32 1.0, %v5076_v32  ;;  %v3348_v38 = vmul.f32 %v5064_v18, %v3347_v43  ;;  %vm6310_vm6 = vcmp.lt.f32.partialorder %v3349_v48, 0.0004427343 }
 0x52b   :  { %v5078_v1 = vpop.eup %5077  ;;  %v3342_v2 = vsel %vm6274_vm0, %v3339_v26, %v3336_v45  ;;  %v3374_v7 = vadd.f32 1.0, %v3373_v50  ;;  %v3382_v10 = vmul.f32 -0.5, %v5076_v32  ;;  %v3356_v11 = vadd.f32 1.0, %v3355_v57 }
 0x52c   :  { %v3798_v62 = vadd.f32 1e-06, %v3342_v2  ;;  %5093 = vlog2.f32 %v3379_v42  ;;  %v3361_v63 = vadd.f32 1.0, %v5078_v1  ;;  %v3330_v23 = vmul.f32 %v5068_v46, %v3329_v12  ;;  %v4884_v2 = vpop.f32.mrf.mxu1 }
 0x52d   :  { %v6314_v9 = vpop.eup %5079  ;;  %vm6320_vm0 = vcmp.lt.f32.partialorder %v3331_v55, 0.0004427343  ;;  %v3358_v51 = vand.u32 2147483647, %v5072_v3  ;;  %v3383_v47 = vadd.f32 1.0, %v3382_v10  ;;  %v3364_v24 = vmul.f32 -0.5, %v5078_v1 }
 0x52e   :  { %v5082_v22 = vpop.eup %5081  ;;  %v3927_v52 = vsel %vm3863_vm8, %v3798_v62, %v6097_v17  ;;  %vm6325_vm9 = vcmp.lt.f32.partialorder %v3376_v0, 0.0004427343  ;;  %5095 = vlog2.f32 %v3361_v63  ;;  %v3406_v27 = vadd.f32 1.0, %v6314_v9  ;;  %vm3861_vm8 = vmand %vm3848_vm14, %vm2964_vm12 }
 0x52f   :  { %v3409_v14 = vmul.f32 -0.5, %v6314_v9  ;;  %v6331_v46 = vpop.eup %5083  ;;  %3991 = vst [vmem:[#allocation5 + $0x70] sm:$0xff] %v3927_v52  ;;  %v3318_v31 = vmul.f32 0.6931472, %v5082_v22  ;;  %v3375_v33 = vmul.f32 %v6278_v30, %v3374_v7  ;;  %v3385_v19 = vand.u32 2147483647, %v5076_v32 }
 0x530   :  { %v3365_v34 = vadd.f32 1.0, %v3364_v24  ;;  %v6334_v29 = vmul.f32 %v5072_v3, %v3356_v11  ;;  %v3367_v17 = vand.u32 2147483647, %v5078_v1  ;;  %5097 = vlog2.f32 %v3406_v27  ;;  %v5086_v26 = vpop.eup %5085 }
 0x531   :  { %v3388_v13 = vadd.f32 1.0, %v6331_v46  ;;  %v3324_v43 = vsel %vm6298_vm7, %v3321_v60, %v3318_v31  ;;  %vm6341_vm15 = vcmp.lt.f32.partialorder %v3358_v51, 0.0004427343  ;;  %v6345_v50 = vmul.f32 %v5076_v32, %v3383_v47 }
 0x532   :  { %v3410_v30 = vadd.f32 1.0, %v3409_v14  ;;  %v3391_v3 = vmul.f32 -0.5, %v6331_v46  ;;  %v3796_v53 = vadd.f32 1e-06, %v3324_v43  ;;  %v3345_v54 = vmul.f32 0.6931472, %v5086_v26 }
 0x533   :  { %v6348_v40 = vmul.f32 %v5078_v1, %v3365_v34  ;;  %v3412_v57 = vand.u32 2147483647, %v6314_v9  ;;  %v5088_v45 = vpop.eup %5087  ;;  %vm6355_vm7 = vcmp.lt.f32.partialorder %v3385_v19, 0.0004427343  ;;  %5099 = vlog2.f32 %v3388_v13 }
 0x534   :  { %v6359_v32 = vadd.f32 1.0, %v3391_v3  ;;  %v3394_v60 = vand.u32 2147483647, %v6331_v46  ;;  %v3037_v12 = vsel %vm2973_vm11, %v6290_v39, 0.0  ;;  %v5090_v55 = vpop.eup %5089  ;;  %v3925_v0 = vsel %vm3861_vm8, %v3796_v53, %v6116_v36 }
 0x535   :  { %v3351_v42 = vsel %vm6310_vm6, %v3348_v38, %v3345_v54  ;;  %v3327_v1 = vmul.f32 0.6931472, %v5088_v45  ;;  %5101 = vpow2.f32 %v6302_v58  ;;  %3989 = vst [vmem:[#allocation5 + $0x60] sm:$0xff] %v3925_v0  ;;  %v3372_v10 = vmul.f32 0.6931472, %v5090_v55  ;;  %vm3864_vm6 = vmand %vm3848_vm14, %vm2967_vm1 }
 0x536   :  { %v3799_v7 = vadd.f32 1e-06, %v3351_v42  ;;  %vm6369_vm12 = vcmp.lt.f32.partialorder %v3367_v17, 0.0004427343  ;;  %v6374_v11 = vmul.f32 %v6314_v9, %v3410_v30  ;;  %v3122_v63 = vmul.f32 1.442695, %v3037_v12  ;;  %v5092_v9 = vpop.eup %5091 }
 0x537   :  { %v3333_v36 = vsel %vm6320_vm0, %v3330_v23, %v3327_v1  ;;  %v6384_v58 = vadd.f32 %v6280_v37, %v5939_v61  ;;  %v6388_v38 = vadd.f32 %v5939_v61, %v6304_v59  ;;  %v6391_v5 = vadd.f32 %v4881_v15, %v5939_v61  ;;  %vm3862_vm0 = vmand %vm3848_vm14, %vm2965_vm13 }
 0x538   :  { %v3928_v51 = vsel %vm3864_vm6, %v3799_v7, %v6165_v16  ;;  %v3797_v47 = vadd.f32 1e-06, %v3333_v36  ;;  %v3378_v24 = vsel %vm6325_vm9, %v3375_v33, %v3372_v10  ;;  %vm6396_vm1 = vcmp.lt.f32.partialorder %v3412_v57, 0.0004427343  ;;  %v2807_v16 = vpop.f32.mrf.mxu1  ;;  %vm3867_vm9 = vmand %vm3848_vm14, %vm2970_vm3 }
 0x539   :  { %5103 = vpow2.f32 %v3122_v63  ;;  %3992 = vst [vmem:[#allocation5 + $0x78] sm:$0xff] %v3928_v51  ;;  %v3802_v37 = vadd.f32 1e-06, %v3378_v24  ;;  %v3354_v59 = vmul.f32 0.6931472, %v5092_v9  ;;  %vm2978_vm8 = vcmp.lt.f32.partialorder %v6384_v58, 0.0  ;;  %v5094_v15 = vpop.eup %5093  ;;  %vm3865_vm3 = vmand %vm3848_vm14, %vm2968_vm4 }
 0x53a   :  { %vm2976_vm6 = vcmp.lt.f32.partialorder %v6388_v38, 0.0  ;;  %v3926_v18 = vsel %vm3862_vm0, %v3797_v47, %v6176_v28  ;;  %v3042_v22 = vsel %vm2978_vm8, %v6384_v58, 0.0  ;;  %vm2979_vm13 = vcmp.lt.f32.partialorder %v6391_v5, 0.0  ;;  %v4885_v26 = vpop.f32.mrf.mxu1  ;;  %vm3868_vm4 = vmand %vm3848_vm14, %vm2971_vm5 }
 0x53b   :  { %v3040_v52 = vsel %vm2976_vm6, %v6388_v38, 0.0  ;;  %3990 = vst [vmem:[#allocation5 + $0x68] sm:$0xff] %v3926_v18  ;;  %v3931_v6 = vsel %vm3867_vm9, %v3802_v37, %v6180_v20  ;;  %v3360_v28 = vsel %vm6341_vm15, %v6334_v29, %v3354_v59  ;;  %v3381_v27 = vmul.f32 0.6931472, %v5094_v15  ;;  %v5096_v31 = vpop.eup %5095  ;;  %vm3866_vm5 = vmand %vm3848_vm14, %vm2969_vm10 }
 0x53c   :  { %v3132_v14 = vmul.f32 1.442695, %v3042_v22  ;;  %3995 = vst [vmem:[#allocation5 + $0x90] sm:$0xff] %v3931_v6  ;;  %v3800_v33 = vadd.f32 1e-06, %v3360_v28  ;;  %v3043_v34 = vsel %vm2979_vm13, %v6391_v5, 0.0  ;;  %v6427_v17 = vadd.f32 %v5939_v61, %v6337_v35  ;;  %v2810_v12 = vpop.f32.mrf.mxu1  ;;  %vm3871_vm10 = vmand %vm3848_vm14, %vm2974_vm2 }
 0x53d   :  { %v3128_v19 = vmul.f32 1.442695, %v3040_v52  ;;  %v3387_v20 = vsel %vm6355_vm7, %v6345_v50, %v3381_v27  ;;  %v3363_v29 = vmul.f32 0.6931472, %v5096_v31  ;;  %v3134_v13 = vmul.f32 1.442695, %v3043_v34  ;;  %v5098_v43 = vpop.eup %5097 }
 0x53e   :  { %5105 = vpow2.f32 %v3132_v14  ;;  %v3929_v48 = vsel %vm3865_vm3, %v3800_v33, %v6189_v21  ;;  %v3803_v30 = vadd.f32 1e-06, %v3387_v20  ;;  %vm2977_vm15 = vcmp.lt.f32.partialorder %v6427_v17, 0.0 }
 0x53f   :  { %5107 = vpow2.f32 %v3128_v19  ;;  %3993 = vst [vmem:[#allocation5 + $0x80] sm:$0xff] %v3929_v48  ;;  %v3369_v35 = vsel %vm6369_vm12, %v6348_v40, %v3363_v29  ;;  %v3408_v50 = vmul.f32 0.6931472, %v5098_v43  ;;  %v3041_v21 = vsel %vm2977_vm15, %v6427_v17, 0.0 }
 0x540   :  { %5109 = vpow2.f32 %v3134_v13  ;;  %v3932_v3 = vsel %vm3868_vm4, %v3803_v30, %v6204_v25  ;;  %v3801_v53 = vadd.f32 1e-06, %v3369_v35  ;;  %v3130_v54 = vmul.f32 1.442695, %v3041_v21  ;;  %v5100_v45 = vpop.eup %5099 }
 0x541   :  { %v6450_v57 = vadd.f32 %v4884_v2, %v5939_v61  ;;  %3996 = vst [vmem:[#allocation5 + $0x98] sm:$0xff] %v3932_v3  ;;  %v3414_v40 = vsel %vm6396_vm1, %v6374_v11, %v3408_v50  ;;  %v3393_v41 = vmul.f32 %v6331_v46, %v6359_v32  ;;  %v6462_v25 = vadd.f32 %v5939_v61, %v2807_v16 }
 0x542   :  { %v5102_v55 = vpop.eup %5101  ;;  %v3930_v0 = vsel %vm3866_vm5, %v3801_v53, %v6231_v8  ;;  %v3806_v42 = vadd.f32 1e-06, %v3414_v40  ;;  %v3390_v1 = vmul.f32 0.6931472, %v5100_v45  ;;  %5111 = vpow2.f32 %v3130_v54 }
 0x543   :  { %3994 = vst [vmem:[#allocation5 + $0x88] sm:$0xff] %v3930_v0  ;;  %vm3395_vm7 = vcmp.lt.f32.partialorder %v3394_v60, 0.0004427343  ;;  %v3415_v32 = vadd.f32 1.0, %v5102_v55  ;;  %vm2982_vm12 = vcmp.lt.f32.partialorder %v6450_v57, 0.0  ;;  %v6473_v2 = vadd.f32 %v4885_v26, %v5939_v61 }
 0x544   :  { %v3935_v8 = vsel %vm3871_vm10, %v3806_v42, %v6234_v44  ;;  %v3396_v7 = vsel %vm3395_vm7, %v3393_v41, %v3390_v1  ;;  %v3046_v10 = vsel %vm2982_vm12, %v6450_v57, 0.0  ;;  %vm2980_vm1 = vcmp.lt.f32.partialorder %v6462_v25, 0.0  ;;  %v6485_v60 = vld [vmem:[%s7339_s6] ss:$0 sm:$0xff]  ;;  %v4888_v44 = vpop.f32.mrf.mxu1 }
 0x545   :  { %3999 = vst [vmem:[#allocation5 + $0xb0] sm:$0xff] %v3935_v8  ;;  %v3804_v46 = vadd.f32 1e-06, %v3396_v7  ;;  %5113 = vlog2.f32 %v3415_v32  ;;  %v6488_v61 = vadd.f32 %v6485_v60, %v2810_v12  ;;  %vm7396_vm2 = vcmp.lt.f32.partialorder %v6240_v56, 0.0 }
 0x546   :  { %v6480_v62 = vpop.eup %5103  ;;  %vm3869_vm0 = vmand %vm3848_vm14, %vm7396_vm2  ;;  %v3418_v11 = vmul.f32 -0.5, %v5102_v55  ;;  %v3140_v36 = vmul.f32 1.442695, %v3046_v10  ;;  %v3044_v51 = vsel %vm2980_vm1, %v6462_v25, 0.0  ;;  %vm7349_vm9 = vcmp.lt.f32.partialorder %v6473_v2, 0.0  ;;  %v2823_v37 = vpop.f32.mrf.mxu1 }
 0x547   :  { %v3397_v63 = vadd.f32 1.0, %v6480_v62  ;;  %v3933_v9 = vsel %vm3869_vm0, %v3804_v46, %v6240_v56  ;;  %v3136_v47 = vmul.f32 1.442695, %v3044_v51  ;;  %v3421_v24 = vand.u32 2147483647, %v5102_v55 }
 0x548   :  { %3997 = vst [vmem:[#allocation5 + $0xa0] sm:$0xff] %v3933_v9  ;;  %v3047_v23 = vsel %vm7349_vm9, %v6473_v2, 0.0  ;;  %vm7348_vm3 = vcmp.lt.f32.partialorder %v6488_v61, 0.0  ;;  %v3419_v56 = vadd.f32 1.0, %v3418_v11  ;;  %v3400_v22 = vmul.f32 -0.5, %v6480_v62  ;;  %v4889_v34 = vpop.f32.mrf.mxu1 }
 0x549   :  { %5115 = vlog2.f32 %v3397_v63  ;;  %v3142_v16 = vmul.f32 1.442695, %v3047_v23  ;;  %v3045_v15 = vsel %vm7348_vm3, %v6488_v61, 0.0  ;;  %v6509_v6 = vadd.f32 %v6485_v60, %v4888_v44 }
 0x54a   :  { %5117 = vpow2.f32 %v3140_v36  ;;  %v3403_v27 = vand.u32 2147483647, %v6480_v62  ;;  %v3138_v19 = vmul.f32 1.442695, %v3045_v15  ;;  %v3420_v20 = vmul.f32 %v5102_v55, %v3419_v56  ;;  %v2826_v45 = vpop.f32.mrf.mxu1 }
 0x54b   :  { %v5106_v59 = vpop.eup %5105  ;;  %5119 = vpow2.f32 %v3136_v47  ;;  %vm6512_vm4 = vcmp.lt.f32.partialorder %v3421_v24, 0.0004427343  ;;  %v3401_v43 = vadd.f32 1.0, %v3400_v22  ;;  %vm7347_vm5 = vcmp.lt.f32.partialorder %v6509_v6, 0.0 }
 0x54c   :  { %v5108_v18 = vpop.eup %5107  ;;  %v3442_v52 = vadd.f32 1.0, %v5106_v59  ;;  %5121 = vpow2.f32 %v3142_v16  ;;  %v3445_v31 = vmul.f32 -0.5, %v5106_v59  ;;  %vm6517_vm10 = vcmp.lt.f32.partialorder %v3403_v27, 0.0004427343 }
 0x54d   :  { %v5110_v28 = vpop.eup %5109  ;;  %v3424_v14 = vadd.f32 1.0, %v5108_v18  ;;  %v3427_v13 = vmul.f32 -0.5, %v5108_v18  ;;  %v3448_v35 = vand.u32 2147483647, %v5106_v59  ;;  %v3430_v53 = vand.u32 2147483647, %v5108_v18 }
 0x54e   :  { %5123 = vlog2.f32 %v3442_v52  ;;  %v3451_v33 = vadd.f32 1.0, %v5110_v28  ;;  %v3454_v48 = vmul.f32 -0.5, %v5110_v28  ;;  %v3446_v3 = vadd.f32 1.0, %v3445_v31 }
 0x54f   :  { %5125 = vlog2.f32 %v3424_v14  ;;  %v5112_v26 = vpop.eup %5111  ;;  %v3050_v54 = vsel %vm7347_vm5, %v6509_v6, 0.0  ;;  %v3428_v41 = vadd.f32 1.0, %v3427_v13  ;;  %v3457_v12 = vand.u32 2147483647, %v5110_v28 }
 0x550   :  { %5127 = vlog2.f32 %v3451_v33  ;;  %v3433_v50 = vadd.f32 1.0, %v5112_v26  ;;  %v3436_v21 = vmul.f32 -0.5, %v5112_v26  ;;  %v3148_v55 = vmul.f32 1.442695, %v3050_v54 }
 0x551   :  { %5129 = vpow2.f32 %v3138_v19  ;;  %v3455_v42 = vadd.f32 1.0, %v3454_v48  ;;  %v6525_v32 = vadd.f32 %v6485_v60, %v2823_v37  ;;  %v3402_v8 = vmul.f32 %v6480_v62, %v3401_v43  ;;  %v4892_v62 = vpop.f32.mrf.mxu1 }
 0x552   :  { %v5114_v40 = vpop.eup %5113  ;;  %5131 = vlog2.f32 %v3433_v50  ;;  %v3437_v1 = vadd.f32 1.0, %v3436_v21  ;;  %vm6528_vm7 = vcmp.lt.f32.partialorder %v3448_v35, 0.0004427343  ;;  %v6533_v10 = vadd.f32 %v6485_v60, %v4889_v34 }
 0x553   :  { %v3417_v0 = vmul.f32 0.6931472, %v5114_v40  ;;  %5133 = vpow2.f32 %v3148_v55  ;;  %v3447_v11 = vmul.f32 %v5106_v59, %v3446_v3  ;;  %vm6537_vm2 = vcmp.lt.f32.partialorder %v3430_v53, 0.0004427343  ;;  %v2839_v33 = vpop.f32.mrf.mxu1 }
 0x554   :  { %v3439_v36 = vand.u32 2147483647, %v5112_v26  ;;  %vm2984_vm0 = vcmp.lt.f32.partialorder %v6525_v32, 0.0  ;;  %v3429_v24 = vmul.f32 %v5108_v18, %v3428_v41  ;;  %vm6544_vm5 = vcmp.lt.f32.partialorder %v3457_v12, 0.0004427343 }
 0x555   :  { %v3423_v44 = vsel %vm6512_vm4, %v3420_v20, %v3417_v0  ;;  %vm7407_vm4 = vcmp.lt.f32.partialorder %v6264_v4, 0.0  ;;  %v3456_v59 = vmul.f32 %v5110_v28, %v3455_v42  ;;  %v6554_v56 = vmul.f32 %v5112_v26, %v3437_v1  ;;  %v4893_v40 = vpop.f32.mrf.mxu1 }
 0x556   :  { %v5116_v46 = vpop.eup %5115  ;;  %v3807_v51 = vadd.f32 1e-06, %v3423_v44  ;;  %vm3872_vm3 = vmand %vm3848_vm14, %vm7407_vm4  ;;  %v3048_v15 = vsel %vm2984_vm0, %v6525_v32, 0.0  ;;  %vm2987_vm9 = vcmp.lt.f32.partialorder %v6533_v10, 0.0  ;;  %vm6567_vm4 = vcmp.lt.f32.partialorder %v3439_v36, 0.0004427343 }
 0x557   :  { %v6542_v9 = vpop.eup %5117  ;;  %v3399_v47 = vmul.f32 0.6931472, %v5116_v46  ;;  %v3144_v20 = vmul.f32 1.442695, %v3048_v15  ;;  %v6581_v29 = vadd.f32 %v6485_v60, %v4892_v62  ;;  %v3051_v30 = vsel %vm2987_vm9, %v6533_v10, 0.0 }
 0x558   :  { %v6548_v37 = vpop.eup %5119  ;;  %v3478_v16 = vadd.f32 1.0, %v6542_v9  ;;  %v3936_v18 = vsel %vm3872_vm3, %v3807_v51, %v6264_v4  ;;  %v3481_v31 = vmul.f32 -0.5, %v6542_v9  ;;  %v6573_v4 = vadd.f32 %v6485_v60, %v2826_v45  ;;  %vm3870_vm3 = vmand %vm3848_vm14, %vm2973_vm11 }
 0x559   :  { %v3405_v22 = vsel %vm6517_vm10, %v3402_v8, %v3399_v47  ;;  %v3460_v52 = vadd.f32 1.0, %v6548_v37  ;;  %v6565_v27 = vpop.eup %5121  ;;  %4000 = vst [vmem:[#allocation5 + $0xb8] sm:$0xff] %v3936_v18  ;;  %v3463_v48 = vmul.f32 -0.5, %v6548_v37  ;;  %v3484_v21 = vand.u32 2147483647, %v6542_v9  ;;  %vm3875_vm11 = vmand %vm3848_vm14, %vm2978_vm8 }
 0x55a   :  { %v3805_v28 = vadd.f32 1e-06, %v3405_v22  ;;  %5135 = vlog2.f32 %v3478_v16  ;;  %v3487_v34 = vadd.f32 1.0, %v6565_v27  ;;  %v6590_v3 = vadd.f32 %v6485_v60, %v2839_v33  ;;  %vm3873_vm10 = vmand %vm3848_vm14, %vm2976_vm6 }
 0x55b   :  { %v5124_v19 = vpop.eup %5123  ;;  %5137 = vlog2.f32 %v3460_v52  ;;  %v3482_v54 = vadd.f32 1.0, %v3481_v31  ;;  %v3490_v45 = vmul.f32 -0.5, %v6565_v27  ;;  %v3150_v0 = vmul.f32 1.442695, %v3051_v30  ;;  %vm3876_vm8 = vmand %vm3848_vm14, %vm2979_vm13 }
 0x55c   :  { %v5126_v13 = vpop.eup %5125  ;;  %v3934_v26 = vsel %vm3870_vm3, %v3805_v28, %v6290_v39  ;;  %v3444_v43 = vmul.f32 0.6931472, %v5124_v19  ;;  %5139 = vlog2.f32 %v3487_v34  ;;  %v3464_v7 = vadd.f32 1.0, %v3463_v48  ;;  %vm3874_vm13 = vmand %vm3848_vm14, %vm2977_vm15 }
 0x55d   :  { %v5128_v35 = vpop.eup %5127  ;;  %3998 = vst [vmem:[#allocation5 + $0xa8] sm:$0xff] %v3934_v26  ;;  %v3426_v50 = vmul.f32 0.6931472, %v5126_v13  ;;  %5141 = vpow2.f32 %v3144_v20  ;;  %v3466_v46 = vand.u32 2147483647, %v6548_v37  ;;  %v3483_v15 = vmul.f32 %v6542_v9, %v3482_v54  ;;  %vm3879_vm3 = vmand %vm3848_vm14, %vm2982_vm12 }
 0x55e   :  { %v3450_v53 = vsel %vm6528_vm7, %v3447_v11, %v3444_v43  ;;  %v3453_v39 = vmul.f32 0.6931472, %v5128_v35  ;;  %v6595_v41 = vpop.eup %5129  ;;  %v3493_v47 = vand.u32 2147483647, %v6565_v27  ;;  %5143 = vpow2.f32 %v3150_v0 }
 0x55f   :  { %v3810_v12 = vadd.f32 1e-06, %v3450_v53  ;;  %v3432_v55 = vsel %vm6537_vm2, %v3429_v24, %v3426_v50  ;;  %v5132_v42 = vpop.eup %5131  ;;  %v3469_v36 = vadd.f32 1.0, %v6595_v41  ;;  %v2842_v24 = vpop.f32.mrf.mxu1  ;;  %vm6626_vm6 = vcmp.lt.f32.partialorder %v3484_v21, 0.0004427343 }
 0x560   :  { %v3808_v1 = vadd.f32 1e-06, %v3432_v55  ;;  %v3459_v8 = vsel %vm6544_vm5, %v3456_v59, %v3453_v39  ;;  %v3435_v63 = vmul.f32 0.6931472, %v5132_v42  ;;  %v6612_v62 = vpop.eup %5133  ;;  %v3465_v22 = vmul.f32 %v6548_v37, %v3464_v7 }
 0x561   :  { %v3939_v44 = vsel %vm3875_vm11, %v3810_v12, %v6384_v58  ;;  %v3811_v11 = vadd.f32 1e-06, %v3459_v8  ;;  %v3491_v58 = vadd.f32 1.0, %v3490_v45  ;;  %5145 = vlog2.f32 %v3469_v36  ;;  %v4896_v28 = vpop.f32.mrf.mxu1 }
 0x562   :  { %4003 = vst [vmem:[#allocation5 + $0xd0] sm:$0xff] %v3939_v44  ;;  %v3937_v51 = vsel %vm3873_vm10, %v3808_v1, %v6388_v38  ;;  %v3441_v59 = vsel %vm6567_vm4, %v6554_v56, %v3435_v63  ;;  %v3514_v38 = vadd.f32 1.0, %v6612_v62  ;;  %vm6635_vm5 = vcmp.lt.f32.partialorder %v3466_v46, 0.0004427343 }
 0x563   :  { %4001 = vst [vmem:[#allocation5 + $0xc0] sm:$0xff] %v3937_v51  ;;  %v3940_v23 = vsel %vm3876_vm8, %v3811_v11, %v6391_v5  ;;  %v3809_v16 = vadd.f32 1e-06, %v3441_v59  ;;  %vm2985_vm7 = vcmp.lt.f32.partialorder %v6573_v4, 0.0  ;;  %vm2990_vm2 = vcmp.lt.f32.partialorder %v6581_v29, 0.0  ;;  %v2855_v53 = vpop.f32.mrf.mxu1  ;;  %vm3877_vm8 = vmand %vm3848_vm14, %vm2980_vm1 }
 0x564   :  { %4004 = vst [vmem:[#allocation5 + $0xd8] sm:$0xff] %v3940_v23  ;;  %5147 = vlog2.f32 %v3514_v38  ;;  %v3492_v56 = vmul.f32 %v6565_v27, %v3491_v58  ;;  %vm6643_vm4 = vcmp.lt.f32.partialorder %v3493_v47, 0.0004427343  ;;  %v3049_v52 = vsel %vm2985_vm7, %v6573_v4, 0.0 }
 0x565   :  { %v3938_v9 = vsel %vm3874_vm13, %v3809_v16, %v6427_v17  ;;  %v3472_v31 = vmul.f32 -0.5, %v6595_v41  ;;  %v3146_v33 = vmul.f32 1.442695, %v3049_v52  ;;  %v3054_v17 = vsel %vm2990_vm2, %v6581_v29, 0.0  ;;  %v4897_v11 = vpop.f32.mrf.mxu1 }
 0x566   :  { %4002 = vst [vmem:[#allocation5 + $0xc8] sm:$0xff] %v3938_v9  ;;  %vm2988_vm15 = vcmp.lt.f32.partialorder %v6590_v3, 0.0  ;;  %v3517_v34 = vmul.f32 -0.5, %v6612_v62  ;;  %v3156_v20 = vmul.f32 1.442695, %v3054_v17  ;;  %v6660_v48 = vadd.f32 %v6485_v60, %v4893_v40 }
 0x567   :  { %v5136_v14 = vpop.eup %5135  ;;  %v3052_v13 = vsel %vm2988_vm15, %v6590_v3, 0.0  ;;  %5149 = vpow2.f32 %v3146_v33  ;;  %v6665_v50 = vadd.f32 %v6485_v60, %v2842_v24  ;;  %v6668_v21 = vadd.f32 %v6485_v60, %v4896_v28  ;;  %v2858_v5 = vpop.f32.mrf.mxu1 }
 0x568   :  { %v5138_v27 = vpop.eup %5137  ;;  %v3480_v19 = vmul.f32 0.6931472, %v5136_v14  ;;  %v3152_v43 = vmul.f32 1.442695, %v3052_v13  ;;  %5151 = vpow2.f32 %v3156_v20  ;;  %v3475_v55 = vand.u32 2147483647, %v6595_v41 }
 0x569   :  { %v3462_v26 = vmul.f32 0.6931472, %v5138_v27  ;;  %v5140_v30 = vpop.eup %5139  ;;  %vm2991_vm11 = vcmp.lt.f32.partialorder %v6660_v48, 0.0  ;;  %vm2989_vm10 = vcmp.lt.f32.partialorder %v6665_v50, 0.0  ;;  %v3473_v1 = vadd.f32 1.0, %v3472_v31 }
 0x56a   :  { %v3486_v35 = vsel %vm6626_vm6, %v3483_v15, %v3480_v19  ;;  %v3489_v45 = vmul.f32 0.6931472, %v5140_v30  ;;  %5153 = vpow2.f32 %v3152_v43  ;;  %v6672_v40 = vpop.eup %5141  ;;  %v3518_v44 = vadd.f32 1.0, %v3517_v34  ;;  %v4900_v34 = vpop.f32.mrf.mxu1 }
 0x56b   :  { %v3814_v39 = vadd.f32 1e-06, %v3486_v35  ;;  %v3468_v54 = vsel %vm6635_vm5, %v3465_v22, %v3462_v26  ;;  %v3496_v8 = vadd.f32 1.0, %v6672_v40  ;;  %v6693_v63 = vpop.eup %5143  ;;  %vm7416_vm12 = vcmp.lt.f32.partialorder %v6473_v2, 0.0 }
 0x56c   :  { %v3812_v12 = vadd.f32 1e-06, %v3468_v54  ;;  %v3495_v42 = vsel %vm6643_vm4, %v3492_v56, %v3489_v45  ;;  %vm3880_vm1 = vmand %vm3848_vm14, %vm7416_vm12  ;;  %vm2994_vm6 = vcmp.lt.f32.partialorder %v6668_v21, 0.0  ;;  %vm6704_vm13 = vcmp.lt.f32.partialorder %v3475_v55, 0.0004427343 }
 0x56d   :  { %v3943_v0 = vsel %vm3879_vm3, %v3814_v39, %v6450_v57  ;;  %v3815_v46 = vadd.f32 1e-06, %v3495_v42  ;;  %v3055_v57 = vsel %vm2991_vm11, %v6660_v48, 0.0  ;;  %5155 = vlog2.f32 %v3496_v8 }
 0x56e   :  { %4007 = vst [vmem:[#allocation5 + $0xf0] sm:$0xff] %v3943_v0  ;;  %v3941_v7 = vsel %vm3877_vm8, %v3812_v12, %v6462_v25  ;;  %v3158_v36 = vmul.f32 1.442695, %v3055_v57  ;;  %v3053_v25 = vsel %vm2989_vm10, %v6665_v50, 0.0  ;;  %v5146_v51 = vpop.eup %5145  ;;  %v3520_v24 = vand.u32 2147483647, %v6612_v62  ;;  %v6763_v0 = vpop.f32.mrf.mxu1 }
 0x56f   :  { %4005 = vst [vmem:[#allocation5 + $0xe0] sm:$0xff] %v3941_v7  ;;  %v3944_v58 = vsel %vm3880_vm1, %v3815_v46, %v6473_v2  ;;  %v3523_v23 = vadd.f32 1.0, %v6693_v63  ;;  %v3471_v59 = vmul.f32 0.6931472, %v5146_v51  ;;  %v3474_v38 = vmul.f32 %v6595_v41, %v3473_v1 }
 0x570   :  { %4008 = vst [vmem:[#allocation5 + $0xf8] sm:$0xff] %v3944_v58  ;;  %v3499_v16 = vmul.f32 -0.5, %v6672_v40  ;;  %5157 = vpow2.f32 %v3158_v36  ;;  %v3519_v18 = vmul.f32 %v6612_v62, %v3518_v44  ;;  %v3154_v2 = vmul.f32 1.442695, %v3053_v25  ;;  %v4901_v47 = vpop.f32.mrf.mxu1 }
 0x571   :  { %v5148_v15 = vpop.eup %5147  ;;  %5159 = vlog2.f32 %v3523_v23  ;;  %v3058_v22 = vsel %vm2994_vm6, %v6668_v21, 0.0  ;;  %v3477_v9 = vsel %vm6704_vm13, %v3474_v38, %v3471_v59  ;;  %v3526_v37 = vmul.f32 -0.5, %v6693_v63 }
 0x572   :  { %v3516_v56 = vmul.f32 0.6931472, %v5148_v15  ;;  %v3164_v41 = vmul.f32 1.442695, %v3058_v22  ;;  %v3813_v52 = vadd.f32 1e-06, %v3477_v9  ;;  %5161 = vpow2.f32 %v3154_v2 }
 0x573   :  { %vm3521_vm5 = vcmp.lt.f32.partialorder %v3520_v24, 0.0004427343  ;;  %v6720_v28 = vadd.f32 %v6485_v60, %v2855_v53  ;;  %vm7419_vm4 = vcmp.lt.f32.partialorder %v6488_v61, 0.0  ;;  %v3500_v14 = vadd.f32 1.0, %v3499_v16 }
 0x574   :  { %vm3878_vm3 = vmand %vm3848_vm14, %vm7419_vm4  ;;  %v3522_v62 = vsel %vm3521_vm5, %v3519_v18, %v3516_v56  ;;  %v3502_v31 = vand.u32 2147483647, %v6672_v40  ;;  %5163 = vpow2.f32 %v3164_v41  ;;  %v6727_v33 = vpop.eup %5149  ;;  %v3529_v19 = vand.u32 2147483647, %v6693_v63 }
 0x575   :  { %v3942_v17 = vsel %vm3878_vm3, %v3813_v52, %v6488_v61  ;;  %v3818_v27 = vadd.f32 1e-06, %v3522_v62  ;;  %vm2992_vm8 = vcmp.lt.f32.partialorder %v6720_v28, 0.0  ;;  %v6732_v20 = vpop.eup %5151  ;;  %vm7420_vm12 = vcmp.lt.f32.partialorder %v6509_v6, 0.0 }
 0x576   :  { %4006 = vst [vmem:[#allocation5 + $0xe8] sm:$0xff] %v3942_v17  ;;  %vm3883_vm1 = vmand %vm3848_vm14, %vm7420_vm12  ;;  %v3527_v13 = vadd.f32 1.0, %v3526_v37  ;;  %v3505_v26 = vadd.f32 1.0, %v6727_v33  ;;  %v6740_v43 = vadd.f32 %v6485_v60, %v4897_v11  ;;  %v3550_v35 = vadd.f32 1.0, %v6732_v20 }
 0x577   :  { %v6742_v61 = vpop.eup %5153  ;;  %v3947_v30 = vsel %vm3883_vm1, %v3818_v27, %v6509_v6  ;;  %v3056_v53 = vsel %vm2992_vm8, %v6720_v28, 0.0  ;;  %v6750_v39 = vadd.f32 %v6485_v60, %v2858_v5  ;;  %vm6752_vm13 = vcmp.lt.f32.partialorder %v3502_v31, 0.0004427343  ;;  %v2874_v31 = vpop.f32.mrf.mxu1 }
 0x578   :  { %4011 = vst [vmem:[#allocation5 + $0x110] sm:$0xff] %v3947_v30  ;;  %5165 = vlog2.f32 %v3505_v26  ;;  %v3532_v45 = vadd.f32 1.0, %v6742_v61  ;;  %v3501_v12 = vmul.f32 %v6672_v40, %v3500_v14  ;;  %vm6758_vm5 = vcmp.lt.f32.partialorder %v3529_v19, 0.0004427343 }
 0x579   :  { %v3508_v55 = vmul.f32 -0.5, %v6727_v33  ;;  %5167 = vlog2.f32 %v3550_v35  ;;  %v3553_v42 = vmul.f32 -0.5, %v6732_v20  ;;  %v3160_v1 = vmul.f32 1.442695, %v3056_v53 }
 0x57a   :  { %5169 = vlog2.f32 %v3532_v45  ;;  %v6767_v8 = vadd.f32 %v6485_v60, %v4900_v34  ;;  %v5156_v7 = vpop.eup %5155  ;;  %v3528_v46 = vmul.f32 %v6693_v63, %v3527_v13  ;;  %v3511_v40 = vand.u32 2147483647, %v6727_v33 }
 0x57b   :  { %vm2995_vm4 = vcmp.lt.f32.partialorder %v6740_v43, 0.0  ;;  %vm2993_vm3 = vcmp.lt.f32.partialorder %v6750_v39, 0.0  ;;  %v3498_v44 = vmul.f32 0.6931472, %v5156_v7  ;;  %v3535_v57 = vmul.f32 -0.5, %v6742_v61 }
 0x57c   :  { %5171 = vpow2.f32 %v3160_v1  ;;  %v3059_v11 = vsel %vm2995_vm4, %v6740_v43, 0.0  ;;  %v3509_v25 = vadd.f32 1.0, %v3508_v55  ;;  %v3556_v51 = vand.u32 2147483647, %v6732_v20 }
 0x57d   :  { %v6777_v36 = vpop.eup %5157  ;;  %v3166_v63 = vmul.f32 1.442695, %v3059_v11  ;;  %v3057_v58 = vsel %vm2993_vm3, %v6750_v39, 0.0  ;;  %v3504_v23 = vsel %vm6752_vm13, %v3501_v12, %v3498_v44  ;;  %v3554_v59 = vadd.f32 1.0, %v3553_v42  ;;  %vm3881_vm13 = vmand %vm3848_vm14, %vm2984_vm0  ;;  %v4904_v12 = vpop.f32.mrf.mxu1 }
 0x57e   :  { %v5160_v24 = vpop.eup %5159  ;;  %v3559_v38 = vadd.f32 1.0, %v6777_v36  ;;  %vm7350_vm12 = vcmp.lt.f32.partialorder %v6767_v8, 0.0  ;;  %v3816_v16 = vadd.f32 1e-06, %v3504_v23  ;;  %vm6787_vm1 = vcmp.lt.f32.partialorder %v3511_v40, 0.0004427343 }
 0x57f   :  { %v3525_v15 = vmul.f32 0.6931472, %v5160_v24  ;;  %v3538_v2 = vand.u32 2147483647, %v6742_v61  ;;  %5173 = vpow2.f32 %v3166_v63  ;;  %v6792_v22 = vpop.eup %5161  ;;  %v3536_v5 = vadd.f32 1.0, %v3535_v57 }
 0x580   :  { %5175 = vlog2.f32 %v3559_v38  ;;  %v3562_v9 = vmul.f32 -0.5, %v6777_v36  ;;  %v3162_v56 = vmul.f32 1.442695, %v3057_v58  ;;  %v3945_v41 = vsel %vm3881_vm13, %v3816_v16, %v6525_v32  ;;  %v2887_v58 = vpop.f32.mrf.mxu1 }
 0x581   :  { %v6799_v37 = vpop.eup %5163  ;;  %v3531_v52 = vsel %vm6758_vm5, %v3528_v46, %v3525_v15  ;;  %v3541_v62 = vadd.f32 1.0, %v6792_v22  ;;  %v3062_v14 = vsel %vm7350_vm12, %v6767_v8, 0.0  ;;  %4009 = vst [vmem:[#allocation5 + $0x100] sm:$0xff] %v3945_v41  ;;  %vm6808_vm0 = vcmp.lt.f32.partialorder %v3556_v51, 0.0004427343  ;;  %vm3884_vm5 = vmand %vm3848_vm14, %vm2987_vm9 }
 0x582   :  { %v3819_v17 = vadd.f32 1e-06, %v3531_v52  ;;  %v3586_v19 = vadd.f32 1.0, %v6799_v37  ;;  %v3510_v32 = vmul.f32 %v6727_v33, %v3509_v25  ;;  %v3565_v34 = vand.u32 2147483647, %v6777_v36 }
 0x583   :  { %5177 = vlog2.f32 %v3541_v62  ;;  %v3544_v13 = vmul.f32 -0.5, %v6792_v22  ;;  %v3555_v30 = vmul.f32 %v6732_v20, %v3554_v59  ;;  %v3172_v35 = vmul.f32 1.442695, %v3062_v14  ;;  %v4905_v14 = vpop.f32.mrf.mxu1 }
 0x584   :  { %v3948_v26 = vsel %vm3884_vm5, %v3819_v17, %v6533_v10  ;;  %5179 = vlog2.f32 %v3586_v19  ;;  %v3537_v54 = vmul.f32 %v6742_v61, %v3536_v5  ;;  %vm6823_vm13 = vcmp.lt.f32.partialorder %v3538_v2, 0.0004427343 }
 0x585   :  { %v5166_v53 = vpop.eup %5165  ;;  %4012 = vst [vmem:[#allocation5 + $0x118] sm:$0xff] %v3948_v26  ;;  %v3563_v33 = vadd.f32 1.0, %v3562_v9  ;;  %5181 = vpow2.f32 %v3162_v56  ;;  %v6829_v10 = vadd.f32 %v6485_v60, %v6763_v0  ;;  %v6832_v20 = vadd.f32 %v6485_v60, %v4901_v47 }
 0x586   :  { %v5168_v6 = vpop.eup %5167  ;;  %v3507_v55 = vmul.f32 0.6931472, %v5166_v53  ;;  %5183 = vpow2.f32 %v3172_v35  ;;  %vm6834_vm9 = vcmp.lt.f32.partialorder %v3565_v34, 0.0004427343  ;;  %v3545_v7 = vadd.f32 1.0, %v3544_v13 }
 0x587   :  { %v5170_v42 = vpop.eup %5169  ;;  %v3552_v1 = vmul.f32 0.6931472, %v5168_v6  ;;  %v3547_v46 = vand.u32 2147483647, %v6792_v22  ;;  %v3589_v40 = vmul.f32 -0.5, %v6799_v37  ;;  %vm2996_vm5 = vcmp.lt.f32.partialorder %v6829_v10, 0.0 }
 0x588   :  { %v3513_v44 = vsel %vm6787_vm1, %v3510_v32, %v3507_v55  ;;  %v3534_v57 = vmul.f32 0.6931472, %v5170_v42  ;;  %vm2999_vm12 = vcmp.lt.f32.partialorder %v6832_v20, 0.0  ;;  %v3060_v51 = vsel %vm2996_vm5, %v6829_v10, 0.0  ;;  %vm3882_vm1 = vmand %vm3848_vm14, %vm2985_vm7 }
 0x589   :  { %v6844_v0 = vpop.eup %5171  ;;  %v3817_v11 = vadd.f32 1e-06, %v3513_v44  ;;  %v3558_v25 = vsel %vm6808_vm0, %v3555_v30, %v3552_v1  ;;  %v3063_v63 = vsel %vm2999_vm12, %v6832_v20, 0.0  ;;  %v3592_v23 = vand.u32 2147483647, %v6799_v37  ;;  %vm3887_vm0 = vmand %vm3848_vm14, %vm2990_vm2 }
 0x58a   :  { %v3822_v47 = vadd.f32 1e-06, %v3558_v25  ;;  %v3540_v24 = vsel %vm6823_vm13, %v3537_v54, %v3534_v57  ;;  %v3568_v59 = vadd.f32 1.0, %v6844_v0  ;;  %v3168_v15 = vmul.f32 1.442695, %v3060_v51  ;;  %vm3885_vm7 = vmand %vm3848_vm14, %vm2988_vm15  ;;  %v2890_v54 = vpop.f32.mrf.mxu1 }
 0x58b   :  { %v3946_v38 = vsel %vm3882_vm1, %v3817_v11, %v6573_v4  ;;  %v3820_v16 = vadd.f32 1e-06, %v3540_v24  ;;  %v6868_v18 = vadd.f32 %v6485_v60, %v2874_v31  ;;  %v3564_v4 = vmul.f32 %v6777_v36, %v3563_v33 }
 0x58c   :  { %v6870_v2 = vpop.eup %5173  ;;  %4010 = vst [vmem:[#allocation5 + $0x108] sm:$0xff] %v3946_v38  ;;  %v3951_v5 = vsel %vm3887_vm0, %v3822_v47, %v6581_v29  ;;  %5185 = vlog2.f32 %v3568_v59  ;;  %v3174_v9 = vmul.f32 1.442695, %v3063_v63  ;;  %vm6879_vm2 = vcmp.lt.f32.partialorder %v3547_v46, 0.0004427343  ;;  %v4908_v25 = vpop.f32.mrf.mxu1  ;;  %vm3891_vm0 = vmand %vm3848_vm14, %vm2994_vm6 }
 0x58d   :  { %v5176_v56 = vpop.eup %5175  ;;  %4015 = vst [vmem:[#allocation5 + $0x130] sm:$0xff] %v3951_v5  ;;  %v3949_v41 = vsel %vm3885_vm7, %v3820_v16, %v6590_v3  ;;  %v3590_v62 = vadd.f32 1.0, %v3589_v40  ;;  %v3595_v29 = vadd.f32 1.0, %v6870_v2  ;;  %v3571_v17 = vmul.f32 -0.5, %v6844_v0 }
 0x58e   :  { %4013 = vst [vmem:[#allocation5 + $0x120] sm:$0xff] %v3949_v41  ;;  %v3561_v31 = vmul.f32 0.6931472, %v5176_v56  ;;  %5187 = vpow2.f32 %v3168_v15  ;;  %v6886_v36 = vadd.f32 %v6485_v60, %v4904_v12  ;;  %v3546_v27 = vmul.f32 %v6792_v22, %v3545_v7  ;;  %v2903_v15 = vpop.f32.mrf.mxu1 }
 0x58f   :  { %vm6889_vm15 = vcmp.lt.f32.partialorder %v3592_v23, 0.0004427343  ;;  %5189 = vlog2.f32 %v3595_v29  ;;  %vm2997_vm13 = vcmp.lt.f32.partialorder %v6868_v18, 0.0  ;;  %v3574_v34 = vand.u32 2147483647, %v6844_v0 }
 0x590   :  { %v5178_v19 = vpop.eup %5177  ;;  %v3567_v32 = vsel %vm6834_vm9, %v3564_v4, %v3561_v31  ;;  %5191 = vpow2.f32 %v3174_v9  ;;  %v3061_v13 = vsel %vm2997_vm13, %v6868_v18, 0.0  ;;  %v3591_v35 = vmul.f32 %v6799_v37, %v3590_v62  ;;  %vm3888_vm9 = vmand %vm3848_vm14, %vm2991_vm11 }
 0x591   :  { %v5180_v26 = vpop.eup %5179  ;;  %v3823_v22 = vadd.f32 1e-06, %v3567_v32  ;;  %v3543_v30 = vmul.f32 0.6931472, %v5178_v19  ;;  %v3598_v53 = vmul.f32 -0.5, %v6870_v2  ;;  %v3572_v12 = vadd.f32 1.0, %v3571_v17  ;;  %vm3886_vm11 = vmand %vm3848_vm14, %vm2989_vm10 }
 0x592   :  { %v6902_v45 = vpop.eup %5181  ;;  %v3588_v33 = vmul.f32 0.6931472, %v5180_v26  ;;  %v3170_v6 = vmul.f32 1.442695, %v3061_v13  ;;  %vm3002_vm1 = vcmp.lt.f32.partialorder %v6886_v36, 0.0  ;;  %v6916_v61 = vadd.f32 %v6485_v60, %v2887_v58 }
 0x593   :  { %v6909_v55 = vpop.eup %5183  ;;  %v3952_v42 = vsel %vm3888_vm9, %v3823_v22, %v6660_v48  ;;  %v3549_v37 = vsel %vm6879_vm2, %v3546_v27, %v3543_v30  ;;  %v3577_v1 = vadd.f32 1.0, %v6902_v45  ;;  %v6922_v44 = vadd.f32 %v6485_v60, %v4905_v14 }
 0x594   :  { %4016 = vst [vmem:[#allocation5 + $0x138] sm:$0xff] %v3952_v42  ;;  %v3821_v7 = vadd.f32 1e-06, %v3549_v37  ;;  %v3594_v46 = vsel %vm6889_vm15, %v3591_v35, %v3588_v33  ;;  %v3622_v40 = vadd.f32 1.0, %v6909_v55  ;;  %v3599_v57 = vadd.f32 1.0, %v3598_v53  ;;  %vm3889_vm15 = vmand %vm3848_vm14, %vm2992_vm8 }
 0x595   :  { %v3826_v48 = vadd.f32 1e-06, %v3594_v46  ;;  %5193 = vlog2.f32 %v3577_v1  ;;  %v3066_v11 = vsel %vm3002_vm1, %v6886_v36, 0.0  ;;  %vm6936_vm7 = vcmp.lt.f32.partialorder %v3574_v34, 0.0004427343  ;;  %v4909_v34 = vpop.f32.mrf.mxu1  ;;  %vm3892_vm8 = vmand %vm3848_vm14, %vm2995_vm4 }
 0x596   :  { %v3950_v51 = vsel %vm3886_vm11, %v3821_v7, %v6665_v50  ;;  %5195 = vlog2.f32 %v3622_v40  ;;  %v3573_v47 = vmul.f32 %v6844_v0, %v3572_v12  ;;  %v3580_v24 = vmul.f32 -0.5, %v6902_v45 }
 0x597   :  { %4014 = vst [vmem:[#allocation5 + $0x128] sm:$0xff] %v3950_v51  ;;  %v3955_v58 = vsel %vm3891_vm0, %v3826_v48, %v6668_v21  ;;  %5197 = vpow2.f32 %v3170_v6  ;;  %v3601_v50 = vand.u32 2147483647, %v6870_v2  ;;  %v3180_v23 = vmul.f32 1.442695, %v3066_v11  ;;  %v2906_v7 = vpop.f32.mrf.mxu1 }
 0x598   :  { %4019 = vst [vmem:[#allocation5 + $0x150] sm:$0xff] %v3955_v58  ;;  %vm3000_vm10 = vcmp.lt.f32.partialorder %v6916_v61, 0.0  ;;  %vm3003_vm6 = vcmp.lt.f32.partialorder %v6922_v44, 0.0  ;;  %v3600_v38 = vmul.f32 %v6870_v2, %v3599_v57  ;;  %v6954_v16 = vadd.f32 %v6485_v60, %v2890_v54 }
 0x599   :  { %v5186_v59 = vpop.eup %5185  ;;  %v3064_v21 = vsel %vm3000_vm10, %v6916_v61, 0.0  ;;  %v3067_v0 = vsel %vm3003_vm6, %v6922_v44, 0.0  ;;  %v3583_v4 = vand.u32 2147483647, %v6902_v45  ;;  %5199 = vpow2.f32 %v3180_v23 }
 0x59a   :  { %v3570_v5 = vmul.f32 0.6931472, %v5186_v59  ;;  %v3176_v9 = vmul.f32 1.442695, %v3064_v21  ;;  %v3581_v2 = vadd.f32 1.0, %v3580_v24  ;;  %v3625_v41 = vmul.f32 -0.5, %v6909_v55 }
 0x59b   :  { %v6957_v56 = vpop.eup %5187  ;;  %v3628_v52 = vand.u32 2147483647, %v6909_v55  ;;  %vm3001_vm2 = vcmp.lt.f32.partialorder %v6954_v16, 0.0  ;;  %v3182_v31 = vmul.f32 1.442695, %v3067_v0  ;;  %v6966_v17 = vadd.f32 %v6485_v60, %v4908_v25  ;;  %v4912_v0 = vpop.f32.mrf.mxu1 }
 0x59c   :  { %v5190_v62 = vpop.eup %5189  ;;  %v3576_v29 = vsel %vm6936_vm7, %v3573_v47, %v3570_v5  ;;  %v3604_v14 = vadd.f32 1.0, %v6957_v56  ;;  %5201 = vpow2.f32 %v3176_v9  ;;  %v3065_v32 = vsel %vm3001_vm2, %v6954_v16, 0.0 }
 0x59d   :  { %v6968_v27 = vpop.eup %5191  ;;  %v3824_v3 = vadd.f32 1e-06, %v3576_v29  ;;  %v3597_v19 = vmul.f32 0.6931472, %v5190_v62  ;;  %vm3602_vm9 = vcmp.lt.f32.partialorder %v3601_v50, 0.0004427343  ;;  %v6979_v26 = vadd.f32 %v6485_v60, %v2903_v15 }
 0x59e   :  { %5203 = vlog2.f32 %v3604_v14  ;;  %v3631_v13 = vadd.f32 1.0, %v6968_v27  ;;  %vm6982_vm11 = vcmp.lt.f32.partialorder %v3583_v4, 0.0004427343  ;;  %v3626_v53 = vadd.f32 1.0, %v3625_v41 }
 0x59f   :  { %v3953_v22 = vsel %vm3889_vm15, %v3824_v3, %v6720_v28  ;;  %v3603_v30 = vsel %vm3602_vm9, %v3600_v38, %v3597_v19  ;;  %v3178_v33 = vmul.f32 1.442695, %v3065_v32  ;;  %v6987_v12 = vadd.f32 %v6485_v60, %v4909_v34  ;;  %vm3890_vm9 = vmand %vm3848_vm14, %vm2993_vm3  ;;  %v2919_v19 = vpop.f32.mrf.mxu1 }
 0x5a0   :  { %4017 = vst [vmem:[#allocation5 + $0x140] sm:$0xff] %v3953_v22  ;;  %v3827_v54 = vadd.f32 1e-06, %v3603_v30  ;;  %5205 = vlog2.f32 %v3631_v13  ;;  %v3582_v28 = vmul.f32 %v6902_v45, %v3581_v2  ;;  %vm6994_vm0 = vcmp.lt.f32.partialorder %v3628_v52, 0.0004427343 }
 0x5a1   :  { %5207 = vpow2.f32 %v3182_v31  ;;  %vm3006_vm7 = vcmp.lt.f32.partialorder %v6966_v17, 0.0  ;;  %vm3004_vm15 = vcmp.lt.f32.partialorder %v6979_v26, 0.0  ;;  %v3607_v40 = vmul.f32 -0.5, %v6957_v56 }
 0x5a2   :  { %v5194_v42 = vpop.eup %5193  ;;  %v3956_v37 = vsel %vm3892_vm8, %v3827_v54, %v6740_v43  ;;  %5209 = vpow2.f32 %v3178_v33  ;;  %v3070_v1 = vsel %vm3006_vm7, %v6966_v17, 0.0  ;;  %v3068_v57 = vsel %vm3004_vm15, %v6979_v26, 0.0 }
 0x5a3   :  { %v5196_v46 = vpop.eup %5195  ;;  %4020 = vst [vmem:[#allocation5 + $0x158] sm:$0xff] %v3956_v37  ;;  %v3579_v45 = vmul.f32 0.6931472, %v5194_v42  ;;  %v3188_v48 = vmul.f32 1.442695, %v3070_v1  ;;  %v3627_v25 = vmul.f32 %v6909_v55, %v3626_v53  ;;  %v3634_v51 = vmul.f32 -0.5, %v6968_v27 }
 0x5a4   :  { %v7008_v11 = vpop.eup %5197  ;;  %v3624_v43 = vmul.f32 0.6931472, %v5196_v46  ;;  %vm3007_vm4 = vcmp.lt.f32.partialorder %v6987_v12, 0.0  ;;  %v3184_v47 = vmul.f32 1.442695, %v3068_v57  ;;  %v7017_v24 = vadd.f32 %v6485_v60, %v2906_v7 }
 0x5a5   :  { %v3585_v63 = vsel %vm6982_vm11, %v3582_v28, %v3579_v45  ;;  %v3613_v58 = vadd.f32 1.0, %v7008_v11  ;;  %5211 = vpow2.f32 %v3188_v48  ;;  %v3071_v55 = vsel %vm3007_vm4, %v6987_v12, 0.0  ;;  %v7063_v53 = vld [vmem:[%s7339_s6] ss:$0 sm:$0xff]  ;;  %v4913_v48 = vpop.f32.mrf.mxu1  ;;  %s5318_s6 = smov [#allocation5]  }
 0x5a6   :  { %v3825_v50 = vadd.f32 1e-06, %v3585_v63  ;;  %v3630_v23 = vsel %vm6994_vm0, %v3627_v25, %v3624_v43  ;;  %v7024_v59 = vpop.eup %5199  ;;  %v3608_v21 = vadd.f32 1.0, %v3607_v40  ;;  %v3610_v60 = vand.u32 2147483647, %v6957_v56  ;;  %s4046_s20 = sshll.u32 %s5318_s6, 4  ;;  %s4047_s20 = int_to_ptr.vmem [resolvable:$true] %s4046_s20 }
 0x5a7   :  { %v3830_v38 = vadd.f32 1e-06, %v3630_v23  ;;  %5213 = vlog2.f32 %v3613_v58  ;;  %vm7443_vm11 = vcmp.lt.f32.partialorder %v6767_v8, 0.0  ;;  %v3635_v5 = vadd.f32 1.0, %v3634_v51  ;;  %s5291_s21 = scalar_lea.vmem %s4047_s20, 8192  ;;  %p5296_p6 = scmp.lt.s32.totalorder %s4047_s20, %s4047_s20 }
 0x5a8   :  { %v3954_v15 = vsel %vm3890_vm9, %v3825_v50, %v6750_v39  ;;  %vm3895_vm8 = vmand %vm3848_vm14, %vm7443_vm11  ;;  %v3637_v4 = vand.u32 2147483647, %v6968_v27  ;;  %v3658_v9 = vadd.f32 1.0, %v7024_v59  ;;  %v3616_v41 = vmul.f32 -0.5, %v7008_v11  ;;  %p5292_p5 = scmp.ne.s32.totalorder %s4047_s20, %s5291_s21  ;;  %p5297_p7 = scmp.lt.s32.totalorder %s5291_s21, %s5291_s21 }
 0x5a9   :  { %4018 = vst [vmem:[#allocation5 + $0x148] sm:$0xff] %v3954_v15  ;;  %v3959_v2 = vsel %vm3895_vm8, %v3830_v38, %v6767_v8  ;;  %5215 = vpow2.f32 %v3184_v47  ;;  %v3190_v52 = vmul.f32 1.442695, %v3071_v55  ;;  %v7040_v62 = vpop.eup %5201  ;;  %v3619_v39 = vand.u32 2147483647, %v7008_v11  ;;  %vm3893_vm8 = vmand %vm3848_vm14, %vm2996_vm5 }
 0x5aa   :  { %4023 = vst [vmem:[#allocation5 + $0x170] sm:$0xff] %v3959_v2  ;;  %5217 = vlog2.f32 %v3658_v9  ;;  %v3661_v29 = vmul.f32 -0.5, %v7024_v59  ;;  %vm3005_vm3 = vcmp.lt.f32.partialorder %v7017_v24, 0.0  ;;  %v3609_v31 = vmul.f32 %v6957_v56, %v3608_v21  ;;  %vm3896_vm5 = vmand %vm3848_vm14, %vm2999_vm12  ;;  %p5298_p8 = por %p5297_p7, %p5296_p6 }
 0x5ab   :  { %v5204_v14 = vpop.eup %5203  ;;  %vm7046_vm0 = vcmp.lt.f32.partialorder %v3610_v60, 0.0004427343  ;;  %v3640_v8 = vadd.f32 1.0, %v7040_v62  ;;  %5219 = vpow2.f32 %v3190_v52  ;;  %v3636_v34 = vmul.f32 %v6968_v27, %v3635_v5  ;;  %v2922_v60 = vpop.f32.mrf.mxu1 }
 0x5ac   :  { %v3606_v32 = vmul.f32 0.6931472, %v5204_v14  ;;  %vm7052_vm9 = vcmp.lt.f32.partialorder %v3637_v4, 0.0004427343  ;;  %v3069_v22 = vsel %vm3005_vm3, %v7017_v24, 0.0  ;;  %v3617_v30 = vadd.f32 1.0, %v3616_v41  ;;  %p5299_p9 = pnand %p5298_p8, %p5292_p5 }
 0x5ad   :  { %v5206_v56 = vpop.eup %5205  ;;  %v3664_v35 = vand.u32 2147483647, %v7024_v59  ;;  %5221 = vlog2.f32 %v3640_v8  ;;  %v7066_v27 = vadd.f32 %v7063_v53, %v4912_v0  ;;  %vm7070_vm11 = vcmp.lt.f32.partialorder %v3619_v39, 0.0004427343 }
 0x5ae   :  { %v5208_v54 = vpop.eup %5207  ;;  %v3612_v33 = vsel %vm7046_vm0, %v3609_v31, %v3606_v32  ;;  %v3633_v28 = vmul.f32 0.6931472, %v5206_v56  ;;  %v3662_v42 = vadd.f32 1.0, %v3661_v29  ;;  %v3643_v37 = vmul.f32 -0.5, %v7040_v62 }
 0x5af   :  { %v7075_v1 = vpop.eup %5209  ;;  %v3828_v7 = vadd.f32 1e-06, %v3612_v33  ;;  %v3667_v46 = vadd.f32 1.0, %v5208_v54  ;;  %v3670_v45 = vmul.f32 -0.5, %v5208_v54  ;;  %v3186_v40 = vmul.f32 1.442695, %v3069_v22 }
 0x5b0   :  { %v3639_v57 = vsel %vm7052_vm9, %v3636_v34, %v3633_v28  ;;  %v3646_v43 = vand.u32 2147483647, %v7040_v62  ;;  %v3649_v25 = vadd.f32 1.0, %v7075_v1  ;;  %v3652_v51 = vmul.f32 -0.5, %v7075_v1  ;;  %v4916_v34 = vpop.f32.mrf.mxu1 }
 0x5b1   :  { %v3957_v63 = vsel %vm3893_vm8, %v3828_v7, %v6829_v10  ;;  %v3831_v58 = vadd.f32 1e-06, %v3639_v57  ;;  %5223 = vlog2.f32 %v3667_v46  ;;  %vm7351_vm0 = vcmp.lt.f32.partialorder %v7066_v27, 0.0 }
 0x5b2   :  { %4021 = vst [vmem:[#allocation5 + $0x160] sm:$0xff] %v3957_v63  ;;  %v3618_v47 = vmul.f32 %v7008_v11, %v3617_v30  ;;  %v3644_v50 = vadd.f32 1.0, %v3643_v37  ;;  %v3671_v23 = vadd.f32 1.0, %v3670_v45  ;;  %5225 = vlog2.f32 %v3649_v25  ;;  %v5212_v55 = vpop.eup %5211  ;;  %v2935_v45 = vpop.f32.mrf.mxu1 }
 0x5b3   :  { %v3960_v38 = vsel %vm3896_vm5, %v3831_v58, %v6832_v20  ;;  %vm7094_vm9 = vcmp.lt.f32.partialorder %v3664_v35, 0.0004427343  ;;  %v3673_v21 = vand.u32 2147483647, %v5208_v54  ;;  %5227 = vpow2.f32 %v3186_v40 }
 0x5b4   :  { %v5214_v0 = vpop.eup %5213  ;;  %4024 = vst [vmem:[#allocation5 + $0x178] sm:$0xff] %v3960_v38  ;;  %v3653_v15 = vadd.f32 1.0, %v3652_v51  ;;  %v3694_v5 = vadd.f32 1.0, %v5212_v55  ;;  %v3697_v4 = vmul.f32 -0.5, %v5212_v55  ;;  %v3074_v11 = vsel %vm7351_vm0, %v7066_v27, 0.0  ;;  %v4917_v10 = vpop.f32.mrf.mxu1 }
 0x5b5   :  { %v3615_v9 = vmul.f32 0.6931472, %v5214_v0  ;;  %v3663_v2 = vmul.f32 %v7024_v59, %v3662_v42  ;;  %vm7102_vm12 = vcmp.lt.f32.partialorder %v3646_v43, 0.0004427343  ;;  %v7107_v41 = vadd.f32 %v7063_v53, %v2919_v19 }
 0x5b6   :  { %v7109_v52 = vpop.eup %5215  ;;  %v3645_v39 = vmul.f32 %v7040_v62, %v3644_v50  ;;  %v7112_v29 = vmul.f32 %v5208_v54, %v3671_v23  ;;  %v3655_v14 = vand.u32 2147483647, %v7075_v1  ;;  %5229 = vlog2.f32 %v3694_v5 }
 0x5b7   :  { %v5218_v31 = vpop.eup %5217  ;;  %v3621_v59 = vsel %vm7070_vm11, %v3618_v47, %v3615_v9  ;;  %v3700_v3 = vand.u32 2147483647, %v5212_v55  ;;  %v3676_v8 = vadd.f32 1.0, %v7109_v52  ;;  %v3196_v32 = vmul.f32 1.442695, %v3074_v11  ;;  %vm3894_vm11 = vmand %vm3848_vm14, %vm2997_vm13 }
 0x5b8   :  { %v7118_v19 = vpop.eup %5219  ;;  %v3829_v13 = vadd.f32 1e-06, %v3621_v59  ;;  %v3660_v22 = vmul.f32 0.6931472, %v5218_v31  ;;  %vm7120_vm8 = vcmp.lt.f32.partialorder %v3673_v21, 0.0004427343  ;;  %v3654_v56 = vmul.f32 %v7075_v1, %v3653_v15  ;;  %vm3899_vm13 = vmand %vm3848_vm14, %vm3002_vm1  ;;  %v2938_v59 = vpop.f32.mrf.mxu1 }
 0x5b9   :  { %v3698_v30 = vadd.f32 1.0, %v3697_v4  ;;  %5231 = vlog2.f32 %v3676_v8  ;;  %v3703_v35 = vadd.f32 1.0, %v7118_v19  ;;  %vm3008_vm5 = vcmp.lt.f32.partialorder %v7107_v41, 0.0 }
 0x5ba   :  { %v7132_v54 = vadd.f32 %v7063_v53, %v4913_v48  ;;  %v5222_v33 = vpop.eup %5221  ;;  %v3958_v28 = vsel %vm3894_vm11, %v3829_v13, %v6868_v18  ;;  %v3666_v6 = vsel %vm7094_vm9, %v3663_v2, %v3660_v22  ;;  %vm7137_vm0 = vcmp.lt.f32.partialorder %v3655_v14, 0.0004427343 }
 0x5bb   :  { %v7142_v37 = vadd.f32 %v7063_v53, %v2922_v60  ;;  %4022 = vst [vmem:[#allocation5 + $0x168] sm:$0xff] %v3958_v28  ;;  %v3834_v1 = vadd.f32 1e-06, %v3666_v6  ;;  %v3642_v7 = vmul.f32 0.6931472, %v5222_v33  ;;  %v3679_v46 = vmul.f32 -0.5, %v7109_v52 }
 0x5bc   :  { %5233 = vlog2.f32 %v3703_v35  ;;  %v3699_v18 = vmul.f32 %v5212_v55, %v3698_v30  ;;  %v3706_v40 = vmul.f32 -0.5, %v7118_v19  ;;  %v3072_v48 = vsel %vm3008_vm5, %v7107_v41, 0.0 }
 0x5bd   :  { %5235 = vpow2.f32 %v3196_v32  ;;  %v3963_v57 = vsel %vm3899_vm13, %v3834_v1, %v6886_v36  ;;  %v3648_v43 = vsel %vm7102_vm12, %v3645_v39, %v3642_v7  ;;  %vm7156_vm9 = vcmp.lt.f32.partialorder %v3700_v3, 0.0004427343  ;;  %vm3897_vm12 = vmand %vm3848_vm14, %vm3000_vm10 }
 0x5be   :  { %v3192_v51 = vmul.f32 1.442695, %v3072_v48  ;;  %vm3011_vm1 = vcmp.lt.f32.partialorder %v7132_v54, 0.0  ;;  %v5224_v63 = vpop.eup %5223  ;;  %4027 = vst [vmem:[#allocation5 + $0x190] sm:$0xff] %v3963_v57  ;;  %v3832_v58 = vadd.f32 1e-06, %v3648_v43  ;;  %v7177_v5 = vadd.f32 %v7063_v53, %v4916_v34  ;;  %vm3900_vm13 = vmand %vm3848_vm14, %vm3003_vm6 }
 0x5bf   :  { %v3682_v47 = vand.u32 2147483647, %v7109_v52  ;;  %v3075_v50 = vsel %vm3011_vm1, %v7132_v54, 0.0  ;;  %vm3009_vm11 = vcmp.lt.f32.partialorder %v7142_v37, 0.0  ;;  %v5226_v36 = vpop.eup %5225  ;;  %v3669_v23 = vmul.f32 0.6931472, %v5224_v63 }
 0x5c0   :  { %5237 = vpow2.f32 %v3192_v51  ;;  %v3198_v55 = vmul.f32 1.442695, %v3075_v50  ;;  %v3073_v38 = vsel %vm3009_vm11, %v7142_v37, 0.0  ;;  %v7173_v21 = vpop.eup %5227  ;;  %v3961_v60 = vsel %vm3897_vm12, %v3832_v58, %v6916_v61 }
 0x5c1   :  { %v3651_v0 = vmul.f32 0.6931472, %v5226_v36  ;;  %v3194_v15 = vmul.f32 1.442695, %v3073_v38  ;;  %4025 = vst [vmem:[#allocation5 + $0x180] sm:$0xff] %v3961_v60  ;;  %v3675_v4 = vsel %vm7120_vm8, %v7112_v29, %v3669_v23  ;;  %v3680_v11 = vadd.f32 1.0, %v3679_v46 }
 0x5c2   :  { %v3707_v9 = vadd.f32 1.0, %v3706_v40  ;;  %v3685_v2 = vadd.f32 1.0, %v7173_v21  ;;  %v3835_v20 = vadd.f32 1e-06, %v3675_v4  ;;  %5239 = vpow2.f32 %v3198_v55 }
 0x5c3   :  { %v3657_v39 = vsel %vm7137_vm0, %v3654_v56, %v3651_v0  ;;  %vm3014_vm10 = vcmp.lt.f32.partialorder %v7177_v5, 0.0  ;;  %v5230_v61 = vpop.eup %5229  ;;  %vm7190_vm12 = vcmp.lt.f32.partialorder %v3682_v47, 0.0004427343  ;;  %v3709_v31 = vand.u32 2147483647, %v7118_v19  ;;  %vm3898_vm0 = vmand %vm3848_vm14, %vm3001_vm2 }
 0x5c4   :  { %v3833_v14 = vadd.f32 1e-06, %v3657_v39  ;;  %5241 = vlog2.f32 %v3685_v2  ;;  %v3964_v3 = vsel %vm3900_vm13, %v3835_v20, %v6922_v44  ;;  %v3696_v8 = vmul.f32 0.6931472, %v5230_v61  ;;  %vm3903_vm2 = vmand %vm3848_vm14, %vm3006_vm7 }
 0x5c5   :  { %5243 = vpow2.f32 %v3194_v15  ;;  %v3078_v32 = vsel %vm3014_vm10, %v7177_v5, 0.0  ;;  %4028 = vst [vmem:[#allocation5 + $0x198] sm:$0xff] %v3964_v3  ;;  %v3681_v13 = vmul.f32 %v7109_v52, %v3680_v11  ;;  %v7206_v62 = vadd.f32 %v7063_v53, %v2935_v45  ;;  %vm3901_vm13 = vmand %vm3848_vm14, %vm3004_vm15 }
 0x5c6   :  { %v3962_v34 = vsel %vm3898_vm0, %v3833_v14, %v6954_v16  ;;  %v3204_v22 = vmul.f32 1.442695, %v3078_v32  ;;  %v5232_v44 = vpop.eup %5231  ;;  %v3702_v56 = vsel %vm7156_vm9, %v3699_v18, %v3696_v8  ;;  %v3708_v30 = vmul.f32 %v7118_v19, %v3707_v9  ;;  %vm3904_vm15 = vmand %vm3848_vm14, %vm3007_vm4 }
 0x5c7   :  { %4026 = vst [vmem:[#allocation5 + $0x188] sm:$0xff] %v3962_v34  ;;  %v7212_v35 = vadd.f32 %v7063_v53, %v4917_v10  ;;  %v7215_v33 = vadd.f32 %v7063_v53, %v2938_v59  ;;  %v3838_v16 = vadd.f32 1e-06, %v3702_v56  ;;  %v3678_v28 = vmul.f32 0.6931472, %v5232_v44 }
 0x5c8   :  { %5245 = vpow2.f32 %v3204_v22  ;;  %vm3012_vm6 = vcmp.lt.f32.partialorder %v7206_v62, 0.0  ;;  %v3688_v6 = vmul.f32 -0.5, %v7173_v21  ;;  %vm3710_vm7 = vcmp.lt.f32.partialorder %v3709_v31, 0.0004427343 }
 0x5c9   :  { %v5234_v52 = vpop.eup %5233  ;;  %v3076_v19 = vsel %vm3012_vm6, %v7206_v62, 0.0  ;;  %vm3015_vm8 = vcmp.lt.f32.partialorder %v7212_v35, 0.0  ;;  %vm3013_vm9 = vcmp.lt.f32.partialorder %v7215_v33, 0.0  ;;  %v3967_v42 = vsel %vm3903_vm2, %v3838_v16, %v6966_v17 }
 0x5ca   :  { %v5236_v53 = vpop.eup %5235  ;;  %v3684_v1 = vsel %vm7190_vm12, %v3681_v13, %v3678_v28  ;;  %v3705_v7 = vmul.f32 0.6931472, %v5234_v52  ;;  %v3200_v46 = vmul.f32 1.442695, %v3076_v19  ;;  %4031 = vst [vmem:[#allocation5 + $0x1b0] sm:$0xff] %v3967_v42  ;;  %v3079_v17 = vsel %vm3015_vm8, %v7212_v35, 0.0  ;;  %vm3902_vm12 = vmand %vm3848_vm14, %vm3005_vm3 }
 0x5cb   :  { %v3836_v45 = vadd.f32 1e-06, %v3684_v1  ;;  %v3730_v18 = vadd.f32 1.0, %v5236_v53  ;;  %v3077_v48 = vsel %vm3013_vm9, %v7215_v33, 0.0  ;;  %v3689_v51 = vadd.f32 1.0, %v3688_v6 }
 0x5cc   :  { %v3711_v40 = vsel %vm3710_vm7, %v3708_v30, %v3705_v7  ;;  %5247 = vpow2.f32 %v3200_v46  ;;  %v3691_v47 = vand.u32 2147483647, %v7173_v21  ;;  %v3206_v50 = vmul.f32 1.442695, %v3079_v17 }
 0x5cd   :  { %v5238_v57 = vpop.eup %5237  ;;  %v3965_v43 = vsel %vm3901_vm13, %v3836_v45, %v6979_v26  ;;  %v3839_v25 = vadd.f32 1e-06, %v3711_v40  ;;  %5249 = vlog2.f32 %v3730_v18  ;;  %v3202_v36 = vmul.f32 1.442695, %v3077_v48  ;;  %vm3905_vm13 = vmand %vm3848_vm14, %vm3008_vm5 }
 0x5ce   :  { %4029 = vst [vmem:[#allocation5 + $0x1a0] sm:$0xff] %v3965_v43  ;;  %v3712_v63 = vadd.f32 1.0, %v5238_v57  ;;  %v3690_v60 = vmul.f32 %v7173_v21, %v3689_v51  ;;  %vm3692_vm4 = vcmp.lt.f32.partialorder %v3691_v47, 0.0004427343  ;;  %v3715_v9 = vmul.f32 -0.5, %v5238_v57  ;;  %vm3908_vm5 = vmand %vm3848_vm14, %vm3011_vm1 }
 0x5cf   :  { %v3968_v58 = vsel %vm3904_vm15, %v3839_v25, %v6987_v12  ;;  %v7248_v23 = vpop.eup %5239  ;;  %v3733_v12 = vmul.f32 -0.5, %v5236_v53  ;;  %v3736_v39 = vand.u32 2147483647, %v5236_v53  ;;  %v3718_v32 = vand.u32 2147483647, %v5238_v57  ;;  %vm3911_vm1 = vmand %vm3848_vm14, %vm3014_vm10 }
 0x5d0   :  { %4032 = vst [vmem:[#allocation5 + $0x1b8] sm:$0xff] %v3968_v58  ;;  %5251 = vlog2.f32 %v3712_v63  ;;  %v3739_v55 = vadd.f32 1.0, %v7248_v23  ;;  %v3742_v61 = vmul.f32 -0.5, %v7248_v23  ;;  %v3716_v31 = vadd.f32 1.0, %v3715_v9  ;;  %vm3909_vm10 = vmand %vm3848_vm14, %vm3012_vm6 }
 0x5d1   :  { %v5242_v26 = vpop.eup %5241  ;;  %5253 = vpow2.f32 %v3206_v50  ;;  %v3734_v20 = vadd.f32 1.0, %v3733_v12  ;;  %vm3737_vm3 = vcmp.lt.f32.partialorder %v3736_v39, 0.0004427343  ;;  %v3745_v52 = vand.u32 2147483647, %v7248_v23  ;;  %vm3912_vm6 = vmand %vm3848_vm14, %vm3015_vm8 }
 0x5d2   :  { %v7251_v38 = vpop.eup %5243  ;;  %v3687_v10 = vmul.f32 0.6931472, %v5242_v26  ;;  %5255 = vpow2.f32 %v3202_v36  ;;  %v3743_v13 = vadd.f32 1.0, %v3742_v61  ;;  %v3717_v28 = vmul.f32 %v5238_v57, %v3716_v31 }
 0x5d3   :  { %5257 = vlog2.f32 %v3739_v55  ;;  %v3721_v0 = vadd.f32 1.0, %v7251_v38  ;;  %v3735_v8 = vmul.f32 %v5236_v53, %v3734_v20  ;;  %v3724_v34 = vmul.f32 -0.5, %v7251_v38 }
 0x5d4   :  { %v3693_v15 = vsel %vm3692_vm4, %v3690_v60, %v3687_v10  ;;  %vm7462_vm0 = vcmp.lt.f32.partialorder %v7066_v27, 0.0  ;;  %vm3719_vm7 = vcmp.lt.f32.partialorder %v3718_v32, 0.0004427343  ;;  %v3727_v53 = vand.u32 2147483647, %v7251_v38 }
 0x5d5   :  { %v7255_v4 = vpop.eup %5245  ;;  %v3837_v11 = vadd.f32 1e-06, %v3693_v15  ;;  %5259 = vlog2.f32 %v3721_v0  ;;  %vm3907_vm2 = vmand %vm3848_vm14, %vm7462_vm0  ;;  %v3725_v19 = vadd.f32 1.0, %v3724_v34  ;;  %v3744_v45 = vmul.f32 %v7248_v23, %v3743_v13 }
 0x5d6   :  { %v3766_v2 = vadd.f32 1.0, %v7255_v4  ;;  %v3769_v44 = vmul.f32 -0.5, %v7255_v4  ;;  %vm3746_vm15 = vcmp.lt.f32.partialorder %v3745_v52, 0.0004427343  ;;  %v3772_v43 = vand.u32 2147483647, %v7255_v4 }
 0x5d7   :  { %v3966_v21 = vsel %vm3902_vm12, %v3837_v11, %v7017_v24  ;;  %v3726_v58 = vmul.f32 %v7251_v38, %v3725_v19  ;;  %vm3728_vm4 = vcmp.lt.f32.partialorder %v3727_v53, 0.0004427343  ;;  %vm3906_vm12 = vmand %vm3848_vm14, %vm3009_vm11 }
 0x5d8   :  { %4030 = vst [vmem:[#allocation5 + $0x1a8] sm:$0xff] %v3966_v21  ;;  %5261 = vlog2.f32 %v3766_v2  ;;  %v3770_v48 = vadd.f32 1.0, %v3769_v44 }
 0x5d9   :  { %v7264_v14 = vpop.eup %5247 }
 0x5da   :  { %v5250_v29 = vpop.eup %5249  ;;  %v3748_v59 = vadd.f32 1.0, %v7264_v14  ;;  %v3771_v23 = vmul.f32 %v7255_v4, %v3770_v48  ;;  %v3754_v38 = vand.u32 2147483647, %v7264_v14 }
 0x5db   :  { %v3732_v3 = vmul.f32 0.6931472, %v5250_v29 }
 0x5dc   :  { %5263 = vlog2.f32 %v3748_v59  ;;  %vm3755_vm11 = vcmp.lt.f32.partialorder %v3754_v38, 0.0004427343 }
 0x5dd   :  { %v5252_v24 = vpop.eup %5251  ;;  %v3738_v22 = vsel %vm3737_vm3, %v3735_v8, %v3732_v3  ;;  %vm3773_vm3 = vcmp.lt.f32.partialorder %v3772_v43, 0.0004427343 }
 0x5de   :  { %v7269_v56 = vpop.eup %5253  ;;  %v3842_v30 = vadd.f32 1e-06, %v3738_v22  ;;  %v3714_v16 = vmul.f32 0.6931472, %v5252_v24 }
 0x5df   :  { %v7272_v6 = vpop.eup %5255  ;;  %v3775_v42 = vadd.f32 1.0, %v7269_v56  ;;  %v3778_v60 = vmul.f32 -0.5, %v7269_v56  ;;  %v3781_v20 = vand.u32 2147483647, %v7269_v56 }
 0x5e0   :  { %v5258_v1 = vpop.eup %5257  ;;  %v3971_v7 = vsel %vm3907_vm2, %v3842_v30, %v7066_v27  ;;  %v3720_v46 = vsel %vm3719_vm7, %v3717_v28, %v3714_v16  ;;  %v3757_v18 = vadd.f32 1.0, %v7272_v6  ;;  %v3751_v27 = vmul.f32 -0.5, %v7264_v14  ;;  %vm3910_vm7 = vmand %vm3848_vm14, %vm3013_vm9 }
 0x5e1   :  { %4035 = vst [vmem:[#allocation5 + $0x1d0] sm:$0xff] %v3971_v7  ;;  %v3840_v40 = vadd.f32 1e-06, %v3720_v46  ;;  %v3741_v17 = vmul.f32 0.6931472, %v5258_v1  ;;  %5265 = vlog2.f32 %v3775_v42  ;;  %v3760_v15 = vmul.f32 -0.5, %v7272_v6 }
 0x5e2   :  { %v5260_v57 = vpop.eup %5259  ;;  %5267 = vlog2.f32 %v3757_v18  ;;  %v3752_v10 = vadd.f32 1.0, %v3751_v27  ;;  %v3779_v21 = vadd.f32 1.0, %v3778_v60  ;;  %v3763_v29 = vand.u32 2147483647, %v7272_v6 }
 0x5e3   :  { %v3969_v25 = vsel %vm3905_vm13, %v3840_v40, %v7107_v41  ;;  %v3747_v51 = vsel %vm3746_vm15, %v3744_v45, %v3741_v17  ;;  %v3723_v63 = vmul.f32 0.6931472, %v5260_v57  ;;  %v3761_v39 = vadd.f32 1.0, %v3760_v15 }
 0x5e4   :  { %4033 = vst [vmem:[#allocation5 + $0x1c0] sm:$0xff] %v3969_v25  ;;  %v3843_v47 = vadd.f32 1e-06, %v3747_v51  ;;  %v3753_v9 = vmul.f32 %v7264_v14, %v3752_v10  ;;  %v3780_v3 = vmul.f32 %v7269_v56, %v3779_v21  ;;  %vm3782_vm0 = vcmp.lt.f32.partialorder %v3781_v20, 0.0004427343 }
 0x5e5   :  { %v5262_v50 = vpop.eup %5261  ;;  %v3729_v36 = vsel %vm3728_vm4, %v3726_v58, %v3723_v63  ;;  %v3762_v32 = vmul.f32 %v7272_v6, %v3761_v39  ;;  %vm3764_vm2 = vcmp.lt.f32.partialorder %v3763_v29, 0.0004427343 }
 0x5e6   :  { %v3972_v26 = vsel %vm3908_vm5, %v3843_v47, %v7132_v54  ;;  %v3841_v55 = vadd.f32 1e-06, %v3729_v36  ;;  %v3768_v41 = vmul.f32 0.6931472, %v5262_v50 }
 0x5e7   :  { %4036 = vst [vmem:[#allocation5 + $0x1d8] sm:$0xff] %v3972_v26 }
 0x5e8   :  { %v3970_v12 = vsel %vm3906_vm12, %v3841_v55, %v7142_v37  ;;  %v3774_v0 = vsel %vm3773_vm3, %v3771_v23, %v3768_v41 }
 0x5e9   :  { %v5264_v54 = vpop.eup %5263  ;;  %4034 = vst [vmem:[#allocation5 + $0x1c8] sm:$0xff] %v3970_v12  ;;  %v3846_v4 = vadd.f32 1e-06, %v3774_v0 }
 0x5ea   :  { %v3750_v11 = vmul.f32 0.6931472, %v5264_v54 }
 0x5eb   :  { %v3975_v2 = vsel %vm3911_vm1, %v3846_v4, %v7177_v5 }
 0x5ec   :  { %4039 = vst [vmem:[#allocation5 + $0x1f0] sm:$0xff] %v3975_v2  ;;  %v3756_v37 = vsel %vm3755_vm11, %v3753_v9, %v3750_v11 }
 0x5ed   :  { %v3844_v61 = vadd.f32 1e-06, %v3756_v37 }
 0x5ee   :  { %v5266_v31 = vpop.eup %5265 }
 0x5ef   :  { %v5268_v59 = vpop.eup %5267  ;;  %v3973_v14 = vsel %vm3909_vm10, %v3844_v61, %v7206_v62  ;;  %v3777_v5 = vmul.f32 0.6931472, %v5266_v31 }
 0x5f0   :  { %4037 = vst [vmem:[#allocation5 + $0x1e0] sm:$0xff] %v3973_v14  ;;  %v3759_v8 = vmul.f32 0.6931472, %v5268_v59 }
 0x5f1   :  { %v3783_v34 = vsel %vm3782_vm0, %v3780_v3, %v3777_v5 }
 0x5f2   :  { %v3847_v13 = vadd.f32 1e-06, %v3783_v34  ;;  %v3765_v24 = vsel %vm3764_vm2, %v3762_v32, %v3759_v8 }
 0x5f3   :  { %v3845_v62 = vadd.f32 1e-06, %v3765_v24 }
 0x5f4   :  { %v3976_v22 = vsel %vm3912_vm6, %v3847_v13, %v7212_v35 }
 0x5f5   :  { %4040 = vst [vmem:[#allocation5 + $0x1f8] sm:$0xff] %v3976_v22  ;;  %v3974_v44 = vsel %vm3910_vm7, %v3845_v62, %v7215_v33 }
 0x5f6   :  { %4038 = vst [vmem:[#allocation5 + $0x1e8] sm:$0xff] %v3974_v44 }
 0x5f7   :  { %5302 = shalt.err (!%p5299_p9)
}
 0x5f8   :  { %s5319_s22 = smov 128   ;;  %s5320_s23 = smov 8  }
 0x5f9   :  { %4052 = dma.vmem_to_hbm [thread:$0]  %s4047_s20, 8192, %s7340_s7, [#allocation4], %s5319_s22, %s5319_s22, %s5320_s23  }
 0x5fa   :  { %5313 = dma.done.wait [#allocation4], 8192  }
 0x5fb   :  { %5314 = vsyncadd [#allocation4], 4294959104 }
 0x5fc   :  { %4056 = vsyncpa [#allocation3], 1 }
 0x5fd   :  { %4057 = vsyncpa [#allocation4], 1 }

</bundles_post_ra>
